<compile_context>
chip_gen: v5e
topology: v5e:2x2
jax: 0.10.0
libtpu: 0.0.40
codegen_flags: <defaults>
</compile_context>

<pallas_src>
import jax
import jax.numpy as jnp
from jax.experimental import pallas as pl
from jax.experimental.pallas import tpu as pltpu


NEG_SLOPE = 0.2        # GATv2Conv default negative_slope
MASK_VAL = -1e30       # finite f32 sentinel (do not cast mask to bf16)


# ----------------------------------------------------------------------------
# Pallas kernel
# ----------------------------------------------------------------------------
def _gatv2_block(x, mask_flat, sum_mat, w_cat, b_cat, att_wide, bias):
    """One GATv2Conv layer (all heads), traced inline inside the fused kernel.

    x        : (N, Fin)
    mask_flat: (N*N, 1)   additive mask (0 edge / -1e30 no-edge), row k = i*N+j
    sum_mat  : (N, N*N)   0/1 neighbour-block summation matrix
    w_cat    : (Fin, 2d)  [W_l | W_r] concatenated            (d = heads*out_ch)
    b_cat    : (1, 2d)    [b_l | b_r]
    att_wide : (d, d)     block-diagonal; block h has every column == att_h
    bias     : (1, d)
    """
    n = x.shape[0]
    d = w_cat.shape[1] // 2

    # Single fused projection for both source (W_l) and target (W_r) sides.
    proj = jnp.dot(x, w_cat, preferred_element_type=jnp.float32) + b_cat  # (N, 2d)
    xl = proj[:, :d]          # W_l x  (source / message side)
    xr = proj[:, d:]          # W_r x  (target side)

    # Pairwise pre-activations for all heads at once: z[i,j,:] = xr[i] + xl[j].
    z = xr[:, None, :] + xl[None, :, :]                       # (N, N, d)
    z = jnp.where(z > 0, z, NEG_SLOPE * z)                    # LeakyReLU(0.2)

    # Per-head logits via one MXU matmul; block-diagonal att_wide broadcasts
    # each head's logit across its C output lanes so the softmax stays
    # lane-dense. Additive mask applied in the same pass (no selects).
    z2d = z.reshape(n * n, d)
    e2d = jnp.dot(z2d, att_wide, preferred_element_type=jnp.float32) + mask_flat
    e = e2d.reshape(n, n, d)                                  # (N, N, d)

    # Masked softmax over neighbours j (axis=1). Self-loops guarantee at least
    # one unmasked entry per row, so denom >= 1.
    m = jnp.max(e, axis=1, keepdims=True)                     # (N, 1, d)
    p = jnp.exp(e - m)                                        # masked -> exactly 0
    denom = jnp.sum(p, axis=1, keepdims=True)                 # (N, 1, d)
    alpha = p * pl.reciprocal(denom, approx=True)             # EUP reciprocal

    # Aggregate messages alpha_ij * (W_l x_j) with an MXU matmul.
    msg = (alpha * xl[None, :, :]).reshape(n * n, d)          # (N*N, d)
    out = jnp.dot(sum_mat, msg, preferred_element_type=jnp.float32)  # (N, d)
    return out + bias


def gat_fused_kernel(x_ref, mask_ref, smat_ref,
                     w1_ref, b1_ref, att1_ref, bias1_ref,
                     w2_ref, b2_ref, att2_ref, bias2_ref,
                     h_ref, logp_ref):
    """Fused gat1 -> ELU -> gat2 -> log_softmax, entirely in VMEM."""
    x = x_ref[...]
    mask_flat = mask_ref[...]
    smat = smat_ref[...]

    # ---- gat1 (heads=H, concat) + fused F.elu ----
    h1 = _gatv2_block(x, mask_flat, smat,
                      w1_ref[...], b1_ref[...], att1_ref[...], bias1_ref[...])
    h1 = jnp.where(h1 > 0, h1, jnp.exp(h1) - 1.0)

    # ---- gat2 (heads=1) ----
    h2 = _gatv2_block(h1, mask_flat, smat,
                      w2_ref[...], b2_ref[...], att2_ref[...], bias2_ref[...])
    h_ref[...] = h2

    # ---- log_softmax(dim=1) epilogue ----
    mrow = jnp.max(h2, axis=1, keepdims=True)
    s = h2 - mrow
    lse = jnp.log(jnp.sum(jnp.exp(s), axis=1, keepdims=True))
    logp_ref[...] = s - lse


# ----------------------------------------------------------------------------
# Wrappers (glue)
# ----------------------------------------------------------------------------
def _vmem():
    return pl.BlockSpec(memory_space=pltpu.MemorySpace.VMEM)


@jax.jit
def gat_forward(kp, x, mask_flat, sum_mat):
    n = x.shape[0]
    d_out = kp["bias2"].shape[1]
    return pl.pallas_call(
        gat_fused_kernel,
        out_shape=(jax.ShapeDtypeStruct((n, d_out), jnp.float32),
                   jax.ShapeDtypeStruct((n, d_out), jnp.float32)),
        in_specs=[_vmem()] * 11,
        out_specs=(_vmem(), _vmem()),
    )(x, mask_flat, sum_mat,
      kp["w1"], kp["b1"], kp["att1"], kp["bias1"],
      kp["w2"], kp["b2"], kp["att2"], kp["bias2"])


def build_mask(edge_index, num_nodes):
    """Additive attention mask: 0 for edge j->i (incl. self loops), -1e30 else."""
    src, dst = edge_index[0], edge_index[1]
    mask = jnp.full((num_nodes, num_nodes), MASK_VAL, jnp.float32)
    mask = mask.at[dst, src].set(0.0)
    idx = jnp.arange(num_nodes)
    mask = mask.at[idx, idx].set(0.0)            # add_self_loops=True
    return mask.reshape(num_nodes * num_nodes, 1)


def build_sum_mat(num_nodes):
    """0/1 matrix summing the N contiguous neighbour rows of each target node."""
    i = jnp.arange(num_nodes)[:, None]
    k = jnp.arange(num_nodes * num_nodes)[None, :]
    return (k // num_nodes == i).astype(jnp.float32)


def glorot(key, shape):
    fan_in, fan_out = shape[0], shape[1]
    limit = (6.0 / (fan_in + fan_out)) ** 0.5
    return jax.random.uniform(key, shape, jnp.float32, -limit, limit)


def init_gatv2_params(key, dim_in, out_ch, heads):
    k = jax.random.split(key, 3)
    d = heads * out_ch
    return {
        "wl": glorot(k[0], (dim_in, d)),
        "bl": jnp.zeros((1, d), jnp.float32),
        "wr": glorot(k[1], (dim_in, d)),
        "br": jnp.zeros((1, d), jnp.float32),
        # TODO(synk): PyG glorot-inits att over (1, heads, out_ch) (different fan);
        # irrelevant once trained weights are loaded.
        "att": glorot(k[2], (heads, out_ch)),
        "bias": jnp.zeros((1, d), jnp.float32),
    }


def prep_gatv2_params(p, heads, out_ch):
    """One-time repack into the kernel-friendly fused/block-diag layout."""
    d = heads * out_ch
    w_cat = jnp.concatenate([p["wl"], p["wr"]], axis=1)        # (Fin, 2d)
    b_cat = jnp.concatenate([p["bl"], p["br"]], axis=1)        # (1, 2d)
    att_wide = jnp.zeros((d, d), jnp.float32)                  # block-diag att
    for h in range(heads):
        blk = jnp.broadcast_to(p["att"][h][:, None], (out_ch, out_ch))
        att_wide = att_wide.at[h * out_ch:(h + 1) * out_ch,
                               h * out_ch:(h + 1) * out_ch].set(blk)
    return {"w": w_cat, "b": b_cat, "att": att_wide, "bias": p["bias"]}


# ----------------------------------------------------------------------------
# Main
# ----------------------------------------------------------------------------
if __name__ == "__main__":
    N, dim_in, dim_h, dim_out, heads = 16, 16, 8, 4, 8

    key = jax.random.PRNGKey(0)
    k_x, k1, k2 = jax.random.split(key, 3)

    x = jax.random.normal(k_x, (N, dim_in), jnp.float32)

    # Small deterministic graph: bidirectional ring + a few chords.
    ring = jnp.arange(N)
    src = jnp.concatenate([ring, (ring + 1) % N, jnp.array([0, 3, 5])])
    dst = jnp.concatenate([(ring + 1) % N, ring, jnp.array([7, 11, 13])])
    edge_index = jnp.stack([src, dst]).astype(jnp.int32)       # (2, E)

    mask_flat = build_mask(edge_index, N)                      # (N*N, 1)
    sum_mat = build_sum_mat(N)                                 # (N, N*N)

    p1 = init_gatv2_params(k1, dim_in, dim_h, heads)
    p2 = init_gatv2_params(k2, dim_h * heads, dim_out, 1)
    kp1 = prep_gatv2_params(p1, heads, dim_h)
    kp2 = prep_gatv2_params(p2, 1, dim_out)
    kernel_params = {
        "w1": kp1["w"], "b1": kp1["b"], "att1": kp1["att"], "bias1": kp1["bias"],
        "w2": kp2["w"], "b2": kp2["b"], "att2": kp2["att"], "bias2": kp2["bias"],
    }

    h, log_probs = gat_forward(kernel_params, x, mask_flat, sum_mat)
    jax.block_until_ready((h, log_probs))

    assert h.shape == (N, dim_out)
    assert log_probs.shape == (N, dim_out)
    assert bool(jnp.all(jnp.isfinite(h)))
    assert bool(jnp.all(jnp.isfinite(log_probs)))
    print("KERNEL_OK")
</pallas_src>

<mosaic_0001>
module attributes {stable_mosaic.version = 11 : i64} {
  func.func @gat_fused_kernel(%arg0: memref<16x16xf32, #tpu.memory_space<vmem>>, %arg1: memref<256x1xf32, #tpu.memory_space<vmem>>, %arg2: memref<16x256xf32, #tpu.memory_space<vmem>>, %arg3: memref<16x128xf32, #tpu.memory_space<vmem>>, %arg4: memref<1x128xf32, #tpu.memory_space<vmem>>, %arg5: memref<64x64xf32, #tpu.memory_space<vmem>>, %arg6: memref<1x64xf32, #tpu.memory_space<vmem>>, %arg7: memref<64x8xf32, #tpu.memory_space<vmem>>, %arg8: memref<1x8xf32, #tpu.memory_space<vmem>>, %arg9: memref<4x4xf32, #tpu.memory_space<vmem>>, %arg10: memref<1x4xf32, #tpu.memory_space<vmem>>, %arg11: memref<16x4xf32, #tpu.memory_space<vmem>>, %arg12: memref<16x4xf32, #tpu.memory_space<vmem>>) attributes {dimension_semantics = [], scalar_prefetch = 0 : i64, scratch_operands = 0 : i64, tpu.core_type = #tpu.core_type<tc>} {
    %c0 = arith.constant 0 : index
    %c0_0 = arith.constant 0 : index
    %0 = vector.load %arg0[%c0, %c0_0] : memref<16x16xf32, #tpu.memory_space<vmem>>, vector<16x16xf32>
    %c0_1 = arith.constant 0 : index
    %c0_2 = arith.constant 0 : index
    %1 = vector.load %arg1[%c0_1, %c0_2] : memref<256x1xf32, #tpu.memory_space<vmem>>, vector<256x1xf32>
    %c0_3 = arith.constant 0 : index
    %c0_4 = arith.constant 0 : index
    %2 = vector.load %arg2[%c0_3, %c0_4] : memref<16x256xf32, #tpu.memory_space<vmem>>, vector<16x256xf32>
    %c0_5 = arith.constant 0 : index
    %c0_6 = arith.constant 0 : index
    %3 = vector.load %arg3[%c0_5, %c0_6] : memref<16x128xf32, #tpu.memory_space<vmem>>, vector<16x128xf32>
    %c0_7 = arith.constant 0 : index
    %c0_8 = arith.constant 0 : index
    %4 = vector.load %arg4[%c0_7, %c0_8] : memref<1x128xf32, #tpu.memory_space<vmem>>, vector<1x128xf32>
    %c0_9 = arith.constant 0 : index
    %c0_10 = arith.constant 0 : index
    %5 = vector.load %arg5[%c0_9, %c0_10] : memref<64x64xf32, #tpu.memory_space<vmem>>, vector<64x64xf32>
    %c0_11 = arith.constant 0 : index
    %c0_12 = arith.constant 0 : index
    %6 = vector.load %arg6[%c0_11, %c0_12] : memref<1x64xf32, #tpu.memory_space<vmem>>, vector<1x64xf32>
    %cst = arith.constant dense<0.000000e+00> : vector<16x128xf32>
    %7 = tpu.matmul %0, %3, %cst {dimension_numbers = #tpu.dot_dimension_numbers<[1], [0], [0], [1], [0, 0, 1, 1], [], []>} : vector<16x16xf32>, vector<16x128xf32>, vector<16x128xf32> -> vector<16x128xf32>
    %8 = vector.broadcast %4 : vector<1x128xf32> to vector<16x128xf32>
    %9 = arith.addf %7, %8 : vector<16x128xf32>
    %10 = vector.extract_strided_slice %9 {offsets = [0, 0], sizes = [16, 64], strides = [1, 1]} : vector<16x128xf32> to vector<16x64xf32>
    %11 = vector.extract_strided_slice %9 {offsets = [0, 64], sizes = [16, 64], strides = [1, 1]} : vector<16x128xf32> to vector<16x64xf32>
    %12 = vector.shape_cast %11 : vector<16x64xf32> to vector<16x1x64xf32>
    %13 = vector.shape_cast %10 : vector<16x64xf32> to vector<1x16x64xf32>
    %14 = vector.broadcast %12 : vector<16x1x64xf32> to vector<16x16x64xf32>
    %15 = vector.broadcast %13 : vector<1x16x64xf32> to vector<16x16x64xf32>
    %16 = arith.addf %14, %15 : vector<16x16x64xf32>
    %cst_13 = arith.constant 0.000000e+00 : f32
    %17 = vector.broadcast %cst_13 : f32 to vector<16x16x64xf32>
    %18 = arith.cmpf ogt, %16, %17 : vector<16x16x64xf32>
    %cst_14 = arith.constant 2.000000e-01 : f32
    %19 = vector.broadcast %cst_14 : f32 to vector<16x16x64xf32>
    %20 = arith.mulf %19, %16 : vector<16x16x64xf32>
    %21 = arith.select %18, %16, %20 : vector<16x16x64xi1>, vector<16x16x64xf32>
    %22 = vector.shape_cast %21 : vector<16x16x64xf32> to vector<256x64xf32>
    %cst_15 = arith.constant dense<0.000000e+00> : vector<256x64xf32>
    %23 = tpu.matmul %22, %5, %cst_15 {dimension_numbers = #tpu.dot_dimension_numbers<[1], [0], [0], [1], [0, 0, 1, 1], [], []>} : vector<256x64xf32>, vector<64x64xf32>, vector<256x64xf32> -> vector<256x64xf32>
    %24 = vector.broadcast %1 : vector<256x1xf32> to vector<256x64xf32>
    %25 = arith.addf %23, %24 : vector<256x64xf32>
    %26 = vector.shape_cast %25 : vector<256x64xf32> to vector<16x16x64xf32>
    %cst_16 = arith.constant dense<0xFF800000> : vector<16x64xf32>
    %27 = vector.multi_reduction <maximumf>, %26, %cst_16 [1] : vector<16x16x64xf32> to vector<16x64xf32>
    %28 = vector.shape_cast %27 : vector<16x64xf32> to vector<16x1x64xf32>
    %29 = vector.broadcast %28 : vector<16x1x64xf32> to vector<16x16x64xf32>
    %30 = arith.subf %26, %29 : vector<16x16x64xf32>
    %31 = math.exp %30 : vector<16x16x64xf32>
    %cst_17 = arith.constant dense<0.000000e+00> : vector<16x64xf32>
    %32 = vector.multi_reduction <add>, %31, %cst_17 [1] : vector<16x16x64xf32> to vector<16x64xf32>
    %33 = vector.shape_cast %32 : vector<16x64xf32> to vector<16x1x64xf32>
    %34 = tpu.reciprocal %33 {approx = true} : vector<16x1x64xf32> -> vector<16x1x64xf32>
    %35 = vector.broadcast %34 : vector<16x1x64xf32> to vector<16x16x64xf32>
    %36 = arith.mulf %31, %35 : vector<16x16x64xf32>
    %37 = vector.shape_cast %10 : vector<16x64xf32> to vector<1x16x64xf32>
    %38 = vector.broadcast %37 : vector<1x16x64xf32> to vector<16x16x64xf32>
    %39 = arith.mulf %36, %38 : vector<16x16x64xf32>
    %40 = vector.shape_cast %39 : vector<16x16x64xf32> to vector<256x64xf32>
    %cst_18 = arith.constant dense<0.000000e+00> : vector<16x64xf32>
    %41 = tpu.matmul %2, %40, %cst_18 {dimension_numbers = #tpu.dot_dimension_numbers<[1], [0], [0], [1], [0, 0, 1, 1], [], []>} : vector<16x256xf32>, vector<256x64xf32>, vector<16x64xf32> -> vector<16x64xf32>
    %42 = vector.broadcast %6 : vector<1x64xf32> to vector<16x64xf32>
    %43 = arith.addf %41, %42 : vector<16x64xf32>
    %cst_19 = arith.constant 0.000000e+00 : f32
    %44 = vector.broadcast %cst_19 : f32 to vector<16x64xf32>
    %45 = arith.cmpf ogt, %43, %44 : vector<16x64xf32>
    %46 = math.exp %43 : vector<16x64xf32>
    %cst_20 = arith.constant 1.000000e+00 : f32
    %47 = vector.broadcast %cst_20 : f32 to vector<16x64xf32>
    %48 = arith.subf %46, %47 : vector<16x64xf32>
    %49 = arith.select %45, %43, %48 : vector<16x64xi1>, vector<16x64xf32>
    %c0_21 = arith.constant 0 : index
    %c0_22 = arith.constant 0 : index
    %50 = vector.load %arg7[%c0_21, %c0_22] : memref<64x8xf32, #tpu.memory_space<vmem>>, vector<64x8xf32>
    %c0_23 = arith.constant 0 : index
    %c0_24 = arith.constant 0 : index
    %51 = vector.load %arg8[%c0_23, %c0_24] : memref<1x8xf32, #tpu.memory_space<vmem>>, vector<1x8xf32>
    %c0_25 = arith.constant 0 : index
    %c0_26 = arith.constant 0 : index
    %52 = vector.load %arg9[%c0_25, %c0_26] : memref<4x4xf32, #tpu.memory_space<vmem>>, vector<4x4xf32>
    %c0_27 = arith.constant 0 : index
    %c0_28 = arith.constant 0 : index
    %53 = vector.load %arg10[%c0_27, %c0_28] : memref<1x4xf32, #tpu.memory_space<vmem>>, vector<1x4xf32>
    %cst_29 = arith.constant dense<0.000000e+00> : vector<16x8xf32>
    %54 = tpu.matmul %49, %50, %cst_29 {dimension_numbers = #tpu.dot_dimension_numbers<[1], [0], [0], [1], [0, 0, 1, 1], [], []>} : vector<16x64xf32>, vector<64x8xf32>, vector<16x8xf32> -> vector<16x8xf32>
    %55 = vector.broadcast %51 : vector<1x8xf32> to vector<16x8xf32>
    %56 = arith.addf %54, %55 : vector<16x8xf32>
    %57 = vector.extract_strided_slice %56 {offsets = [0, 0], sizes = [16, 4], strides = [1, 1]} : vector<16x8xf32> to vector<16x4xf32>
    %58 = vector.extract_strided_slice %56 {offsets = [0, 4], sizes = [16, 4], strides = [1, 1]} : vector<16x8xf32> to vector<16x4xf32>
    %59 = vector.shape_cast %58 : vector<16x4xf32> to vector<16x1x4xf32>
    %60 = vector.shape_cast %57 : vector<16x4xf32> to vector<1x16x4xf32>
    %61 = vector.broadcast %59 : vector<16x1x4xf32> to vector<16x16x4xf32>
    %62 = vector.broadcast %60 : vector<1x16x4xf32> to vector<16x16x4xf32>
    %63 = arith.addf %61, %62 : vector<16x16x4xf32>
    %cst_30 = arith.constant 0.000000e+00 : f32
    %64 = vector.broadcast %cst_30 : f32 to vector<16x16x4xf32>
    %65 = arith.cmpf ogt, %63, %64 : vector<16x16x4xf32>
    %cst_31 = arith.constant 2.000000e-01 : f32
    %66 = vector.broadcast %cst_31 : f32 to vector<16x16x4xf32>
    %67 = arith.mulf %66, %63 : vector<16x16x4xf32>
    %68 = arith.select %65, %63, %67 : vector<16x16x4xi1>, vector<16x16x4xf32>
    %69 = vector.shape_cast %68 : vector<16x16x4xf32> to vector<256x4xf32>
    %cst_32 = arith.constant dense<0.000000e+00> : vector<256x4xf32>
    %70 = tpu.matmul %69, %52, %cst_32 {dimension_numbers = #tpu.dot_dimension_numbers<[1], [0], [0], [1], [0, 0, 1, 1], [], []>} : vector<256x4xf32>, vector<4x4xf32>, vector<256x4xf32> -> vector<256x4xf32>
    %71 = vector.broadcast %1 : vector<256x1xf32> to vector<256x4xf32>
    %72 = arith.addf %70, %71 : vector<256x4xf32>
    %73 = vector.shape_cast %72 : vector<256x4xf32> to vector<16x16x4xf32>
    %cst_33 = arith.constant dense<0xFF800000> : vector<16x4xf32>
    %74 = vector.multi_reduction <maximumf>, %73, %cst_33 [1] : vector<16x16x4xf32> to vector<16x4xf32>
    %75 = vector.shape_cast %74 : vector<16x4xf32> to vector<16x1x4xf32>
    %76 = vector.broadcast %75 : vector<16x1x4xf32> to vector<16x16x4xf32>
    %77 = arith.subf %73, %76 : vector<16x16x4xf32>
    %78 = math.exp %77 : vector<16x16x4xf32>
    %cst_34 = arith.constant dense<0.000000e+00> : vector<16x4xf32>
    %79 = vector.multi_reduction <add>, %78, %cst_34 [1] : vector<16x16x4xf32> to vector<16x4xf32>
    %80 = vector.shape_cast %79 : vector<16x4xf32> to vector<16x1x4xf32>
    %81 = tpu.reciprocal %80 {approx = true} : vector<16x1x4xf32> -> vector<16x1x4xf32>
    %82 = vector.broadcast %81 : vector<16x1x4xf32> to vector<16x16x4xf32>
    %83 = arith.mulf %78, %82 : vector<16x16x4xf32>
    %84 = vector.shape_cast %57 : vector<16x4xf32> to vector<1x16x4xf32>
    %85 = vector.broadcast %84 : vector<1x16x4xf32> to vector<16x16x4xf32>
    %86 = arith.mulf %83, %85 : vector<16x16x4xf32>
    %87 = vector.shape_cast %86 : vector<16x16x4xf32> to vector<256x4xf32>
    %cst_35 = arith.constant dense<0.000000e+00> : vector<16x4xf32>
    %88 = tpu.matmul %2, %87, %cst_35 {dimension_numbers = #tpu.dot_dimension_numbers<[1], [0], [0], [1], [0, 0, 1, 1], [], []>} : vector<16x256xf32>, vector<256x4xf32>, vector<16x4xf32> -> vector<16x4xf32>
    %89 = vector.broadcast %53 : vector<1x4xf32> to vector<16x4xf32>
    %90 = arith.addf %88, %89 : vector<16x4xf32>
    %c0_36 = arith.constant 0 : index
    %c0_37 = arith.constant 0 : index
    %91 = vector.load %arg11[%c0_36, %c0_37] : memref<16x4xf32, #tpu.memory_space<vmem>>, vector<16x4xf32>
    tpu.vector_store %arg11[%c0_36, %c0_37], %90 {strides = array<i32>} : memref<16x4xf32, #tpu.memory_space<vmem>>, vector<16x4xf32>,
    %cst_38 = arith.constant dense<0xFF800000> : vector<16xf32>
    %92 = vector.multi_reduction <maximumf>, %90, %cst_38 [1] : vector<16x4xf32> to vector<16xf32>
    %93 = vector.shape_cast %92 : vector<16xf32> to vector<16x1xf32>
    %94 = vector.broadcast %93 : vector<16x1xf32> to vector<16x4xf32>
    %95 = arith.subf %90, %94 : vector<16x4xf32>
    %96 = math.exp %95 : vector<16x4xf32>
    %cst_39 = arith.constant dense<0.000000e+00> : vector<16xf32>
    %97 = vector.multi_reduction <add>, %96, %cst_39 [1] : vector<16x4xf32> to vector<16xf32>
    %98 = vector.shape_cast %97 : vector<16xf32> to vector<16x1xf32>
    %99 = math.log %98 : vector<16x1xf32>
    %100 = vector.broadcast %99 : vector<16x1xf32> to vector<16x4xf32>
    %101 = arith.subf %95, %100 : vector<16x4xf32>
    %c0_40 = arith.constant 0 : index
    %c0_41 = arith.constant 0 : index
    %102 = vector.load %arg12[%c0_40, %c0_41] : memref<16x4xf32, #tpu.memory_space<vmem>>, vector<16x4xf32>
    tpu.vector_store %arg12[%c0_40, %c0_41], %101 {strides = array<i32>} : memref<16x4xf32, #tpu.memory_space<vmem>>, vector<16x4xf32>,
    return
  }
}

</mosaic_0001>

<bundles_post_ra>
// kernel: gat_forward.1
= control target key start
LH: loop header
LB: loop body
LE: loop exit
PB: predicated region body
PF: predicated region fallthrough
CT: control target
= control target key end

     0   :  { %vm93_vm0 = vcmask 130048   ;;  %s2615_s27 = smov 4   ;;  %s3990_s3 = inlined_call_operand.vmem [shape: f32[16,128], index: 3, kind: input, shape index: {}]   ;;  %s3991_s0 = inlined_call_operand.vmem [shape: f32[16,16], index: 0, kind: input, shape index: {}]   ;;  %s3992_s4 = inlined_call_operand.vmem [shape: f32[1,128], index: 4, kind: input, shape index: {}]   ;;  %s3993_s5 = inlined_call_operand.vmem [shape: f32[64,64], index: 5, kind: input, shape index: {}]   ;;  %s3994_s1 = inlined_call_operand.vmem [shape: f32[256,1], index: 1, kind: input, shape index: {}]   ;;  %s3995_s6 = inlined_call_operand.vmem [shape: f32[1,64], index: 6, kind: input, shape index: {}]   ;;  %s3996_s2 = inlined_call_operand.vmem [shape: f32[16,256], index: 2, kind: input, shape index: {}]   ;;  %s3997_s8 = inlined_call_operand.vmem [shape: f32[1,8], index: 8, kind: input, shape index: {}]   ;;  %s3998_s7 = inlined_call_operand.vmem [shape: f32[64,8], index: 7, kind: input, shape index: {}]   ;;  %s3999_s9 = inlined_call_operand.vmem [shape: f32[4,4], index: 9, kind: input, shape index: {}]   ;;  %s4000_s10 = inlined_call_operand.vmem [shape: f32[1,4], index: 10, kind: input, shape index: {}]   ;;  %s4001_s11 = inlined_call_operand.vmem [shape: f32[16,4], index: 11, kind: output, shape index: {0}]   ;;  %s4002_s12 = inlined_call_operand.vmem [shape: f32[16,4], index: 12, kind: output, shape index: {1}]  }
   0x1   :  { %v79_v0 = vld [vmem:[%s3990_s3 + $0x8] sm:$0xff]  ;;  %v78_v1 = vld [vmem:[%s3990_s3] sm:$0xff]  ;;  %s2613_s3 = smov 64  }
   0x2   :  { %114 = vmatpush.msra.mxu3 %v79_v0  ;;  %v40_v2 = vld [vmem:[%s3991_s0] sm:$0xff]  ;;  %v41_v3 = vld [vmem:[%s3991_s0 + $0x8] sm:$0xff] }
   0x3   :  { %v2401_v4 = vld [vmem:[%s3992_s4] ss:$0 sm:$0xff] }
   0x4   :  { %115 = vmatpush.msra.mxu3 %v78_v1 }
   0x5   :  { %2314 = vmatmul.msk.f32.vlgmr.msra.gmra.mxu3 %vm93_vm0, %v40_v2 }
   0xd   :  { %2315 = vmatmul.msk.f32.gmra.mxu3 %vm93_vm0, %v41_v3 }
  0x88   :  { %v117_v5 = vpop.f32.mrf.mxu3 }
  0x89   :  { %v2697_v6 = vadd.f32 %v2401_v4, %v117_v5 }
  0x8b   :  { %171 = vrot.lane.b32.xlu0 %v2697_v6, %s2613_s3  ;;  %v126_v9 = vrot.slane %v2697_v6, 2  ;;  %v125_v10 = vrot.slane %v2697_v6, 1  ;;  %v139_v11 = vperm.slane %v2697_v6, 0  ;;  %v127_v25 = vrot.slane %v2697_v6, 3 }
  0x8c   :  { %v129_v54 = vrot.slane %v2697_v6, 5  ;;  %v128_v55 = vrot.slane %v2697_v6, 4 }
  0x8d   :  { %v141_v12 = vperm.slane %v126_v9, 0  ;;  %v140_v13 = vperm.slane %v125_v10, 0  ;;  %v142_v31 = vperm.slane %v127_v25, 0 }
  0x8e   :  { %v144_v59 = vperm.slane %v129_v54, 0  ;;  %v143_v60 = vperm.slane %v128_v55, 0 }
  0x90   :  { %v120_v7 = vpop.f32.mrf.mxu3 }
  0x91   :  { %v2701_v8 = vadd.f32 %v2401_v4, %v120_v7 }
  0x93   :  { %173 = vrot.lane.b32.xlu0 %v2701_v8, %s2613_s3  ;;  %v133_v18 = vrot.slane %v2701_v8, 2  ;;  %v135_v41 = vrot.slane %v2701_v8, 4  ;;  %v134_v42 = vrot.slane %v2701_v8, 3  ;;  %v136_v3 = vrot.slane %v2701_v8, 5 }
  0x94   :  { %v132_v55 = vrot.slane %v2701_v8, 1 }
  0x95   :  { %v149_v26 = vperm.slane %v133_v18, 0  ;;  %v151_v46 = vperm.slane %v135_v41, 0  ;;  %v150_v47 = vperm.slane %v134_v42, 0  ;;  %v152_v9 = vperm.slane %v136_v3, 0 }
  0xfd   :  { %v2708_v14 = vpop.permute.xlu0 %171 }
  0xfe   :  { %v177_v15 = vadd.f32 %v2708_v14, %v139_v11  ;;  %v181_v16 = vadd.f32 %v2708_v14, %v141_v12  ;;  %v179_v17 = vadd.f32 %v2708_v14, %v140_v13  ;;  %v197_v37 = vadd.f32 %v2708_v14, %v149_v26 }
  0xff   :  { %v183_v50 = vadd.f32 %v2708_v14, %v142_v31  ;;  %v201_v51 = vadd.f32 %v2708_v14, %v151_v46  ;;  %v199_v53 = vadd.f32 %v2708_v14, %v150_v47  ;;  %v187_v0 = vadd.f32 %v2708_v14, %v144_v59 }
 0x100   :  { %vm209_vm1 = vcmp.gt.f32.partialorder %v177_v15, 0.0  ;;  %v241_v19 = vmul.f32 0.2, %v177_v15  ;;  %vm213_vm2 = vcmp.gt.f32.partialorder %v181_v16, 0.0  ;;  %v245_v20 = vmul.f32 0.2, %v181_v16 }
 0x101   :  { %vm211_vm3 = vcmp.gt.f32.partialorder %v179_v17, 0.0  ;;  %v243_v21 = vmul.f32 0.2, %v179_v17  ;;  %v261_v43 = vmul.f32 0.2, %v197_v37  ;;  %vm229_vm7 = vcmp.gt.f32.partialorder %v197_v37, 0.0 }
 0x102   :  { %v273_v22 = vsel %vm209_vm1, %v177_v15, %v241_v19  ;;  %v277_v23 = vsel %vm213_vm2, %v181_v16, %v245_v20  ;;  %v247_v56 = vmul.f32 0.2, %v183_v50  ;;  %v265_v57 = vmul.f32 0.2, %v201_v51 }
 0x103   :  { %497 = vrot.lane.b32.xlu1 %v273_v22, %s2613_s3  ;;  %505 = vrot.lane.b32.xlu0 %v277_v23, %s2613_s3  ;;  %v275_v24 = vsel %vm211_vm3, %v179_v17, %v243_v21  ;;  %v293_v48 = vsel %vm229_vm7, %v197_v37, %v261_v43  ;;  %vm215_vm10 = vcmp.gt.f32.partialorder %v183_v50, 0.0  ;;  %vm233_vm11 = vcmp.gt.f32.partialorder %v201_v51, 0.0 }
 0x104   :  { %501 = vrot.lane.b32.xlu2 %v275_v24, %s2613_s3  ;;  %v263_v58 = vmul.f32 0.2, %v199_v53  ;;  %vm231_vm12 = vcmp.gt.f32.partialorder %v199_v53, 0.0  ;;  %v279_v61 = vsel %vm215_vm10, %v183_v50, %v247_v56  ;;  %v297_v62 = vsel %vm233_vm11, %v201_v51, %v265_v57 }
 0x105   :  { %v2718_v27 = vpop.permute.xlu0 %173  ;;  %v185_v2 = vadd.f32 %v2708_v14, %v143_v60  ;;  %v251_v5 = vmul.f32 0.2, %v187_v0  ;;  %vm219_vm14 = vcmp.gt.f32.partialorder %v187_v0, 0.0  ;;  %v130_v17 = vrot.slane %v2697_v6, 6 }
 0x106   :  { %v178_v28 = vadd.f32 %v2718_v27, %v139_v11  ;;  %v198_v29 = vadd.f32 %v2718_v27, %v149_v26  ;;  %v180_v30 = vadd.f32 %v2718_v27, %v140_v13  ;;  %v184_v38 = vadd.f32 %v2718_v27, %v142_v31 }
 0x107   :  { %v182_v40 = vadd.f32 %v2718_v27, %v141_v12  ;;  %v200_v63 = vadd.f32 %v2718_v27, %v150_v47  ;;  %v295_v1 = vsel %vm231_vm12, %v199_v53, %v263_v58  ;;  %v249_v7 = vmul.f32 0.2, %v185_v2 }
 0x108   :  { %vm210_vm4 = vcmp.gt.f32.partialorder %v178_v28, 0.0  ;;  %v242_v32 = vmul.f32 0.2, %v178_v28  ;;  %vm230_vm5 = vcmp.gt.f32.partialorder %v198_v29, 0.0  ;;  %v262_v33 = vmul.f32 0.2, %v198_v29 }
 0x109   :  { %vm212_vm6 = vcmp.gt.f32.partialorder %v180_v30, 0.0  ;;  %v244_v34 = vmul.f32 0.2, %v180_v30  ;;  %v248_v44 = vmul.f32 0.2, %v184_v38  ;;  %vm216_vm8 = vcmp.gt.f32.partialorder %v184_v38, 0.0 }
 0x10a   :  { %v274_v35 = vsel %vm210_vm4, %v178_v28, %v242_v32  ;;  %v294_v36 = vsel %vm230_vm5, %v198_v29, %v262_v33  ;;  %v246_v45 = vmul.f32 0.2, %v182_v40  ;;  %vm214_vm9 = vcmp.gt.f32.partialorder %v182_v40, 0.0 }
 0x10b   :  { %499 = vrot.lane.b32.xlu1 %v274_v35, %s2613_s3  ;;  %539 = vrot.lane.b32.xlu0 %v294_v36, %s2613_s3  ;;  %v276_v39 = vsel %vm212_vm6, %v180_v30, %v244_v34  ;;  %v280_v49 = vsel %vm216_vm8, %v184_v38, %v248_v44  ;;  %v264_v4 = vmul.f32 0.2, %v200_v63  ;;  %vm232_vm13 = vcmp.gt.f32.partialorder %v200_v63, 0.0 }
 0x10c   :  { %503 = vrot.lane.b32.xlu2 %v276_v39, %s2613_s3  ;;  %v278_v52 = vsel %vm214_vm9, %v182_v40, %v246_v45  ;;  %vm217_vm15 = vcmp.gt.f32.partialorder %v185_v2, 0.0  ;;  %v283_v11 = vsel %vm219_vm14, %v187_v0, %v251_v5  ;;  %v186_v12 = vadd.f32 %v2718_v27, %v143_v60  ;;  %v87_v5 = vld [vmem:[%s3993_s5 + $0x30] sm:$0xff] }
 0x10d   :  { %v296_v10 = vsel %vm232_vm13, %v200_v63, %v264_v4  ;;  %v204_v13 = vadd.f32 %v2718_v27, %v152_v9  ;;  %v281_v15 = vsel %vm217_vm15, %v185_v2, %v249_v7  ;;  %v202_v16 = vadd.f32 %v2718_v27, %v151_v46  ;;  %v88_v4 = vld [vmem:[%s3993_s5 + $0x38] sm:$0xff] }
 0x10e   :  { %v250_v18 = vmul.f32 0.2, %v186_v12  ;;  %vm218_vm0 = vcmp.gt.f32.partialorder %v186_v12, 0.0  ;;  %v145_v21 = vperm.slane %v130_v17, 0  ;;  %v203_v24 = vadd.f32 %v2708_v14, %v152_v9  ;;  %634 = vmatpush.msra.mxu1 %v88_v4  ;;  %2385 = vmatpush.msrb.mxu3 %v88_v4  ;;  %v86_v9 = vld [vmem:[%s3993_s5 + $0x28] sm:$0xff]  ;;  %v44_v4 = vld [vmem:[%s3994_s1 + $0x10] sm:$0xff] }
 0x10f   :  { %v268_v19 = vmul.f32 0.2, %v204_v13  ;;  %vm236_vm1 = vcmp.gt.f32.partialorder %v204_v13, 0.0  ;;  %v266_v20 = vmul.f32 0.2, %v202_v16  ;;  %vm234_vm2 = vcmp.gt.f32.partialorder %v202_v16, 0.0 }
 0x110   :  { %v282_v22 = vsel %vm218_vm0, %v186_v12, %v250_v18  ;;  %v190_v25 = vadd.f32 %v2718_v27, %v145_v21  ;;  %v188_v28 = vadd.f32 %v2718_v27, %v144_v59  ;;  %v138_v29 = vrot.slane %v2701_v8, 7  ;;  %635 = vmatpush.msra.mxu1 %v87_v5  ;;  %2386 = vmatpush.msrb.mxu3 %v87_v5 }
 0x111   :  { %v300_v23 = vsel %vm236_vm1, %v204_v13, %v268_v19  ;;  %v298_v26 = vsel %vm234_vm2, %v202_v16, %v266_v20  ;;  %v137_v30 = vrot.slane %v2701_v8, 6  ;;  %v2614_v31 = vmov 0   ;;  %v85_v16 = vld [vmem:[%s3993_s5 + $0x20] sm:$0xff]  ;;  %v72_v19 = vld [vmem:[%s3994_s1 + $0xf0] sm:$0xff]  ;;  %v82_v20 = vld [vmem:[%s3993_s5 + $0x8] sm:$0xff] }
 0x112   :  { %2400 = vset.pattern.permute.xlu0 %v2614_v31  ;;  %2398 = vset.pattern.permute.xlu1 %v2614_v31  ;;  %v267_v32 = vmul.f32 0.2, %v203_v24  ;;  %v254_v33 = vmul.f32 0.2, %v190_v25  ;;  %vm235_vm3 = vcmp.gt.f32.partialorder %v203_v24, 0.0  ;;  %vm222_vm4 = vcmp.gt.f32.partialorder %v190_v25, 0.0 }
 0x113   :  { %537 = vrot.lane.b32.xlu1 %v293_v48, %s2613_s3  ;;  %511 = vrot.lane.b32.xlu0 %v280_v49, %s2613_s3  ;;  %v252_v34 = vmul.f32 0.2, %v188_v28  ;;  %vm220_vm5 = vcmp.gt.f32.partialorder %v188_v28, 0.0  ;;  %v154_v35 = vperm.slane %v138_v29, 0  ;;  %v153_v36 = vperm.slane %v137_v30, 0  ;;  %v73_v29 = vld [vmem:[%s3994_s1 + $0xf8] sm:$0xff] }
 0x114   :  { %507 = vrot.lane.b32.xlu2 %v278_v52, %s2613_s3  ;;  %v299_v37 = vsel %vm235_vm3, %v203_v24, %v267_v32  ;;  %v286_v38 = vsel %vm222_vm4, %v190_v25, %v254_v33  ;;  %v189_v39 = vadd.f32 %v2708_v14, %v145_v21  ;;  %v131_v43 = vrot.slane %v2697_v6, 7  ;;  %636 = vmatpush.msra.mxu1 %v86_v9  ;;  %v56_v24 = vld [vmem:[%s3994_s1 + $0x70] sm:$0xff]  ;;  %v71_v25 = vld [vmem:[%s3994_s1 + $0xe8] sm:$0xff] }
 0x115   :  { %2399 = vset.pattern.permute.xlu2 %v2614_v31  ;;  %v207_v40 = vadd.f32 %v2708_v14, %v154_v35  ;;  %v284_v41 = vsel %vm220_vm5, %v188_v28, %v252_v34  ;;  %v205_v42 = vadd.f32 %v2708_v14, %v153_v36  ;;  %v147_v47 = vperm.slane %v2701_v8, 0  ;;  %2387 = vmatpush.msrb.mxu3 %v86_v9  ;;  %v68_v30 = vld [vmem:[%s3994_s1 + $0xd0] sm:$0xff]  ;;  %v54_v31 = vld [vmem:[%s3994_s1 + $0x60] sm:$0xff]  ;;  %v55_v33 = vld [vmem:[%s3994_s1 + $0x68] sm:$0xff] }
 0x116   :  { %v253_v44 = vmul.f32 0.2, %v189_v39  ;;  %vm221_vm6 = vcmp.gt.f32.partialorder %v189_v39, 0.0  ;;  %v146_v48 = vperm.slane %v131_v43, 0  ;;  %v206_v51 = vadd.f32 %v2718_v27, %v153_v36  ;;  %637 = vmatpush.msra.mxu1 %v85_v16  ;;  %v51_v34 = vld [vmem:[%s3994_s1 + $0x48] sm:$0xff]  ;;  %v69_v43 = vld [vmem:[%s3994_s1 + $0xd8] sm:$0xff] }
 0x117   :  { %v271_v45 = vmul.f32 0.2, %v207_v40  ;;  %vm239_vm7 = vcmp.gt.f32.partialorder %v207_v40, 0.0  ;;  %v269_v46 = vmul.f32 0.2, %v205_v42  ;;  %vm237_vm8 = vcmp.gt.f32.partialorder %v205_v42, 0.0  ;;  %2388 = vmatpush.msrb.mxu3 %v85_v16 }
 0x118   :  { %v285_v49 = vsel %vm221_vm6, %v189_v39, %v253_v44  ;;  %v193_v52 = vadd.f32 %v2708_v14, %v147_v47  ;;  %v191_v54 = vadd.f32 %v2708_v14, %v146_v48  ;;  %v270_v56 = vmul.f32 0.2, %v206_v51  ;;  %v53_v39 = vld [vmem:[%s3994_s1 + $0x58] sm:$0xff] }
 0x119   :  { %v303_v50 = vsel %vm239_vm7, %v207_v40, %v271_v45  ;;  %v301_v53 = vsel %vm237_vm8, %v205_v42, %v269_v46  ;;  %vm238_vm9 = vcmp.gt.f32.partialorder %v206_v51, 0.0  ;;  %v148_v59 = vperm.slane %v132_v55, 0  ;;  %v65_v44 = vld [vmem:[%s3994_s1 + $0xb8] sm:$0xff]  ;;  %v50_v45 = vld [vmem:[%s3994_s1 + $0x40] sm:$0xff] }
 0x11a   :  { %v257_v57 = vmul.f32 0.2, %v193_v52  ;;  %vm225_vm10 = vcmp.gt.f32.partialorder %v193_v52, 0.0  ;;  %v255_v58 = vmul.f32 0.2, %v191_v54  ;;  %vm223_vm11 = vcmp.gt.f32.partialorder %v191_v54, 0.0 }
 0x11b   :  { %509 = vrot.lane.b32.xlu1 %v279_v61, %s2613_s3  ;;  %545 = vrot.lane.b32.xlu0 %v297_v62, %s2613_s3  ;;  %v302_v60 = vsel %vm238_vm9, %v206_v51, %v270_v56  ;;  %v192_v62 = vadd.f32 %v2718_v27, %v146_v48  ;;  %v196_v63 = vadd.f32 %v2718_v27, %v148_v59  ;;  %vm561_vm1 = vcmask 523264   ;;  %v67_v51 = vld [vmem:[%s3994_s1 + $0xc8] sm:$0xff]  ;;  %v49_v55 = vld [vmem:[%s3994_s1 + $0x38] sm:$0xff] }
 0x11c   :  { %541 = vrot.lane.b32.xlu2 %v295_v1, %s2613_s3  ;;  %v289_v61 = vsel %vm225_vm10, %v193_v52, %v257_v57  ;;  %v287_v0 = vsel %vm223_vm11, %v191_v54, %v255_v58  ;;  %v208_v1 = vadd.f32 %v2718_v27, %v154_v35  ;;  %v194_v12 = vadd.f32 %v2718_v27, %v147_v47  ;;  %v84_v27 = vld [vmem:[%s3993_s5 + $0x18] sm:$0xff]  ;;  %v70_v35 = vld [vmem:[%s3994_s1 + $0xe0] sm:$0xff]  ;;  %v64_v57 = vld [vmem:[%s3994_s1 + $0xb0] sm:$0xff] }
 0x11d   :  { %v256_v2 = vmul.f32 0.2, %v192_v62  ;;  %v260_v3 = vmul.f32 0.2, %v196_v63  ;;  %vm224_vm12 = vcmp.gt.f32.partialorder %v192_v62, 0.0  ;;  %vm228_vm13 = vcmp.gt.f32.partialorder %v196_v63, 0.0  ;;  %638 = vmatpush.msra.mxu1 %v84_v27  ;;  %2389 = vmatpush.msrb.mxu3 %v84_v27 }
 0x11e   :  { %v272_v7 = vmul.f32 0.2, %v208_v1  ;;  %vm240_vm14 = vcmp.gt.f32.partialorder %v208_v1, 0.0  ;;  %v258_v17 = vmul.f32 0.2, %v194_v12  ;;  %vm226_vm15 = vcmp.gt.f32.partialorder %v194_v12, 0.0 }
 0x11f   :  { %v45_v56 = vld [vmem:[%s3994_s1 + $0x18] sm:$0xff] }
 0x120   :  { %v304_v13 = vsel %vm240_vm14, %v208_v1, %v272_v7  ;;  %v290_v21 = vsel %vm226_vm15, %v194_v12, %v258_v17 }
 0x123   :  { %543 = vrot.lane.b32.xlu1 %v296_v10, %s2613_s3  ;;  %517 = vrot.lane.b32.xlu0 %v283_v11, %s2613_s3  ;;  %v288_v10 = vsel %vm224_vm12, %v192_v62, %v256_v2  ;;  %v292_v11 = vsel %vm228_vm13, %v196_v63, %v260_v3  ;;  %v42_v62 = vld [vmem:[%s3994_s1] sm:$0xff]  ;;  %v47_v63 = vld [vmem:[%s3994_s1 + $0x28] sm:$0xff] }
 0x124   :  { %513 = vrot.lane.b32.xlu2 %v281_v15, %s2613_s3  ;;  %v195_v15 = vadd.f32 %v2708_v14, %v148_v59  ;;  %v83_v14 = vld [vmem:[%s3993_s5 + $0x10] sm:$0xff]  ;;  %v63_v3 = vld [vmem:[%s3994_s1 + $0xa8] sm:$0xff] }
 0x125   :  { %639 = vmatpush.msra.mxu1 %v83_v14  ;;  %2390 = vmatpush.msrb.mxu3 %v83_v14 }
 0x126   :  { %v259_v18 = vmul.f32 0.2, %v195_v15  ;;  %vm227_vm0 = vcmp.gt.f32.partialorder %v195_v15, 0.0 }
 0x127   :  { %640 = vmatpush.msra.mxu1 %v82_v20  ;;  %2391 = vmatpush.msrb.mxu3 %v82_v20 }
 0x12b   :  { %515 = vrot.lane.b32.xlu1 %v282_v22, %s2613_s3  ;;  %551 = vrot.lane.b32.xlu0 %v300_v23, %s2613_s3  ;;  %v291_v22 = vsel %vm227_vm0, %v195_v15, %v259_v18  ;;  %v81_v23 = vld [vmem:[%s3993_s5] sm:$0xff]  ;;  %v43_v15 = vld [vmem:[%s3994_s1 + $0x8] sm:$0xff] }
 0x12c   :  { %547 = vrot.lane.b32.xlu2 %v298_v26, %s2613_s3  ;;  %641 = vmatpush.msra.mxu1 %v81_v23  ;;  %v57_v26 = vld [vmem:[%s3994_s1 + $0x78] sm:$0xff] }
 0x12d   :  { %2392 = vmatpush.msrb.mxu3 %v81_v23  ;;  %v61_v23 = vld [vmem:[%s3994_s1 + $0x98] sm:$0xff] }
 0x133   :  { %549 = vrot.lane.b32.xlu1 %v299_v37, %s2613_s3  ;;  %523 = vrot.lane.b32.xlu0 %v286_v38, %s2613_s3  ;;  %v52_v37 = vld [vmem:[%s3994_s1 + $0x50] sm:$0xff] }
 0x134   :  { %519 = vrot.lane.b32.xlu2 %v284_v41, %s2613_s3  ;;  %v48_v38 = vld [vmem:[%s3994_s1 + $0x30] sm:$0xff] }
 0x13b   :  { %521 = vrot.lane.b32.xlu1 %v285_v49, %s2613_s3  ;;  %557 = vrot.lane.b32.xlu0 %v303_v50, %s2613_s3  ;;  %v66_v49 = vld [vmem:[%s3994_s1 + $0xc0] sm:$0xff] }
 0x13c   :  { %553 = vrot.lane.b32.xlu2 %v301_v53, %s2613_s3  ;;  %v62_v50 = vld [vmem:[%s3994_s1 + $0xa0] sm:$0xff] }
 0x143   :  { %555 = vrot.lane.b32.xlu1 %v302_v60, %s2613_s3  ;;  %529 = vrot.lane.b32.xlu0 %v289_v61, %s2613_s3  ;;  %v46_v61 = vld [vmem:[%s3994_s1 + $0x20] sm:$0xff] }
 0x144   :  { %525 = vrot.lane.b32.xlu2 %v287_v0, %s2613_s3 }
 0x14b   :  { %527 = vrot.lane.b32.xlu1 %v288_v10, %s2613_s3  ;;  %535 = vrot.lane.b32.xlu0 %v292_v11, %s2613_s3  ;;  %v60_v10 = vld [vmem:[%s3994_s1 + $0x90] sm:$0xff] }
 0x14c   :  { %559 = vrot.lane.b32.xlu2 %v304_v13, %s2613_s3 }
 0x153   :  { %531 = vrot.lane.b32.xlu1 %v290_v21, %s2613_s3  ;;  %457 = vperm.xlu0 %2400, %v72_v19   ;;  %v59_v19 = vld [vmem:[%s3994_s1 + $0x88] sm:$0xff] }
 0x154   :  { %533 = vrot.lane.b32.xlu2 %v291_v22, %s2613_s3 }
 0x15b   :  { %377 = vperm.xlu1 %2398, %v56_v24   ;;  %452 = vperm.xlu0 %2400, %v71_v25  }
 0x15c   :  { %382 = vperm.xlu2 %2399, %v57_v26  }
 0x15e   :  { %v502_v28 = vpop.permute.xlu2 %501 }
 0x163   :  { %462 = vperm.xlu1 %2398, %v73_v29   ;;  %437 = vperm.xlu0 %2400, %v68_v30  }
 0x164   :  { %367 = vperm.xlu2 %2399, %v54_v31  }
 0x166   :  { %v504_v32 = vpop.permute.xlu2 %503 }
 0x16b   :  { %372 = vperm.xlu1 %2398, %v55_v33   ;;  %352 = vperm.xlu0 %2400, %v51_v34  }
 0x16c   :  { %447 = vperm.xlu2 %2399, %v70_v35  }
 0x16e   :  { %v508_v36 = vpop.permute.xlu2 %507 }
 0x173   :  { %357 = vperm.xlu1 %2398, %v52_v37   ;;  %337 = vperm.xlu0 %2400, %v48_v38  }
 0x174   :  { %362 = vperm.xlu2 %2399, %v53_v39  }
 0x175   :  { %v498_v40 = vpop.permute.xlu1 %497  ;;  %v506_v41 = vpop.permute.xlu0 %505 }
 0x176   :  { %v542_v42 = vpop.permute.xlu2 %541  ;;  %2316 = vmatmul.msk.f32.vlgmr.msra.gmra.mxu1 %vm561_vm1, %v498_v40 }
 0x17b   :  { %442 = vperm.xlu1 %2398, %v69_v43   ;;  %422 = vperm.xlu0 %2400, %v65_v44  }
 0x17c   :  { %347 = vperm.xlu2 %2399, %v50_v45  }
 0x17d   :  { %v500_v46 = vpop.permute.xlu1 %499  ;;  %v540_v47 = vpop.permute.xlu0 %539 }
 0x17e   :  { %v514_v48 = vpop.permute.xlu2 %513  ;;  %2317 = vmatmul.msk.f32.gmra.mxu1 %vm561_vm1, %v500_v46 }
 0x183   :  { %427 = vperm.xlu1 %2398, %v66_v49   ;;  %407 = vperm.xlu0 %2400, %v62_v50  }
 0x184   :  { %432 = vperm.xlu2 %2399, %v67_v51  }
 0x185   :  { %v538_v52 = vpop.permute.xlu1 %537  ;;  %v512_v53 = vpop.permute.xlu0 %511 }
 0x186   :  { %v548_v54 = vpop.permute.xlu2 %547  ;;  %2318 = vmatmul.msk.f32.gmra.mxu1 %vm561_vm1, %v502_v28  ;;  %2336 = vmatmul.msk.f32.vlgmr.msrb.gmra.mxu3 %vm561_vm1, %v538_v52  ;;  %v58_v28 = vld [vmem:[%s3994_s1 + $0x80] sm:$0xff] }
 0x18b   :  { %342 = vperm.xlu1 %2398, %v49_v55   ;;  %322 = vperm.xlu0 %2400, %v45_v56  }
 0x18c   :  { %417 = vperm.xlu2 %2399, %v64_v57  }
 0x18d   :  { %v510_v58 = vpop.permute.xlu1 %509  ;;  %v546_v59 = vpop.permute.xlu0 %545 }
 0x18e   :  { %v520_v60 = vpop.permute.xlu2 %519  ;;  %2319 = vmatmul.msk.f32.gmra.mxu1 %vm561_vm1, %v504_v32  ;;  %2337 = vmatmul.msk.f32.gmra.mxu3 %vm561_vm1, %v540_v47 }
 0x193   :  { %327 = vperm.xlu1 %2398, %v46_v61   ;;  %307 = vperm.xlu0 %2400, %v42_v62  }
 0x194   :  { %332 = vperm.xlu2 %2399, %v47_v63  }
 0x195   :  { %v544_v0 = vpop.permute.xlu1 %543  ;;  %v518_v1 = vpop.permute.xlu0 %517 }
 0x196   :  { %v554_v2 = vpop.permute.xlu2 %553  ;;  %2320 = vmatmul.msk.f32.gmra.mxu1 %vm561_vm1, %v506_v41  ;;  %2338 = vmatmul.msk.f32.gmra.mxu3 %vm561_vm1, %v542_v42 }
 0x19b   :  { %412 = vperm.xlu1 %2398, %v63_v3   ;;  %392 = vperm.xlu0 %2400, %v59_v19  }
 0x19c   :  { %317 = vperm.xlu2 %2399, %v44_v4  }
 0x19d   :  { %v516_v5 = vpop.permute.xlu1 %515  ;;  %v552_v7 = vpop.permute.xlu0 %551 }
 0x19e   :  { %v526_v9 = vpop.permute.xlu2 %525  ;;  %2321 = vmatmul.msk.f32.gmra.mxu1 %vm561_vm1, %v508_v36  ;;  %2339 = vmatmul.msk.f32.gmra.mxu3 %vm561_vm1, %v544_v0 }
 0x1a3   :  { %397 = vperm.xlu1 %2398, %v60_v10  }
 0x1a4   :  { %402 = vperm.xlu2 %2399, %v61_v23  }
 0x1a5   :  { %v550_v11 = vpop.permute.xlu1 %549  ;;  %v524_v12 = vpop.permute.xlu0 %523 }
 0x1a6   :  { %v560_v13 = vpop.permute.xlu2 %559  ;;  %2322 = vmatmul.msk.f32.gmra.mxu1 %vm561_vm1, %v510_v58  ;;  %2340 = vmatmul.msk.f32.gmra.mxu3 %vm561_vm1, %v546_v59 }
 0x1ab   :  { %312 = vperm.xlu1 %2398, %v43_v15  }
 0x1ac   :  { %387 = vperm.xlu2 %2399, %v58_v28  }
 0x1ad   :  { %v522_v16 = vpop.permute.xlu1 %521  ;;  %v558_v17 = vpop.permute.xlu0 %557 }
 0x1ae   :  { %2323 = vmatmul.msk.f32.gmra.mxu1 %vm561_vm1, %v512_v53  ;;  %2341 = vmatmul.msk.f32.gmra.mxu3 %vm561_vm1, %v548_v54  ;;  %v534_v27 = vpop.permute.xlu2 %533 }
 0x1b5   :  { %v556_v18 = vpop.permute.xlu1 %555  ;;  %v530_v14 = vpop.permute.xlu0 %529 }
 0x1b6   :  { %2324 = vmatmul.msk.f32.gmra.mxu1 %vm561_vm1, %v514_v48  ;;  %2342 = vmatmul.msk.f32.gmra.mxu3 %vm561_vm1, %v550_v11  ;;  %v2919_v20 = vpop.permute.xlu2 %382 }
 0x1b7   :  { %4033 = vst [vmem:[#allocation2_spill] sm:$0xff] %v2919_v20 }
 0x1bd   :  { %v528_v21 = vpop.permute.xlu1 %527  ;;  %v536_v22 = vpop.permute.xlu0 %535 }
 0x1be   :  { %2325 = vmatmul.msk.f32.gmra.mxu1 %vm561_vm1, %v516_v5  ;;  %2343 = vmatmul.msk.f32.gmra.mxu3 %vm561_vm1, %v552_v7  ;;  %v2926_v24 = vpop.permute.xlu2 %367 }
 0x1bf   :  { %4034 = vst [vmem:[#allocation3_spill] sm:$0xff] %v2926_v24 }
 0x1c5   :  { %v532_v25 = vpop.permute.xlu1 %531  ;;  %v2928_v26 = vpop.permute.xlu0 %457 }
 0x1c6   :  { %4035 = vst [vmem:[#allocation4_spill] sm:$0xff] %v2928_v26  ;;  %2326 = vmatmul.msk.f32.gmra.mxu1 %vm561_vm1, %v518_v1  ;;  %2344 = vmatmul.msk.f32.gmra.mxu3 %vm561_vm1, %v554_v2  ;;  %v2935_v29 = vpop.permute.xlu2 %447 }
 0x1c7   :  { %4036 = vst [vmem:[#allocation5_spill] sm:$0xff] %v2935_v29 }
 0x1cd   :  { %v2937_v30 = vpop.permute.xlu1 %377  ;;  %v2941_v31 = vpop.permute.xlu0 %452 }
 0x1ce   :  { %4037 = vst [vmem:[#allocation6_spill] sm:$0xff] %v2937_v30  ;;  %2327 = vmatmul.msk.f32.gmra.mxu1 %vm561_vm1, %v520_v60  ;;  %2345 = vmatmul.msk.f32.gmra.mxu3 %vm561_vm1, %v556_v18  ;;  %v2945_v33 = vpop.permute.xlu2 %362 }
 0x1cf   :  { %4038 = vst [vmem:[#allocation7_spill] sm:$0xff] %v2941_v31 }
 0x1d0   :  { %4040 = vst [vmem:[#allocation9_spill] sm:$0xff] %v2945_v33 }
 0x1d5   :  { %v2943_v32 = vpop.permute.xlu1 %462  ;;  %v2949_v34 = vpop.permute.xlu0 %437 }
 0x1d6   :  { %4039 = vst [vmem:[#allocation8_spill] sm:$0xff] %v2943_v32  ;;  %2328 = vmatmul.msk.f32.gmra.mxu1 %vm561_vm1, %v522_v16  ;;  %2346 = vmatmul.msk.f32.gmra.mxu3 %vm561_vm1, %v558_v17  ;;  %v2955_v36 = vpop.permute.xlu2 %347 }
 0x1d7   :  { %4041 = vst [vmem:[#allocation10_spill] sm:$0xff] %v2949_v34 }
 0x1d8   :  { %4043 = vst [vmem:[#allocation12_spill] sm:$0xff] %v2955_v36 }
 0x1dd   :  { %v2951_v35 = vpop.permute.xlu1 %372  ;;  %v2957_v37 = vpop.permute.xlu0 %352 }
 0x1de   :  { %4042 = vst [vmem:[#allocation11_spill] sm:$0xff] %v2951_v35  ;;  %2329 = vmatmul.msk.f32.gmra.mxu1 %vm561_vm1, %v524_v12  ;;  %2347 = vmatmul.msk.f32.gmra.mxu3 %vm561_vm1, %v560_v13  ;;  %v2962_v39 = vpop.permute.xlu2 %432 }
 0x1df   :  { %4044 = vst [vmem:[#allocation13_spill] sm:$0xff] %v2957_v37 }
 0x1e0   :  { %4046 = vst [vmem:[#allocation15_spill] sm:$0xff] %v2962_v39 }
 0x1e5   :  { %v2959_v38 = vpop.permute.xlu1 %357  ;;  %v2964_v40 = vpop.permute.xlu0 %337 }
 0x1e6   :  { %4045 = vst [vmem:[#allocation14_spill] sm:$0xff] %v2959_v38  ;;  %2330 = vmatmul.msk.f32.gmra.mxu1 %vm561_vm1, %v526_v9  ;;  %v2969_v43 = vpop.permute.xlu2 %417 }
 0x1e7   :  { %4047 = vst [vmem:[#allocation16_spill] sm:$0xff] %v2964_v40 }
 0x1e8   :  { %4049 = vst [vmem:[#allocation18_spill] sm:$0xff] %v2969_v43 }
 0x1ed   :  { %v2966_v41 = vpop.permute.xlu1 %442  ;;  %v2974_v45 = vpop.permute.xlu0 %422 }
 0x1ee   :  { %4048 = vst [vmem:[#allocation17_spill] sm:$0xff] %v2966_v41  ;;  %2331 = vmatmul.msk.f32.gmra.mxu1 %vm561_vm1, %v528_v21  ;;  %v2976_v47 = vpop.permute.xlu2 %332 }
 0x1ef   :  { %4051 = vst [vmem:[#allocation20_spill] sm:$0xff] %v2974_v45 }
 0x1f0   :  { %4052 = vst [vmem:[#allocation21_spill] sm:$0xff] %v2976_v47 }
 0x1f3   :  { %v643_v42 = vpop.f32.mrf.mxu1 }
 0x1f5   :  { %v2971_v44 = vpop.permute.xlu1 %427  ;;  %v2981_v49 = vpop.permute.xlu0 %407 }
 0x1f6   :  { %4050 = vst [vmem:[#allocation19_spill] sm:$0xff] %v2971_v44  ;;  %2332 = vmatmul.msk.f32.gmra.mxu1 %vm561_vm1, %v530_v14  ;;  %v2986_v52 = vpop.permute.xlu2 %317 }
 0x1f7   :  { %4054 = vst [vmem:[#allocation23_spill] sm:$0xff] %v2981_v49 }
 0x1f8   :  { %4056 = vst [vmem:[#allocation25_spill] sm:$0xff] %v2986_v52 }
 0x1fb   :  { %v646_v46 = vpop.f32.mrf.mxu1 }
 0x1fd   :  { %v2978_v48 = vpop.permute.xlu1 %342  ;;  %v2989_v55 = vpop.permute.xlu0 %322 }
 0x1fe   :  { %4053 = vst [vmem:[#allocation22_spill] sm:$0xff] %v2978_v48  ;;  %2333 = vmatmul.msk.f32.gmra.mxu1 %vm561_vm1, %v532_v25 }
 0x1ff   :  { %4057 = vst [vmem:[#allocation26_spill] sm:$0xff] %v2989_v55 }
 0x203   :  { %v649_v50 = vpop.f32.mrf.mxu1 }
 0x204   :  { %v650_v54 = vadd.f32 %v649_v50, %v2986_v52 }
 0x205   :  { %v2983_v51 = vpop.permute.xlu1 %327  ;;  %v3003_v13 = vpop.permute.xlu0 %307 }
 0x206   :  { %4055 = vst [vmem:[#allocation24_spill] sm:$0xff] %v2983_v51  ;;  %2334 = vmatmul.msk.f32.gmra.mxu1 %vm561_vm1, %v534_v27  ;;  %v748_v59 = vsel %vm561_vm1, %v650_v54, -inf  ;;  %v3009_v21 = vadd.f32 %v643_v42, %v3003_v13 }
 0x207   :  { %4059 = vst [vmem:[#allocation28_spill] sm:$0xff] %v3003_v13 }
 0x209   :  { %v703_v53 = vpop.f32.mrf.mxu3 }
 0x20a   :  { %v704_v62 = vadd.f32 %v703_v53, %v2981_v49 }
 0x20b   :  { %v652_v56 = vpop.f32.mrf.mxu1 }
 0x20c   :  { %v653_v57 = vadd.f32 %v652_v56, %v2989_v55  ;;  %v829_v4 = vsel %vm561_vm1, %v704_v62, -inf }
 0x20d   :  { %v2992_v58 = vpop.permute.xlu1 %412 }
 0x20e   :  { %4058 = vst [vmem:[#allocation27_spill] sm:$0xff] %v2992_v58  ;;  %v749_v60 = vsel %vm561_vm1, %v653_v57, -inf  ;;  %2335 = vmatmul.msk.f32.gmra.mxu1 %vm561_vm1, %v536_v22 }
 0x20f   :  { %v750_v61 = vmax.f32 %v748_v59, %v749_v60 }
 0x211   :  { %v751_v63 = vrot.slane %v750_v61, 4  ;;  %v706_v0 = vpop.f32.mrf.mxu3 }
 0x212   :  { %v707_v1 = vadd.f32 %v706_v0, %v2992_v58 }
 0x213   :  { %v752_v2 = vmax.f32 %v750_v61, %v751_v63  ;;  %v655_v3 = vpop.f32.mrf.mxu1 }
 0x214   :  { %v830_v5 = vsel %vm561_vm1, %v707_v1, -inf  ;;  %v3006_v27 = vadd.f32 %v655_v3, %v2983_v51 }
 0x215   :  { %v753_v7 = vrot.slane %v752_v2, 2  ;;  %v831_v9 = vmax.f32 %v829_v4, %v830_v5  ;;  %v3001_v10 = vpop.permute.xlu1 %397 }
 0x216   :  { %v757_v53 = vsel %vm561_vm1, %v3006_v27, -inf }
 0x217   :  { %v754_v11 = vmax.f32 %v752_v2, %v753_v7  ;;  %v832_v12 = vrot.slane %v831_v9, 4 }
 0x219   :  { %v755_v15 = vrot.slane %v754_v11, 1  ;;  %v833_v16 = vmax.f32 %v831_v9, %v832_v12  ;;  %v709_v17 = vpop.f32.mrf.mxu3 }
 0x21b   :  { %v756_v18 = vmax.f32 %v754_v11, %v755_v15  ;;  %v834_v14 = vrot.slane %v833_v16, 2  ;;  %v658_v19 = vpop.f32.mrf.mxu1 }
 0x21c   :  { %v3012_v22 = vadd.f32 %v658_v19, %v2976_v47 }
 0x21d   :  { %v885_v23 = vsub.f32 %v650_v54, %v756_v18  ;;  %v886_v25 = vsub.f32 %v653_v57, %v756_v18  ;;  %v835_v28 = vmax.f32 %v833_v16, %v834_v14  ;;  %v3014_v50 = vpop.permute.xlu1 %312  ;;  %v739_v54 = vsel %vm561_vm1, %v3009_v21, -inf }
 0x21e   :  { %4060 = vst [vmem:[#allocation29_spill] sm:$0xff] %v3014_v50  ;;  %v758_v56 = vsel %vm561_vm1, %v3012_v22, -inf  ;;  %v3021_v59 = vadd.f32 %v646_v46, %v3014_v50  ;;  %v3026_v57 = vadd.f32 %v709_v17, %v2969_v43 }
 0x21f   :  { %v919_v60 = vmul.f32 1.442695, %v885_v23  ;;  %v921_v42 = vmul.f32 1.442695, %v886_v25  ;;  %v836_v61 = vrot.slane %v835_v28, 1  ;;  %v759_v63 = vmax.f32 %v757_v53, %v758_v56 }
 0x220   :  { %v740_v0 = vsel %vm561_vm1, %v3021_v59, -inf  ;;  %v838_v16 = vsel %vm561_vm1, %v3026_v57, -inf }
 0x221   :  { %2405 = vpow2.f32 %v919_v60  ;;  %v837_v2 = vmax.f32 %v835_v28, %v836_v61  ;;  %v760_v3 = vrot.slane %v759_v63, 4  ;;  %v741_v4 = vmax.f32 %v739_v54, %v740_v0  ;;  %v712_v5 = vpop.f32.mrf.mxu3 }
 0x222   :  { %2407 = vpow2.f32 %v921_v42  ;;  %v3031_v46 = vadd.f32 %v712_v5, %v2974_v45 }
 0x223   :  { %v903_v7 = vsub.f32 %v704_v62, %v837_v2  ;;  %v904_v9 = vsub.f32 %v707_v1, %v837_v2  ;;  %v761_v11 = vmax.f32 %v759_v63, %v760_v3  ;;  %v742_v12 = vrot.slane %v741_v4, 4  ;;  %v661_v15 = vpop.f32.mrf.mxu1 }
 0x224   :  { %v839_v17 = vsel %vm561_vm1, %v3031_v46, -inf  ;;  %v3046_v54 = vadd.f32 %v661_v15, %v2964_v40 }
 0x225   :  { %v955_v18 = vmul.f32 1.442695, %v903_v7  ;;  %v957_v14 = vmul.f32 1.442695, %v904_v9  ;;  %v762_v19 = vrot.slane %v761_v11, 2  ;;  %v743_v23 = vmax.f32 %v741_v4, %v742_v12 }
 0x226   :  { %v840_v25 = vmax.f32 %v838_v16, %v839_v17  ;;  %v766_v15 = vsel %vm561_vm1, %v3046_v54, -inf }
 0x227   :  { %v3037_v28 = vpop.eup %2405  ;;  %2409 = vpow2.f32 %v955_v18  ;;  %v763_v53 = vmax.f32 %v761_v11, %v762_v19  ;;  %v744_v62 = vrot.slane %v743_v23, 2 }
 0x228   :  { %v3039_v1 = vpop.eup %2407  ;;  %v988_v56 = vsel %vm561_vm1, %v3037_v28, 0.0  ;;  %2411 = vpow2.f32 %v957_v14  ;;  %v841_v60 = vrot.slane %v840_v25, 4 }
 0x229   :  { %v989_v42 = vsel %vm561_vm1, %v3039_v1, 0.0  ;;  %v764_v61 = vrot.slane %v763_v53, 1  ;;  %v745_v63 = vmax.f32 %v743_v23, %v744_v62  ;;  %v715_v0 = vpop.f32.mrf.mxu3 }
 0x22a   :  { %v990_v2 = vadd.f32 %v989_v42, %v988_v56  ;;  %v842_v3 = vmax.f32 %v840_v25, %v841_v60 }
 0x22b   :  { %v765_v4 = vmax.f32 %v763_v53, %v764_v61  ;;  %v746_v5 = vrot.slane %v745_v63, 1  ;;  %v664_v7 = vpop.f32.mrf.mxu1 }
 0x22c   :  { %v991_v9 = vrot.slane %v990_v2, 4  ;;  %v843_v11 = vrot.slane %v842_v3, 2  ;;  %v3049_v12 = vadd.f32 %v664_v7, %v2978_v48 }
 0x22d   :  { %v3051_v16 = vpop.eup %2409  ;;  %v887_v17 = vsub.f32 %v3006_v27, %v765_v4  ;;  %v888_v18 = vsub.f32 %v3012_v22, %v765_v4  ;;  %v747_v14 = vmax.f32 %v745_v63, %v746_v5 }
 0x22e   :  { %v3057_v19 = vpop.eup %2411  ;;  %v992_v23 = vadd.f32 %v991_v9, %v990_v2  ;;  %v1069_v25 = vsel %vm561_vm1, %v3051_v16, 0.0  ;;  %v844_v53 = vmax.f32 %v842_v3, %v843_v11  ;;  %v767_v62 = vsel %vm561_vm1, %v3049_v12, -inf }
 0x22f   :  { %v1070_v56 = vsel %vm561_vm1, %v3057_v19, 0.0  ;;  %v923_v27 = vmul.f32 1.442695, %v887_v17  ;;  %v925_v60 = vmul.f32 1.442695, %v888_v18  ;;  %v883_v22 = vsub.f32 %v3009_v21, %v747_v14 }
 0x230   :  { %v1071_v42 = vadd.f32 %v1070_v56, %v1069_v25  ;;  %v884_v61 = vsub.f32 %v3021_v59, %v747_v14  ;;  %v845_v63 = vrot.slane %v844_v53, 1  ;;  %v768_v4 = vmax.f32 %v766_v15, %v767_v62 }
 0x231   :  { %2413 = vpow2.f32 %v923_v27  ;;  %v915_v2 = vmul.f32 1.442695, %v883_v22  ;;  %v718_v5 = vpop.f32.mrf.mxu3  ;;  %v993_v7 = vrot.slane %v992_v23, 2 }
 0x232   :  { %v1072_v3 = vrot.slane %v1071_v42, 4  ;;  %2415 = vpow2.f32 %v925_v60  ;;  %v917_v9 = vmul.f32 1.442695, %v884_v61  ;;  %v846_v11 = vmax.f32 %v844_v53, %v845_v63 }
 0x233   :  { %2417 = vpow2.f32 %v915_v2  ;;  %v769_v48 = vrot.slane %v768_v4, 4  ;;  %v667_v40 = vpop.f32.mrf.mxu1  ;;  %v994_v17 = vadd.f32 %v993_v7, %v992_v23  ;;  %v3070_v15 = vadd.f32 %v718_v5, %v2962_v39 }
 0x234   :  { %v1073_v18 = vadd.f32 %v1072_v3, %v1071_v42  ;;  %2419 = vpow2.f32 %v917_v9  ;;  %v905_v21 = vsub.f32 %v3026_v57, %v846_v11  ;;  %v906_v59 = vsub.f32 %v3031_v46, %v846_v11 }
 0x235   :  { %v770_v14 = vmax.f32 %v768_v4, %v769_v48  ;;  %v995_v25 = vrot.slane %v994_v17, 1  ;;  %v3073_v53 = vadd.f32 %v715_v0, %v2971_v44  ;;  %v848_v0 = vsel %vm561_vm1, %v3070_v15, -inf }
 0x236   :  { %v1074_v62 = vrot.slane %v1073_v18, 2  ;;  %v959_v56 = vmul.f32 1.442695, %v905_v21  ;;  %v961_v27 = vmul.f32 1.442695, %v906_v59 }
 0x237   :  { %v3075_v60 = vpop.eup %2413  ;;  %v771_v23 = vrot.slane %v770_v14, 2  ;;  %v996_v22 = vadd.f32 %v995_v25, %v994_v17  ;;  %v847_v3 = vsel %vm561_vm1, %v3073_v53, -inf }
 0x238   :  { %v3077_v42 = vpop.eup %2415  ;;  %v997_v57 = vsel %vm561_vm1, %v3075_v60, 0.0  ;;  %2421 = vpow2.f32 %v959_v56  ;;  %v1075_v48 = vadd.f32 %v1074_v62, %v1073_v18 }
 0x239   :  { %v3081_v46 = vpop.eup %2417  ;;  %v998_v61 = vsel %vm561_vm1, %v3077_v42, 0.0  ;;  %2423 = vpow2.f32 %v961_v27  ;;  %v772_v63 = vmax.f32 %v770_v14, %v771_v23  ;;  %v721_v4 = vpop.f32.mrf.mxu3  ;;  %v849_v14 = vmax.f32 %v847_v3, %v848_v0 }
 0x23a   :  { %v3087_v2 = vpop.eup %2419  ;;  %v999_v5 = vadd.f32 %v998_v61, %v997_v57  ;;  %v979_v7 = vsel %vm561_vm1, %v3081_v46, 0.0  ;;  %v1076_v18 = vrot.slane %v1075_v48, 1  ;;  %2425 = vrcp.f32 %v996_v22 }
 0x23b   :  { %v980_v9 = vsel %vm561_vm1, %v3087_v2, 0.0  ;;  %v773_v11 = vrot.slane %v772_v63, 1  ;;  %v670_v17 = vpop.f32.mrf.mxu1  ;;  %v3108_v0 = vadd.f32 %v721_v4, %v2949_v34 }
 0x23c   :  { %v1000_v21 = vrot.slane %v999_v5, 4  ;;  %v3095_v59 = vadd.f32 %v980_v9, %v979_v7  ;;  %v1077_v62 = vadd.f32 %v1076_v18, %v1075_v48  ;;  %v850_v7 = vrot.slane %v849_v14, 4 }
 0x23d   :  { %v774_v25 = vmax.f32 %v772_v63, %v773_v11  ;;  %v3111_v48 = vadd.f32 %v670_v17, %v2957_v37 }
 0x23e   :  { %v3097_v56 = vpop.eup %2421  ;;  %v1001_v27 = vadd.f32 %v1000_v21, %v999_v5  ;;  %2427 = vrcp.f32 %v1077_v62 }
 0x23f   :  { %v3099_v23 = vpop.eup %2423  ;;  %v1078_v57 = vsel %vm561_vm1, %v3097_v56, 0.0  ;;  %v889_v61 = vsub.f32 %v3046_v54, %v774_v25  ;;  %v890_v44 = vsub.f32 %v3049_v12, %v774_v25  ;;  %v3114_v54 = vadd.f32 %v667_v40, %v2955_v36 }
 0x240   :  { %v1079_v22 = vsel %vm561_vm1, %v3099_v23, 0.0  ;;  %v2426_v63 = vpop.eup %2425  ;;  %v1002_v18 = vrot.slane %v1001_v27, 2  ;;  %v776_v62 = vsel %vm561_vm1, %v3111_v48, -inf }
 0x241   :  { %v1080_v5 = vadd.f32 %v1079_v22, %v1078_v57  ;;  %v927_v3 = vmul.f32 1.442695, %v889_v61  ;;  %v929_v9 = vmul.f32 1.442695, %v890_v44  ;;  %v724_v11 = vpop.f32.mrf.mxu3  ;;  %v3120_v25 = vmul.f32 %v2426_v63, %v3039_v1 }
 0x242   :  { %v3117_v12 = vadd.f32 %v724_v11, %v2966_v41  ;;  %v3123_v17 = vmul.f32 %v2426_v63, %v3037_v28  ;;  %v851_v44 = vmax.f32 %v849_v14, %v850_v7  ;;  %v856_v57 = vsel %vm561_vm1, %v3108_v0, -inf }
 0x243   :  { %v1081_v21 = vrot.slane %v1080_v5, 4  ;;  %2429 = vpow2.f32 %v927_v3  ;;  %v673_v4 = vpop.f32.mrf.mxu1  ;;  %v1003_v22 = vadd.f32 %v1002_v18, %v1001_v27  ;;  %v775_v1 = vsel %vm561_vm1, %v3114_v54, -inf }
 0x244   :  { %2431 = vpow2.f32 %v929_v9  ;;  %v857_v61 = vsel %vm561_vm1, %v3117_v12, -inf  ;;  %v2428_v11 = vpop.eup %2427  ;;  %v777_v63 = vmax.f32 %v775_v1, %v776_v62  ;;  %v852_v14 = vrot.slane %v851_v44, 2 }
 0x245   :  { %v1082_v40 = vadd.f32 %v1081_v21, %v1080_v5  ;;  %v858_v3 = vmax.f32 %v856_v57, %v857_v61  ;;  %v1004_v9 = vrot.slane %v1003_v22, 1  ;;  %v3134_v36 = vmul.f32 %v2428_v11, %v3057_v19 }
 0x246   :  { %v3139_v41 = vmul.f32 %v2428_v11, %v3051_v16  ;;  %v778_v1 = vrot.slane %v777_v63, 4  ;;  %v853_v45 = vmax.f32 %v851_v44, %v852_v14 }
 0x247   :  { %v1083_v28 = vrot.slane %v1082_v40, 2  ;;  %v859_v7 = vrot.slane %v858_v3, 4  ;;  %v1005_v27 = vadd.f32 %v1004_v9, %v1003_v22 }
 0x249   :  { %v3136_v5 = vpop.eup %2429  ;;  %v727_v21 = vpop.f32.mrf.mxu3  ;;  %v1084_v37 = vadd.f32 %v1083_v28, %v1082_v40  ;;  %v860_v62 = vmax.f32 %v858_v3, %v859_v7  ;;  %v3148_v40 = vadd.f32 %v673_v4, %v2959_v38  ;;  %2433 = vrcp.f32 %v1005_v27 }
 0x24a   :  { %v3141_v18 = vpop.eup %2431  ;;  %v1006_v57 = vsel %vm561_vm1, %v3136_v5, 0.0  ;;  %v779_v28 = vmax.f32 %v777_v63, %v778_v1  ;;  %v854_v7 = vrot.slane %v853_v45, 1  ;;  %v3158_v4 = vadd.f32 %v727_v21, %v2935_v29 }
 0x24b   :  { %v1007_v61 = vsel %vm561_vm1, %v3141_v18, 0.0  ;;  %v676_v19 = vpop.f32.mrf.mxu1  ;;  %v1085_v34 = vrot.slane %v1084_v37, 1  ;;  %v861_v43 = vrot.slane %v860_v62, 2  ;;  %v784_v44 = vsel %vm561_vm1, %v3148_v40, -inf }
 0x24c   :  { %v1008_v39 = vadd.f32 %v1007_v61, %v1006_v57  ;;  %v3151_v16 = vadd.f32 %v676_v19, %v2945_v33  ;;  %v780_v27 = vrot.slane %v779_v28, 2  ;;  %v855_v19 = vmax.f32 %v853_v45, %v854_v7 }
 0x24d   :  { %v1086_v22 = vadd.f32 %v1085_v34, %v1084_v37  ;;  %v862_v47 = vmax.f32 %v860_v62, %v861_v43  ;;  %v982_v7 = vrot.slane %v3095_v59, 4 }
 0x24e   :  { %v1009_v11 = vrot.slane %v1008_v39, 4  ;;  %v785_v3 = vsel %vm561_vm1, %v3151_v16, -inf  ;;  %v908_v51 = vsub.f32 %v3070_v15, %v855_v19 }
 0x24f   :  { %2435 = vrcp.f32 %v1086_v22  ;;  %v786_v14 = vmax.f32 %v784_v44, %v785_v3  ;;  %v2434_v63 = vpop.eup %2433  ;;  %v865_v22 = vsel %vm561_vm1, %v3158_v4, -inf }
 0x250   :  { %v1010_v9 = vadd.f32 %v1009_v11, %v1008_v39  ;;  %v863_v39 = vrot.slane %v862_v47, 1  ;;  %v3166_v62 = vmul.f32 %v2434_v63, %v3077_v42  ;;  %v907_v42 = vsub.f32 %v3073_v53, %v855_v19 }
 0x251   :  { %v730_v57 = vpop.f32.mrf.mxu3  ;;  %v787_v61 = vrot.slane %v786_v14, 4  ;;  %v965_v53 = vmul.f32 1.442695, %v908_v51 }
 0x252   :  { %v3161_v34 = vadd.f32 %v730_v57, %v2941_v31  ;;  %v1011_v37 = vrot.slane %v1010_v9, 2  ;;  %v781_v31 = vmax.f32 %v779_v28, %v780_v27  ;;  %v864_v33 = vmax.f32 %v862_v47, %v863_v39 }
 0x253   :  { %v679_v1 = vpop.f32.mrf.mxu1  ;;  %v788_v11 = vmax.f32 %v786_v14, %v787_v61 }
 0x254   :  { %v866_v43 = vsel %vm561_vm1, %v3161_v34, -inf  ;;  %v1012_v45 = vadd.f32 %v1011_v37, %v1010_v9  ;;  %v3180_v14 = vadd.f32 %v679_v1, %v2926_v24  ;;  %v782_v9 = vrot.slane %v781_v31, 1 }
 0x255   :  { %v2436_v21 = vpop.eup %2435  ;;  %v867_v3 = vmax.f32 %v865_v22, %v866_v43  ;;  %v789_v29 = vrot.slane %v788_v11, 2  ;;  %v909_v28 = vsub.f32 %v3108_v0, %v864_v33  ;;  %v910_v0 = vsub.f32 %v3117_v12, %v864_v33 }
 0x256   :  { %v3171_v44 = vmul.f32 %v2436_v21, %v3099_v23  ;;  %v3174_v57 = vmul.f32 %v2436_v21, %v3097_v56  ;;  %v1013_v43 = vrot.slane %v1012_v45, 1  ;;  %v983_v56 = vadd.f32 %v982_v7, %v3095_v59 }
 0x257   :  { %v868_v38 = vrot.slane %v867_v3, 4  ;;  %v790_v58 = vmax.f32 %v788_v11, %v789_v29  ;;  %v963_v21 = vmul.f32 1.442695, %v907_v42  ;;  %v793_v29 = vsel %vm561_vm1, %v3180_v14, -inf }
 0x258   :  { %v1014_v19 = vadd.f32 %v1013_v43, %v1012_v45  ;;  %v3192_v59 = vmul.f32 %v2434_v63, %v3075_v60  ;;  %v783_v39 = vmax.f32 %v781_v31, %v782_v9  ;;  %v967_v11 = vmul.f32 1.442695, %v909_v28 }
 0x259   :  { %v733_v23 = vpop.f32.mrf.mxu3  ;;  %v869_v61 = vmax.f32 %v867_v3, %v868_v38  ;;  %v791_v15 = vrot.slane %v790_v58, 1  ;;  %2437 = vpow2.f32 %v963_v21  ;;  %v984_v51 = vrot.slane %v983_v56, 2 }
 0x25a   :  { %2439 = vpow2.f32 %v965_v53  ;;  %v3196_v42 = vadd.f32 %v733_v23, %v2928_v26  ;;  %v891_v31 = vsub.f32 %v3114_v54, %v783_v39  ;;  %v892_v33 = vsub.f32 %v3111_v48, %v783_v39 }
 0x25b   :  { %v682_v37 = vpop.f32.mrf.mxu1  ;;  %v870_v27 = vrot.slane %v869_v61, 2  ;;  %v792_v7 = vmax.f32 %v790_v58, %v791_v15  ;;  %2441 = vrcp.f32 %v1014_v19  ;;  %v969_v60 = vmul.f32 1.442695, %v910_v0 }
 0x25c   :  { %v3185_v47 = vadd.f32 %v682_v37, %v2951_v35  ;;  %2443 = vpow2.f32 %v967_v11  ;;  %v985_v43 = vadd.f32 %v984_v51, %v983_v56  ;;  %v874_v21 = vsel %vm561_vm1, %v3196_v42, -inf }
 0x25d   :  { %v871_v1 = vmax.f32 %v869_v61, %v870_v27  ;;  %v893_v9 = vsub.f32 %v3148_v40, %v792_v7  ;;  %v894_v48 = vsub.f32 %v3151_v16, %v792_v7  ;;  %2445 = vpow2.f32 %v969_v60 }
 0x25e   :  { %v794_v38 = vsel %vm561_vm1, %v3185_v47, -inf }
 0x25f   :  { %v795_v22 = vmax.f32 %v793_v29, %v794_v38  ;;  %v872_v3 = vrot.slane %v871_v1, 1  ;;  %v3210_v53 = vpop.eup %2437  ;;  %v933_v38 = vmul.f32 1.442695, %v892_v33  ;;  %v935_v39 = vmul.f32 1.442695, %v893_v9 }
 0x260   :  { %v1087_v16 = vsel %vm561_vm1, %v3210_v53, 0.0 }
 0x261   :  { %v796_v61 = vrot.slane %v795_v22, 4  ;;  %v736_v37 = vpop.f32.mrf.mxu3  ;;  %v873_v27 = vmax.f32 %v871_v1, %v872_v3  ;;  %v937_v3 = vmul.f32 1.442695, %v894_v48  ;;  %v3245_v48 = vpop.permute.xlu2 %402 }
 0x262   :  { %v3199_v45 = vadd.f32 %v736_v37, %v2943_v32 }
 0x263   :  { %v797_v12 = vmax.f32 %v795_v22, %v796_v61  ;;  %v685_v63 = vpop.f32.mrf.mxu1  ;;  %v911_v58 = vsub.f32 %v3158_v4, %v873_v27  ;;  %v912_v23 = vsub.f32 %v3161_v34, %v873_v27  ;;  %v3213_v4 = vpop.eup %2439  ;;  %v931_v34 = vmul.f32 1.442695, %v891_v31 }
 0x264   :  { %v875_v54 = vsel %vm561_vm1, %v3199_v45, -inf  ;;  %v2442_v40 = vpop.eup %2441  ;;  %v986_v22 = vrot.slane %v985_v43, 1  ;;  %v3220_v7 = vadd.f32 %v685_v63, %v2937_v30  ;;  %v1088_v33 = vsel %vm561_vm1, %v3213_v4, 0.0 }
 0x265   :  { %v798_v28 = vrot.slane %v797_v12, 2  ;;  %v971_v15 = vmul.f32 1.442695, %v911_v58  ;;  %v973_v29 = vmul.f32 1.442695, %v912_v23  ;;  %v876_v1 = vmax.f32 %v874_v21, %v875_v54  ;;  %v3215_v11 = vpop.eup %2443 }
 0x266   :  { %v3223_v27 = vmul.f32 %v2442_v40, %v3141_v18  ;;  %v3226_v31 = vmul.f32 %v2442_v40, %v3136_v5  ;;  %v3233_v58 = vpop.eup %2445  ;;  %v987_v18 = vadd.f32 %v986_v22, %v985_v43  ;;  %v802_v21 = vsel %vm561_vm1, %v3220_v7, -inf }
 0x267   :  { %v799_v56 = vmax.f32 %v797_v12, %v798_v28  ;;  %2447 = vpow2.f32 %v971_v15  ;;  %v877_v19 = vrot.slane %v876_v1, 4 }
 0x268   :  { %2449 = vpow2.f32 %v973_v29  ;;  %v1096_v29 = vsel %vm561_vm1, %v3215_v11, 0.0 }
 0x269   :  { %v800_v0 = vrot.slane %v799_v56, 1  ;;  %v878_v51 = vmax.f32 %v876_v1, %v877_v19  ;;  %2451 = vpow2.f32 %v931_v34  ;;  %v1097_v1 = vsel %vm561_vm1, %v3233_v58, 0.0 }
 0x26a   :  { %2453 = vpow2.f32 %v933_v38 }
 0x26b   :  { %v801_v61 = vmax.f32 %v799_v56, %v800_v0  ;;  %v688_v37 = vpop.f32.mrf.mxu1  ;;  %v879_v60 = vrot.slane %v878_v51, 2  ;;  %2455 = vpow2.f32 %v935_v39 }
 0x26c   :  { %v3231_v12 = vadd.f32 %v688_v37, %v2919_v20  ;;  %2457 = vpow2.f32 %v937_v3  ;;  %v1089_v3 = vadd.f32 %v1088_v33, %v1087_v16 }
 0x26d   :  { %v895_v63 = vsub.f32 %v3180_v14, %v801_v61  ;;  %v896_v23 = vsub.f32 %v3185_v47, %v801_v61  ;;  %v3237_v9 = vpop.eup %2447  ;;  %v880_v5 = vmax.f32 %v878_v51, %v879_v60  ;;  %v1098_v51 = vadd.f32 %v1097_v1, %v1096_v29 }
 0x26e   :  { %v803_v28 = vsel %vm561_vm1, %v3231_v12, -inf  ;;  %v3243_v54 = vpop.eup %2449  ;;  %v1105_v14 = vsel %vm561_vm1, %v3237_v9, 0.0 }
 0x26f   :  { %v939_v15 = vmul.f32 1.442695, %v895_v63  ;;  %v941_v47 = vmul.f32 1.442695, %v896_v23  ;;  %v804_v43 = vmax.f32 %v802_v21, %v803_v28  ;;  %v1106_v34 = vsel %vm561_vm1, %v3243_v54, 0.0  ;;  %v3255_v40 = vpop.eup %2451 }
 0x270   :  { %v881_v56 = vrot.slane %v880_v5, 1  ;;  %v1107_v38 = vadd.f32 %v1106_v34, %v1105_v14  ;;  %v3257_v39 = vpop.eup %2453 }
 0x271   :  { %2459 = vpow2.f32 %v939_v15  ;;  %v805_v19 = vrot.slane %v804_v43, 4  ;;  %v3259_v22 = vpop.eup %2455 }
 0x272   :  { %2461 = vpow2.f32 %v941_v47  ;;  %v882_v0 = vmax.f32 %v880_v5, %v881_v56  ;;  %v3261_v60 = vpop.eup %2457  ;;  %v1108_v21 = vrot.slane %v1107_v38, 4  ;;  %v1090_v5 = vrot.slane %v1089_v3, 4 }
 0x273   :  { %v806_v61 = vmax.f32 %v804_v43, %v805_v19  ;;  %v691_v37 = vpop.f32.mrf.mxu1  ;;  %2463 = vrcp.f32 %v987_v18  ;;  %v1099_v47 = vrot.slane %v1098_v51, 4  ;;  %v1024_v33 = vsel %vm561_vm1, %v3259_v22, 0.0  ;;  %v3275_v43 = vpop.permute.xlu2 %387 }
 0x274   :  { %v913_v63 = vsub.f32 %v3196_v42, %v882_v0  ;;  %v914_v23 = vsub.f32 %v3199_v45, %v882_v0  ;;  %v1025_v18 = vsel %vm561_vm1, %v3261_v60, 0.0  ;;  %4061 = vst [vmem:[#allocation30_spill] sm:$0xff] %v3275_v43  ;;  %v1109_v29 = vadd.f32 %v1108_v21, %v1107_v38 }
 0x275   :  { %v807_v28 = vrot.slane %v806_v61, 2  ;;  %v1100_v21 = vadd.f32 %v1099_v47, %v1098_v51 }
 0x276   :  { %v975_v14 = vmul.f32 1.442695, %v913_v63  ;;  %v977_v15 = vmul.f32 1.442695, %v914_v23  ;;  %v1015_v63 = vsel %vm561_vm1, %v3255_v40, 0.0  ;;  %v1016_v23 = vsel %vm561_vm1, %v3257_v39, 0.0 }
 0x277   :  { %v3265_v34 = vpop.eup %2459  ;;  %v808_v56 = vmax.f32 %v806_v61, %v807_v28  ;;  %v3280_v61 = vadd.f32 %v691_v37, %v3275_v43  ;;  %v3286_v28 = vpop.permute.xlu0 %392  ;;  %v1110_v43 = vrot.slane %v1109_v29, 2  ;;  %v1101_v47 = vrot.slane %v1100_v21, 2 }
 0x278   :  { %v3267_v16 = vpop.eup %2461  ;;  %v1033_v42 = vsel %vm561_vm1, %v3265_v34, 0.0  ;;  %2465 = vpow2.f32 %v975_v14  ;;  %4062 = vst [vmem:[#allocation31_spill] sm:$0xff] %v3286_v28 }
 0x279   :  { %v2464_v45 = vpop.eup %2463  ;;  %v1034_v1 = vsel %vm561_vm1, %v3267_v16, 0.0  ;;  %2467 = vpow2.f32 %v977_v15  ;;  %v809_v19 = vrot.slane %v808_v56, 1  ;;  %v1026_v15 = vadd.f32 %v1025_v18, %v1024_v33 }
 0x27a   :  { %v1035_v0 = vadd.f32 %v1034_v1, %v1033_v42  ;;  %v3289_v38 = vmul.f32 %v2464_v45, %v3087_v2  ;;  %v3295_v37 = vmul.f32 %v2464_v45, %v3081_v46  ;;  %v1091_v1 = vadd.f32 %v1090_v5, %v1089_v3 }
 0x27b   :  { %v810_v14 = vmax.f32 %v808_v56, %v809_v19  ;;  %v694_v20 = vpop.f32.mrf.mxu1  ;;  %v1017_v56 = vadd.f32 %v1016_v23, %v1015_v63  ;;  %v811_v2 = vsel %vm561_vm1, %v3280_v61, -inf  ;;  %v1111_v63 = vadd.f32 %v1110_v43, %v1109_v29 }
 0x27c   :  { %v3292_v42 = vadd.f32 %v694_v20, %v3286_v28  ;;  %v1036_v19 = vrot.slane %v1035_v0, 4 }
 0x27d   :  { %v897_v30 = vsub.f32 %v3220_v7, %v810_v14  ;;  %v898_v32 = vsub.f32 %v3231_v12, %v810_v14  ;;  %v1027_v12 = vrot.slane %v1026_v15, 4  ;;  %v1092_v14 = vrot.slane %v1091_v1, 2 }
 0x27e   :  { %v3299_v26 = vpop.eup %2465  ;;  %v812_v20 = vsel %vm561_vm1, %v3292_v42, -inf  ;;  %v1037_v23 = vadd.f32 %v1036_v19, %v1035_v0  ;;  %v1018_v28 = vrot.slane %v1017_v56, 4 }
 0x27f   :  { %v3305_v51 = vpop.eup %2467  ;;  %v1114_v46 = vsel %vm561_vm1, %v3299_v26, 0.0  ;;  %v943_v3 = vmul.f32 1.442695, %v897_v30  ;;  %v945_v5 = vmul.f32 1.442695, %v898_v32  ;;  %v813_v7 = vmax.f32 %v811_v2, %v812_v20 }
 0x280   :  { %v1115_v33 = vsel %vm561_vm1, %v3305_v51, 0.0  ;;  %v1028_v55 = vadd.f32 %v1027_v12, %v1026_v15  ;;  %v1102_v30 = vadd.f32 %v1101_v47, %v1100_v21  ;;  %v1112_v20 = vrot.slane %v1111_v63, 1 }
 0x281   :  { %v1116_v18 = vadd.f32 %v1115_v33, %v1114_v46  ;;  %2469 = vpow2.f32 %v943_v3  ;;  %v814_v45 = vrot.slane %v813_v7, 4  ;;  %v1038_v52 = vrot.slane %v1037_v23, 2 }
 0x282   :  { %2471 = vpow2.f32 %v945_v5  ;;  %v1019_v13 = vadd.f32 %v1018_v28, %v1017_v56  ;;  %v1093_v33 = vadd.f32 %v1092_v14, %v1091_v1  ;;  %v1103_v0 = vrot.slane %v1102_v30, 1 }
 0x283   :  { %v1117_v35 = vrot.slane %v1116_v18, 4  ;;  %v815_v24 = vmax.f32 %v813_v7, %v814_v45  ;;  %v697_v49 = vpop.f32.mrf.mxu1  ;;  %v1029_v19 = vrot.slane %v1028_v55, 2  ;;  %v1113_v15 = vadd.f32 %v1112_v20, %v1111_v63 }
 0x284   :  { %v3320_v47 = vadd.f32 %v697_v49, %v3001_v10  ;;  %v1039_v28 = vadd.f32 %v1038_v52, %v1037_v23  ;;  %v1094_v12 = vrot.slane %v1093_v33, 1 }
 0x285   :  { %v1118_v32 = vadd.f32 %v1117_v35, %v1116_v18  ;;  %v816_v2 = vrot.slane %v815_v24, 2  ;;  %v1020_v18 = vrot.slane %v1019_v13, 2  ;;  %2473 = vrcp.f32 %v1113_v15 }
 0x286   :  { %v820_v49 = vsel %vm561_vm1, %v3320_v47, -inf }
 0x287   :  { %v3311_v50 = vpop.eup %2469  ;;  %v1119_v46 = vrot.slane %v1118_v32, 2  ;;  %v817_v3 = vmax.f32 %v815_v24, %v816_v2  ;;  %v1030_v2 = vadd.f32 %v1029_v19, %v1028_v55 }
 0x288   :  { %v3313_v43 = vpop.eup %2471  ;;  %v1042_v29 = vsel %vm561_vm1, %v3311_v50, 0.0 }
 0x289   :  { %v1120_v5 = vadd.f32 %v1119_v46, %v1118_v32  ;;  %v1043_v35 = vsel %vm561_vm1, %v3313_v43, 0.0  ;;  %v818_v21 = vrot.slane %v817_v3, 1  ;;  %v1104_v32 = vadd.f32 %v1103_v0, %v1102_v30 }
 0x28a   :  { %v1044_v7 = vadd.f32 %v1043_v35, %v1042_v29  ;;  %v1021_v0 = vadd.f32 %v1020_v18, %v1019_v13 }
 0x28b   :  { %v1121_v24 = vrot.slane %v1120_v5, 1  ;;  %v819_v1 = vmax.f32 %v817_v3, %v818_v21  ;;  %v700_v56 = vpop.f32.mrf.mxu1  ;;  %v1040_v3 = vrot.slane %v1039_v28, 1  ;;  %v2474_v19 = vpop.eup %2473 }
 0x28c   :  { %v1045_v45 = vrot.slane %v1044_v7, 4  ;;  %v3323_v14 = vadd.f32 %v700_v56, %v3245_v48  ;;  %v1022_v13 = vrot.slane %v1021_v0, 1 }
 0x28d   :  { %v899_v46 = vsub.f32 %v3280_v61, %v819_v1  ;;  %v900_v63 = vsub.f32 %v3292_v42, %v819_v1  ;;  %v1122_v20 = vadd.f32 %v1121_v24, %v1120_v5  ;;  %v1095_v42 = vadd.f32 %v1094_v12, %v1093_v33 }
 0x28e   :  { %v821_v52 = vsel %vm561_vm1, %v3323_v14, -inf  ;;  %v1046_v23 = vadd.f32 %v1045_v45, %v1044_v7  ;;  %v1041_v15 = vadd.f32 %v1040_v3, %v1039_v28  ;;  %v1031_v24 = vrot.slane %v1030_v2, 1 }
 0x28f   :  { %v947_v29 = vmul.f32 1.442695, %v899_v46  ;;  %v949_v35 = vmul.f32 1.442695, %v900_v63  ;;  %v822_v21 = vmax.f32 %v820_v49, %v821_v52  ;;  %2475 = vrcp.f32 %v1122_v20 }
 0x290   :  { %v1047_v30 = vrot.slane %v1046_v23, 2  ;;  %v1032_v33 = vadd.f32 %v1031_v24, %v1030_v2  ;;  %v1167_v3 = vmul.f32 %v2474_v19, %v3237_v9 }
 0x291   :  { %2477 = vpow2.f32 %v947_v29  ;;  %v823_v55 = vrot.slane %v822_v21, 4 }
 0x292   :  { %2479 = vpow2.f32 %v949_v35  ;;  %v1048_v61 = vadd.f32 %v1047_v30, %v1046_v23  ;;  %v1199_v24 = vmul.f32 %v1167_v3, %v2697_v6  ;;  %v1193_v3 = vmul.f32 %v3174_v57, %v2697_v6 }
 0x293   :  { %v824_v5 = vmax.f32 %v822_v21, %v823_v55  ;;  %2481 = vrcp.f32 %v1104_v32  ;;  %v1168_v32 = vmul.f32 %v2474_v19, %v3243_v54  ;;  %v1023_v54 = vadd.f32 %v1022_v13, %v1021_v0 }
 0x294   :  { %v1049_v1 = vrot.slane %v1048_v61, 1  ;;  %2483 = vrcp.f32 %v1095_v42 }
 0x295   :  { %v2476_v56 = vpop.eup %2475  ;;  %v825_v7 = vrot.slane %v824_v5, 2  ;;  %2485 = vrcp.f32 %v1041_v15  ;;  %v1200_v21 = vmul.f32 %v1168_v32, %v2701_v8 }
 0x296   :  { %v1170_v45 = vmul.f32 %v2476_v56, %v3305_v51  ;;  %v1169_v46 = vmul.f32 %v2476_v56, %v3299_v26  ;;  %v1050_v63 = vadd.f32 %v1049_v1, %v1048_v61 }
 0x297   :  { %v3333_v20 = vpop.eup %2477  ;;  %v826_v49 = vmax.f32 %v824_v5, %v825_v7 }
 0x298   :  { %v3335_v12 = vpop.eup %2479  ;;  %v1051_v28 = vsel %vm561_vm1, %v3333_v20, 0.0  ;;  %v1202_v18 = vmul.f32 %v1170_v45, %v2701_v8  ;;  %2487 = vrcp.f32 %v1050_v63  ;;  %v1201_v2 = vmul.f32 %v1169_v46, %v2697_v6 }
 0x299   :  { %v2482_v51 = vpop.eup %2481  ;;  %v1052_v26 = vsel %vm561_vm1, %v3335_v12, 0.0  ;;  %v827_v52 = vrot.slane %v826_v49, 1  ;;  %2489 = vrcp.f32 %v1032_v33 }
 0x29a   :  { %v1053_v23 = vadd.f32 %v1052_v26, %v1051_v28  ;;  %1229 = vmatpush.msra.mxu3 %v1202_v18  ;;  %v2484_v35 = vpop.eup %2483  ;;  %v1166_v30 = vmul.f32 %v2482_v51, %v3233_v58  ;;  %v1165_v9 = vmul.f32 %v2482_v51, %v3215_v11  ;;  %2491 = vrcp.f32 %v1023_v54 }
 0x29b   :  { %v828_v29 = vmax.f32 %v826_v49, %v827_v52  ;;  %v2486_v55 = vpop.eup %2485  ;;  %v1194_v26 = vmul.f32 %v3171_v44, %v2701_v8  ;;  %v1192_v44 = vmul.f32 %v3134_v36, %v2701_v8  ;;  %v1191_v54 = vmul.f32 %v3139_v41, %v2697_v6 }
 0x29c   :  { %1230 = vmatpush.msra.mxu3 %v1201_v2  ;;  %v1054_v15 = vrot.slane %v1053_v23, 4  ;;  %v1198_v0 = vmul.f32 %v1166_v30, %v2701_v8  ;;  %v1152_v7 = vmul.f32 %v2486_v55, %v3267_v16  ;;  %v1197_v11 = vmul.f32 %v1165_v9, %v2697_v6 }
 0x29d   :  { %v901_v61 = vsub.f32 %v3320_v47, %v828_v29  ;;  %v902_v42 = vsub.f32 %v3323_v14, %v828_v29  ;;  %v1164_v47 = vmul.f32 %v2484_v35, %v3213_v4  ;;  %v1151_v63 = vmul.f32 %v2486_v55, %v3265_v34 }
 0x29e   :  { %v2488_v5 = vpop.eup %2487  ;;  %1231 = vmatpush.msra.mxu3 %v1200_v21  ;;  %v1055_v46 = vadd.f32 %v1054_v15, %v1053_v23  ;;  %v1184_v49 = vmul.f32 %v1152_v7, %v2701_v8  ;;  %v1177_v36 = vmul.f32 %v3226_v31, %v2697_v6  ;;  %v1176_v41 = vmul.f32 %v3166_v62, %v2701_v8  ;;  %v75_v7 = vld [vmem:[%s3996_s2 + $0x8] sm:$0xff] }
 0x29f   :  { %v951_v19 = vmul.f32 1.442695, %v901_v61  ;;  %v953_v1 = vmul.f32 1.442695, %v902_v42  ;;  %v1154_v56 = vmul.f32 %v2488_v5, %v3313_v43  ;;  %v1153_v58 = vmul.f32 %v2488_v5, %v3311_v50  ;;  %v2490_v45 = vpop.eup %2489 }
 0x2a0   :  { %1232 = vmatpush.msra.mxu3 %v1199_v24  ;;  %v1163_v43 = vmul.f32 %v2484_v35, %v3210_v53  ;;  %v1196_v4 = vmul.f32 %v1164_v47, %v2701_v8  ;;  %v1150_v16 = vmul.f32 %v2490_v45, %v3261_v60  ;;  %v2492_v33 = vpop.eup %2491  ;;  %v1056_v53 = vrot.slane %v1055_v46, 2 }
 0x2a1   :  { %2493 = vpow2.f32 %v951_v19  ;;  %v1186_v14 = vmul.f32 %v1154_v56, %v2701_v8  ;;  %v1185_v50 = vmul.f32 %v1153_v58, %v2697_v6  ;;  %v1183_v18 = vmul.f32 %v1151_v63, %v2697_v6  ;;  %v1262_v63 = vld [vmem:[%s3998_s7] sm:$0xff] }
 0x2a2   :  { %2495 = vpow2.f32 %v953_v1  ;;  %1233 = vmatpush.msra.mxu3 %v1198_v0  ;;  %v1195_v13 = vmul.f32 %v1163_v43, %v2697_v6  ;;  %v1149_v32 = vmul.f32 %v2490_v45, %v3259_v22  ;;  %v1182_v52 = vmul.f32 %v1150_v16, %v2701_v8  ;;  %v1267_v45 = vld [vmem:[%s3998_s7 + $0x28] sm:$0xff]  ;;  %v1265_v43 = vld [vmem:[%s3998_s7 + $0x18] sm:$0xff] }
 0x2a3   :  { %1206 = vmatpush.msra.mxu2 %v1186_v14  ;;  %v1148_v23 = vmul.f32 %v2492_v33, %v3257_v39  ;;  %v1147_v29 = vmul.f32 %v2492_v33, %v3255_v40  ;;  %v1057_v35 = vadd.f32 %v1056_v53, %v1055_v46  ;;  %v1178_v40 = vmul.f32 %v3223_v27, %v2701_v8  ;;  %v1264_v46 = vld [vmem:[%s3998_s7 + $0x10] sm:$0xff] }
 0x2a4   :  { %1234 = vmatpush.msra.mxu3 %v1197_v11  ;;  %v1181_v22 = vmul.f32 %v1149_v32, %v2697_v6  ;;  %v1175_v9 = vmul.f32 %v3192_v59, %v2697_v6  ;;  %v1174_v27 = vmul.f32 %v3120_v25, %v2701_v8  ;;  %v1173_v31 = vmul.f32 %v3123_v17, %v2697_v6  ;;  %v74_v25 = vld [vmem:[%s3996_s2] sm:$0xff] }
 0x2a5   :  { %1207 = vmatpush.msra.mxu2 %v1185_v50  ;;  %v1180_v30 = vmul.f32 %v1148_v23, %v2701_v8  ;;  %v1179_v57 = vmul.f32 %v1147_v29, %v2697_v6  ;;  %v1058_v55 = vrot.slane %v1057_v35, 1  ;;  %v1172_v62 = vmul.f32 %v3289_v38, %v2701_v8  ;;  %v1266_v11 = vld [vmem:[%s3998_s7 + $0x20] sm:$0xff]  ;;  %v1263_v50 = vld [vmem:[%s3998_s7 + $0x8] sm:$0xff] }
 0x2a6   :  { %1235 = vmatpush.msra.mxu3 %v1196_v4  ;;  %v1171_v59 = vmul.f32 %v3295_v37, %v2697_v6 }
 0x2a7   :  { %v2494_v28 = vpop.eup %2493  ;;  %1208 = vmatpush.msra.mxu2 %v1184_v49  ;;  %v1059_v5 = vadd.f32 %v1058_v55, %v1057_v35  ;;  %v2402_v49 = vld [vmem:[%s3995_s6] ss:$0 sm:$0xff] }
 0x2a8   :  { %v2496_v34 = vpop.eup %2495  ;;  %v1060_v51 = vsel %vm561_vm1, %v2494_v28, 0.0  ;;  %1236 = vmatpush.msra.mxu3 %v1195_v13 }
 0x2a9   :  { %v1061_v60 = vsel %vm561_vm1, %v2496_v34, 0.0  ;;  %1209 = vmatpush.msra.mxu2 %v1183_v18  ;;  %2497 = vrcp.f32 %v1059_v5 }
 0x2aa   :  { %v1062_v2 = vadd.f32 %v1061_v60, %v1060_v51  ;;  %1237 = vmatpush.msra.mxu3 %v1194_v26 }
 0x2ab   :  { %1210 = vmatpush.msra.mxu2 %v1182_v52 }
 0x2ac   :  { %v1063_v21 = vrot.slane %v1062_v2, 4  ;;  %1238 = vmatpush.msra.mxu3 %v1193_v3 }
 0x2ad   :  { %1211 = vmatpush.msra.mxu2 %v1181_v22  ;;  %v2403_v22 = vld [vmem:[%s3997_s8] ss:$0 sm:$0xff]  ;;  %s2616_s8 = smov 124  }
 0x2ae   :  { %v1064_v39 = vadd.f32 %v1063_v21, %v1062_v2  ;;  %1239 = vmatpush.msra.mxu3 %v1192_v44 }
 0x2af   :  { %1212 = vmatpush.msra.mxu2 %v1180_v30  ;;  %v2498_v19 = vpop.eup %2497 }
 0x2b0   :  { %v1065_v61 = vrot.slane %v1064_v39, 2  ;;  %1240 = vmatpush.msra.mxu3 %v1191_v54  ;;  %v1156_v17 = vmul.f32 %v2498_v19, %v3335_v12  ;;  %v1155_v47 = vmul.f32 %v2498_v19, %v3333_v20  ;;  %v76_v12 = vld [vmem:[%s3996_s2 + $0x10] sm:$0xff]  ;;  %v77_v20 = vld [vmem:[%s3996_s2 + $0x18] sm:$0xff] }
 0x2b1   :  { %1213 = vmatpush.msra.mxu2 %v1179_v57 }
 0x2b2   :  { %v1066_v42 = vadd.f32 %v1065_v61, %v1064_v39  ;;  %v1188_v37 = vmul.f32 %v1156_v17, %v2701_v8  ;;  %v1187_v14 = vmul.f32 %v1155_v47, %v2697_v6 }
 0x2b3   :  { %1214 = vmatpush.msra.mxu2 %v1178_v40 }
 0x2b4   :  { %v1067_v15 = vrot.slane %v1066_v42, 1 }
 0x2b5   :  { %1215 = vmatpush.msra.mxu2 %v1177_v36 }
 0x2b6   :  { %v1068_v24 = vadd.f32 %v1067_v15, %v1066_v42 }
 0x2b7   :  { %1216 = vmatpush.msra.mxu2 %v1176_v41 }
 0x2b8   :  { %2499 = vrcp.f32 %v1068_v24 }
 0x2b9   :  { %1217 = vmatpush.msra.mxu2 %v1175_v9 }
 0x2bb   :  { %1218 = vmatpush.msra.mxu2 %v1174_v27 }
 0x2bd   :  { %1219 = vmatpush.msra.mxu2 %v1173_v31 }
 0x2be   :  { %v2500_v1 = vpop.eup %2499 }
 0x2bf   :  { %1220 = vmatpush.msra.mxu2 %v1172_v62  ;;  %v1158_v56 = vmul.f32 %v2500_v1, %v2496_v34  ;;  %v1157_v58 = vmul.f32 %v2500_v1, %v2494_v28 }
 0x2c1   :  { %1221 = vmatpush.msra.mxu2 %v1171_v59  ;;  %v1190_v0 = vmul.f32 %v1158_v56, %v2701_v8  ;;  %v1189_v38 = vmul.f32 %v1157_v58, %v2697_v6  ;;  %v1269_v6 = vld [vmem:[%s3998_s7 + $0x38] sm:$0xff]  ;;  %v1268_v8 = vld [vmem:[%s3998_s7 + $0x30] sm:$0xff] }
 0x2c2   :  { %1222 = vmatmul.f32.vlgmr.msra.gmra.mxu2 %v74_v25  ;;  %1290 = vmatpush.msra.mxu0 %v1269_v6 }
 0x2c3   :  { %1241 = vmatpush.msra.mxu3 %v1190_v0 }
 0x2c4   :  { %1291 = vmatpush.msra.mxu0 %v1268_v8 }
 0x2c5   :  { %1242 = vmatpush.msra.mxu3 %v1189_v38 }
 0x2c6   :  { %1292 = vmatpush.msra.mxu0 %v1267_v45 }
 0x2c7   :  { %1243 = vmatpush.msra.mxu3 %v1188_v37 }
 0x2c8   :  { %1293 = vmatpush.msra.mxu0 %v1266_v11 }
 0x2c9   :  { %1244 = vmatpush.msra.mxu3 %v1187_v14 }
 0x2ca   :  { %1245 = vmatmul.f32.vlgmr.msra.gmra.mxu3 %v75_v7  ;;  %1225 = vmatmul.f32.gmra.mxu2 %v76_v12 }
 0x2cb   :  { %1294 = vmatpush.msra.mxu0 %v1265_v43 }
 0x2cd   :  { %1295 = vmatpush.msra.mxu0 %v1264_v46 }
 0x2cf   :  { %1296 = vmatpush.msra.mxu0 %v1263_v50 }
 0x2d1   :  { %1297 = vmatpush.msra.mxu0 %v1262_v63 }
 0x2d2   :  { %1248 = vmatmul.f32.gmra.mxu3 %v77_v20 }
 0x345   :  { %v1223_v4 = vpop.f32.mrf.mxu2 }
 0x346   :  { %v1224_v16 = vadd.f32 %v2402_v49, %v1223_v4 }
 0x34d   :  { %v1246_v33 = vpop.f32.mrf.mxu3  ;;  %v1226_v28 = vpop.f32.mrf.mxu2 }
 0x34e   :  { %v1247_v13 = vadd.f32 %v1246_v33, %v1224_v16  ;;  %v1227_v18 = vadd.f32 %v2402_v49, %v1226_v28 }
 0x350   :  { %v1254_v53 = vmul.f32 1.442695, %v1247_v13  ;;  %vm1252_vm2 = vcmp.gt.f32.partialorder %v1247_v13, 0.0 }
 0x352   :  { %2501 = vpow2.f32 %v1254_v53 }
 0x355   :  { %v1249_v32 = vpop.f32.mrf.mxu3 }
 0x356   :  { %v1250_v34 = vadd.f32 %v1249_v32, %v1227_v18 }
 0x358   :  { %v2502_v51 = vpop.eup %2501  ;;  %v1256_v26 = vmul.f32 1.442695, %v1250_v34  ;;  %vm1253_vm3 = vcmp.gt.f32.partialorder %v1250_v34, 0.0 }
 0x359   :  { %v2348_v60 = vadd.f32 -1.0, %v2502_v51 }
 0x35a   :  { %2503 = vpow2.f32 %v1256_v26 }
 0x35b   :  { %v1260_v52 = vsel %vm1252_vm2, %v1247_v13, %v2348_v60 }
 0x35c   :  { %2350 = vmatmul.msk.f32.vlgmr.msra.gmra.mxu0 %vm561_vm1, %v1260_v52 }
 0x360   :  { %v2504_v23 = vpop.eup %2503 }
 0x361   :  { %v2349_v2 = vadd.f32 -1.0, %v2504_v23 }
 0x363   :  { %v1261_v3 = vsel %vm1253_vm3, %v1250_v34, %v2349_v2 }
 0x364   :  { %2351 = vmatmul.msk.f32.gmra.mxu0 %vm561_vm1, %v1261_v3 }
 0x3d9   :  { %v1299_v29 = vpop.f32.mrf.mxu0 }
 0x3da   :  { %v3449_v35 = vadd.f32 %v2403_v22, %v1299_v29 }
 0x3dc   :  { %1353 = vrot.lane.b32.xlu1 %v3449_v35, %s2615_s27  ;;  %v1321_v30 = vperm.slane %v3449_v35, 0  ;;  %v1308_v5 = vrot.slane %v3449_v35, 2  ;;  %v1307_v41 = vrot.slane %v3449_v35, 1  ;;  %v1309_v12 = vrot.slane %v3449_v35, 3 }
 0x3dd   :  { %v1311_v52 = vrot.slane %v3449_v35, 5 }
 0x3de   :  { %v1323_v24 = vperm.slane %v1308_v5, 0  ;;  %v1322_v1 = vperm.slane %v1307_v41, 0  ;;  %v1324_v11 = vperm.slane %v1309_v12, 0 }
 0x3e1   :  { %v1302_v21 = vpop.f32.mrf.mxu0 }
 0x3e2   :  { %v3452_v44 = vadd.f32 %v2403_v22, %v1302_v21  ;;  %v1326_v22 = vperm.slane %v1311_v52, 0 }
 0x3e4   :  { %1355 = vrot.lane.b32.xlu2 %v3452_v44, %s2615_s27  ;;  %v1314_v39 = vrot.slane %v3452_v44, 1  ;;  %v1316_v27 = vrot.slane %v3452_v44, 3  ;;  %v1315_v7 = vrot.slane %v3452_v44, 2  ;;  %v1317_v16 = vrot.slane %v3452_v44, 4 }
 0x3e6   :  { %v1330_v61 = vperm.slane %v1314_v39, 0  ;;  %v1332_v25 = vperm.slane %v1316_v27, 0  ;;  %v1331_v45 = vperm.slane %v1315_v7, 0  ;;  %v1333_v53 = vperm.slane %v1317_v16, 0 }
 0x43e   :  { %v3457_v54 = vpop.permute.xlu2 %1355 }
 0x43f   :  { %v1360_v57 = vadd.f32 %v3457_v54, %v1321_v30  ;;  %v1378_v42 = vadd.f32 %v3457_v54, %v1330_v61  ;;  %v1362_v38 = vadd.f32 %v3457_v54, %v1322_v1  ;;  %v1380_v50 = vadd.f32 %v3457_v54, %v1331_v45 }
 0x440   :  { %v1366_v49 = vadd.f32 %v3457_v54, %v1324_v11  ;;  %v1364_v51 = vadd.f32 %v3457_v54, %v1323_v24  ;;  %v1384_v60 = vadd.f32 %v3457_v54, %v1333_v53  ;;  %v1382_v39 = vadd.f32 %v3457_v54, %v1332_v25 }
 0x441   :  { %vm1392_vm4 = vcmp.gt.f32.partialorder %v1360_v57, 0.0  ;;  %v1424_v55 = vmul.f32 0.2, %v1360_v57  ;;  %v1442_v36 = vmul.f32 0.2, %v1378_v42  ;;  %vm1410_vm5 = vcmp.gt.f32.partialorder %v1378_v42, 0.0 }
 0x442   :  { %v1426_v20 = vmul.f32 0.2, %v1362_v38  ;;  %vm1394_vm9 = vcmp.gt.f32.partialorder %v1362_v38, 0.0  ;;  %v1444_v33 = vmul.f32 0.2, %v1380_v50  ;;  %vm1412_vm12 = vcmp.gt.f32.partialorder %v1380_v50, 0.0 }
 0x443   :  { %v1456_v40 = vsel %vm1392_vm4, %v1360_v57, %v1424_v55  ;;  %v1474_v15 = vsel %vm1410_vm5, %v1378_v42, %v1442_v36  ;;  %v1430_v28 = vmul.f32 0.2, %v1366_v49  ;;  %vm1398_vm14 = vcmp.gt.f32.partialorder %v1366_v49, 0.0 }
 0x444   :  { %1521 = vrot.lane.b32.xlu1 %v1456_v40, %s2616_s8  ;;  %v1458_v43 = vsel %vm1394_vm9, %v1362_v38, %v1426_v20  ;;  %v1476_v18 = vsel %vm1412_vm12, %v1380_v50, %v1444_v33  ;;  %v1428_v2 = vmul.f32 0.2, %v1364_v51  ;;  %v1448_v3 = vmul.f32 0.2, %v1384_v60  ;;  %v1271_v33 = vld [vmem:[%s3999_s9] sm:$0xf] }
 0x445   :  { %v1462_v26 = vsel %vm1398_vm14, %v1366_v49, %v1430_v28  ;;  %vm1396_vm0 = vcmp.gt.f32.partialorder %v1364_v51, 0.0  ;;  %vm1416_vm1 = vcmp.gt.f32.partialorder %v1384_v60, 0.0  ;;  %v1319_v40 = vrot.slane %v3452_v44, 6 }
 0x446   :  { %v1460_v21 = vsel %vm1396_vm0, %v1364_v51, %v1428_v2  ;;  %v1480_v57 = vsel %vm1416_vm1, %v1384_v60, %v1448_v3  ;;  %v1446_v36 = vmul.f32 0.2, %v1382_v39  ;;  %vm1414_vm3 = vcmp.gt.f32.partialorder %v1382_v39, 0.0 }
 0x447   :  { %v1335_v41 = vperm.slane %v1319_v40, 0 }
 0x448   :  { %v1478_v27 = vsel %vm1414_vm3, %v1382_v39, %v1446_v36 }
 0x44c   :  { %1557 = vrot.lane.b32.xlu1 %v1474_v15, %s2616_s8 }
 0x44e   :  { %v3465_v9 = vpop.permute.xlu1 %1353 }
 0x44f   :  { %v1377_v31 = vadd.f32 %v3465_v9, %v1330_v61  ;;  %v1359_v19 = vadd.f32 %v3465_v9, %v1321_v30  ;;  %v1363_v62 = vadd.f32 %v3465_v9, %v1323_v24  ;;  %v1361_v47 = vadd.f32 %v3465_v9, %v1322_v1 }
 0x450   :  { %v1381_v14 = vadd.f32 %v3465_v9, %v1332_v25  ;;  %v1379_v63 = vadd.f32 %v3465_v9, %v1331_v45  ;;  %v1365_v34 = vadd.f32 %v3465_v9, %v1324_v11  ;;  %v1383_v30 = vadd.f32 %v3465_v9, %v1333_v53 }
 0x451   :  { %vm1409_vm6 = vcmp.gt.f32.partialorder %v1377_v31, 0.0  ;;  %v1441_v59 = vmul.f32 0.2, %v1377_v31  ;;  %vm1391_vm7 = vcmp.gt.f32.partialorder %v1359_v19, 0.0  ;;  %v1423_v56 = vmul.f32 0.2, %v1359_v19 }
 0x452   :  { %vm1395_vm8 = vcmp.gt.f32.partialorder %v1363_v62, 0.0  ;;  %v1427_v58 = vmul.f32 0.2, %v1363_v62  ;;  %v1425_v6 = vmul.f32 0.2, %v1361_v47  ;;  %vm1393_vm10 = vcmp.gt.f32.partialorder %v1361_v47, 0.0 }
 0x453   :  { %v1473_v0 = vsel %vm1409_vm6, %v1377_v31, %v1441_v59  ;;  %v1455_v17 = vsel %vm1391_vm7, %v1359_v19, %v1423_v56  ;;  %v1445_v8 = vmul.f32 0.2, %v1381_v14  ;;  %vm1413_vm11 = vcmp.gt.f32.partialorder %v1381_v14, 0.0 }
 0x454   :  { %1555 = vrot.lane.b32.xlu2 %v1473_v0, %s2616_s8  ;;  %1519 = vrot.lane.b32.xlu0 %v1455_v17, %s2616_s8  ;;  %v1459_v37 = vsel %vm1395_vm8, %v1363_v62, %v1427_v58  ;;  %v1457_v46 = vsel %vm1393_vm10, %v1361_v47, %v1425_v6  ;;  %v1443_v13 = vmul.f32 0.2, %v1379_v63  ;;  %vm1411_vm13 = vcmp.gt.f32.partialorder %v1379_v63, 0.0 }
 0x455   :  { %1527 = vrot.lane.b32.xlu1 %v1459_v37, %s2616_s8  ;;  %v1477_v4 = vsel %vm1413_vm11, %v1381_v14, %v1445_v8  ;;  %v1429_v23 = vmul.f32 0.2, %v1365_v34  ;;  %vm1397_vm15 = vcmp.gt.f32.partialorder %v1365_v34, 0.0  ;;  %v1369_v55 = vadd.f32 %v3465_v9, %v1326_v22 }
 0x456   :  { %v1475_v32 = vsel %vm1411_vm13, %v1379_v63, %v1443_v13  ;;  %v1310_v61 = vrot.slane %v3449_v35, 4  ;;  %v1447_v42 = vmul.f32 0.2, %v1383_v30  ;;  %vm1415_vm2 = vcmp.gt.f32.partialorder %v1383_v30, 0.0 }
 0x457   :  { %v1461_v29 = vsel %vm1397_vm15, %v1365_v34, %v1429_v23  ;;  %v1433_v5 = vmul.f32 0.2, %v1369_v55  ;;  %vm1401_vm4 = vcmp.gt.f32.partialorder %v1369_v55, 0.0  ;;  %v1387_v1 = vadd.f32 %v3465_v9, %v1335_v41 }
 0x458   :  { %v1325_v15 = vperm.slane %v1310_v61, 0  ;;  %v1479_v24 = vsel %vm1415_vm2, %v1383_v30, %v1447_v42  ;;  %v1318_v59 = vrot.slane %v3452_v44, 5  ;;  %v1312_v56 = vrot.slane %v3449_v35, 6 }
 0x459   :  { %v1465_v62 = vsel %vm1401_vm4, %v1369_v55, %v1433_v5  ;;  %v1451_v0 = vmul.f32 0.2, %v1387_v1  ;;  %vm1419_vm7 = vcmp.gt.f32.partialorder %v1387_v1, 0.0  ;;  %v1320_v6 = vrot.slane %v3452_v44, 7 }
 0x45a   :  { %v1368_v31 = vadd.f32 %v3457_v54, %v1325_v15  ;;  %v1367_v19 = vadd.f32 %v3465_v9, %v1325_v15  ;;  %v1334_v17 = vperm.slane %v1318_v59, 0  ;;  %v1327_v38 = vperm.slane %v1312_v56, 0 }
 0x45b   :  { %v1483_v12 = vsel %vm1419_vm7, %v1387_v1, %v1451_v0  ;;  %vm1648_vm11 = vcmask 1043456   ;;  %v1313_v23 = vrot.slane %v3449_v35, 7 }
 0x45c   :  { %1525 = vrot.lane.b32.xlu2 %v1458_v43, %s2616_s8  ;;  %1523 = vrot.lane.b32.xlu0 %v1457_v46, %s2616_s8  ;;  %v1432_v58 = vmul.f32 0.2, %v1368_v31  ;;  %v1431_v25 = vmul.f32 0.2, %v1367_v19  ;;  %vm1400_vm5 = vcmp.gt.f32.partialorder %v1368_v31, 0.0  ;;  %vm1399_vm6 = vcmp.gt.f32.partialorder %v1367_v19, 0.0 }
 0x45d   :  { %1563 = vrot.lane.b32.xlu1 %v1477_v4, %s2616_s8  ;;  %v1386_v14 = vadd.f32 %v3457_v54, %v1334_v17  ;;  %v1385_v7 = vadd.f32 %v3465_v9, %v1334_v17  ;;  %v1372_v20 = vadd.f32 %v3457_v54, %v1327_v38  ;;  %v1336_v43 = vperm.slane %v1320_v6, 0  ;;  %2393 = vmatpush.msk.msrb.mxu2 %vm1648_vm11, %v1271_v33 }
 0x45e   :  { %v1464_v47 = vsel %vm1400_vm5, %v1368_v31, %v1432_v58  ;;  %v1463_v37 = vsel %vm1399_vm6, %v1367_v19, %v1431_v25  ;;  %v1371_v63 = vadd.f32 %v3465_v9, %v1327_v38  ;;  %v1370_v4 = vadd.f32 %v3457_v54, %v1326_v22  ;;  %2352 = vmatpush.msk.msrb.mxu0 %vm1648_vm11, %v1271_v33 }
 0x45f   :  { %v1450_v8 = vmul.f32 0.2, %v1386_v14  ;;  %v1449_v45 = vmul.f32 0.2, %v1385_v7  ;;  %v1436_v11 = vmul.f32 0.2, %v1372_v20  ;;  %v1390_v16 = vadd.f32 %v3457_v54, %v1336_v43 }
 0x460   :  { %vm1418_vm8 = vcmp.gt.f32.partialorder %v1386_v14, 0.0  ;;  %vm1417_vm9 = vcmp.gt.f32.partialorder %v1385_v7, 0.0  ;;  %vm1404_vm10 = vcmp.gt.f32.partialorder %v1372_v20, 0.0  ;;  %v1435_v13 = vmul.f32 0.2, %v1371_v63 }
 0x461   :  { %v1482_v46 = vsel %vm1418_vm8, %v1386_v14, %v1450_v8  ;;  %v1481_v50 = vsel %vm1417_vm9, %v1385_v7, %v1449_v45  ;;  %v1468_v49 = vsel %vm1404_vm10, %v1372_v20, %v1436_v11  ;;  %v1434_v28 = vmul.f32 0.2, %v1370_v4 }
 0x462   :  { %v1454_v53 = vmul.f32 0.2, %v1390_v16  ;;  %vm1403_vm12 = vcmp.gt.f32.partialorder %v1371_v63, 0.0  ;;  %vm1402_vm13 = vcmp.gt.f32.partialorder %v1370_v4, 0.0  ;;  %vm1422_vm14 = vcmp.gt.f32.partialorder %v1390_v16, 0.0 }
 0x463   :  { %v1466_v34 = vsel %vm1402_vm13, %v1370_v4, %v1434_v28  ;;  %v1389_v51 = vadd.f32 %v3465_v9, %v1336_v43  ;;  %vm1583_vm5 = vcmask 31744  }
 0x464   :  { %1561 = vrot.lane.b32.xlu2 %v1476_v18, %s2616_s8  ;;  %1559 = vrot.lane.b32.xlu0 %v1475_v32, %s2616_s8  ;;  %v1329_v18 = vperm.slane %v3452_v44, 0  ;;  %v1467_v32 = vsel %vm1403_vm12, %v1371_v63, %v1435_v13  ;;  %v1486_v60 = vsel %vm1422_vm14, %v1390_v16, %v1454_v53 }
 0x465   :  { %1533 = vrot.lane.b32.xlu1 %v1462_v26, %s2616_s8  ;;  %v1388_v26 = vadd.f32 %v3457_v54, %v1335_v41  ;;  %v1453_v2 = vmul.f32 0.2, %v1389_v51  ;;  %vm1421_vm15 = vcmp.gt.f32.partialorder %v1389_v51, 0.0 }
 0x466   :  { %v1376_v52 = vadd.f32 %v3457_v54, %v1329_v18  ;;  %v1375_v5 = vadd.f32 %v3465_v9, %v1329_v18 }
 0x467   :  { %v1452_v3 = vmul.f32 0.2, %v1388_v26  ;;  %vm1420_vm0 = vcmp.gt.f32.partialorder %v1388_v26, 0.0 }
 0x468   :  { %v1440_v22 = vmul.f32 0.2, %v1376_v52  ;;  %vm1408_vm1 = vcmp.gt.f32.partialorder %v1376_v52, 0.0  ;;  %vm1407_vm4 = vcmp.gt.f32.partialorder %v1375_v5, 0.0 }
 0x469   :  { %v1484_v30 = vsel %vm1420_vm0, %v1388_v26, %v1452_v3 }
 0x46a   :  { %v1472_v55 = vsel %vm1408_vm1, %v1376_v52, %v1440_v22  ;;  %v4064_v22 = vld [vmem:[#allocation29_spill] sm:$0xff] }
 0x46c   :  { %1531 = vrot.lane.b32.xlu2 %v1461_v29, %s2616_s8  ;;  %1529 = vrot.lane.b32.xlu0 %v1460_v21, %s2616_s8  ;;  %v1328_v29 = vperm.slane %v1313_v23, 0  ;;  %v1485_v21 = vsel %vm1421_vm15, %v1389_v51, %v1453_v2  ;;  %v4063_v2 = vld [vmem:[#allocation28_spill] sm:$0xff] }
 0x46d   :  { %1569 = vrot.lane.b32.xlu1 %v1480_v57, %s2616_s8 }
 0x46e   :  { %v1374_v39 = vadd.f32 %v3457_v54, %v1328_v29  ;;  %v1373_v57 = vadd.f32 %v3465_v9, %v1328_v29  ;;  %v1439_v54 = vmul.f32 0.2, %v1375_v5 }
 0x470   :  { %v1438_v61 = vmul.f32 0.2, %v1374_v39  ;;  %v1437_v40 = vmul.f32 0.2, %v1373_v57  ;;  %vm1406_vm2 = vcmp.gt.f32.partialorder %v1374_v39, 0.0  ;;  %vm1405_vm3 = vcmp.gt.f32.partialorder %v1373_v57, 0.0 }
 0x471   :  { %v1471_v15 = vsel %vm1407_vm4, %v1375_v5, %v1439_v54 }
 0x472   :  { %v1470_v42 = vsel %vm1406_vm2, %v1374_v39, %v1438_v61  ;;  %v1469_v36 = vsel %vm1405_vm3, %v1373_v57, %v1437_v40 }
 0x474   :  { %1567 = vrot.lane.b32.xlu2 %v1479_v24, %s2616_s8  ;;  %1565 = vrot.lane.b32.xlu0 %v1478_v27, %s2616_s8 }
 0x475   :  { %1539 = vrot.lane.b32.xlu1 %v1465_v62, %s2616_s8 }
 0x47c   :  { %1537 = vrot.lane.b32.xlu2 %v1464_v47, %s2616_s8  ;;  %1535 = vrot.lane.b32.xlu0 %v1463_v37, %s2616_s8 }
 0x47d   :  { %1575 = vrot.lane.b32.xlu1 %v1483_v12, %s2616_s8 }
 0x484   :  { %1573 = vrot.lane.b32.xlu2 %v1482_v46, %s2616_s8  ;;  %1571 = vrot.lane.b32.xlu0 %v1481_v50, %s2616_s8 }
 0x485   :  { %1545 = vrot.lane.b32.xlu1 %v1468_v49, %s2616_s8 }
 0x48c   :  { %1543 = vrot.lane.b32.xlu2 %v1467_v32, %s2616_s8  ;;  %1541 = vrot.lane.b32.xlu0 %v1466_v34, %s2616_s8 }
 0x48d   :  { %1581 = vrot.lane.b32.xlu1 %v1486_v60, %s2616_s8 }
 0x494   :  { %1579 = vrot.lane.b32.xlu2 %v1485_v21, %s2616_s8  ;;  %1577 = vrot.lane.b32.xlu0 %v1484_v30, %s2616_s8 }
 0x495   :  { %1553 = vrot.lane.b32.xlu1 %v1472_v55, %s2616_s8 }
 0x49c   :  { %1549 = vrot.lane.b32.xlu2 %v1470_v42, %s2616_s8  ;;  %1547 = vrot.lane.b32.xlu0 %v1469_v36, %s2616_s8 }
 0x4a4   :  { %1551 = vrot.lane.b32.xlu0 %v1471_v15, %s2616_s8 }
 0x4ae   :  { %v1556_v41 = vpop.permute.xlu2 %1555 }
 0x4af   :  { %2371 = vmatmul.msk.f32.vlgmr.msrb.gmra.mxu2 %vm1583_vm5, %v1556_v41 }
 0x4b6   :  { %v1522_v24 = vpop.permute.xlu1 %1521  ;;  %v1526_v19 = vpop.permute.xlu2 %1525 }
 0x4be   :  { %v1558_v27 = vpop.permute.xlu1 %1557  ;;  %v1562_v59 = vpop.permute.xlu2 %1561 }
 0x4bf   :  { %2372 = vmatmul.msk.f32.gmra.mxu2 %vm1583_vm5, %v1558_v27 }
 0x4c6   :  { %v1520_v31 = vpop.permute.xlu0 %1519  ;;  %v1532_v25 = vpop.permute.xlu2 %1531 }
 0x4c7   :  { %2353 = vmatmul.msk.f32.vlgmr.msrb.gmra.mxu0 %vm1583_vm5, %v1520_v31  ;;  %v1528_v1 = vpop.permute.xlu1 %1527 }
 0x4ce   :  { %v1524_v9 = vpop.permute.xlu0 %1523  ;;  %v1568_v38 = vpop.permute.xlu2 %1567 }
 0x4cf   :  { %2354 = vmatmul.msk.f32.gmra.mxu0 %vm1583_vm5, %v1522_v24  ;;  %v1564_v58 = vpop.permute.xlu1 %1563 }
 0x4d6   :  { %v1560_v62 = vpop.permute.xlu0 %1559  ;;  %v1538_v14 = vpop.permute.xlu2 %1537 }
 0x4d7   :  { %2355 = vmatmul.msk.f32.gmra.mxu0 %vm1583_vm5, %v1524_v9  ;;  %2373 = vmatmul.msk.f32.gmra.mxu2 %vm1583_vm5, %v1560_v62  ;;  %v1534_v17 = vpop.permute.xlu1 %1533  ;;  %v4065_v9 = vld [vmem:[#allocation25_spill] sm:$0xff] }
 0x4de   :  { %v1530_v56 = vpop.permute.xlu0 %1529  ;;  %v1574_v20 = vpop.permute.xlu2 %1573 }
 0x4df   :  { %2356 = vmatmul.msk.f32.gmra.mxu0 %vm1583_vm5, %v1526_v19  ;;  %2374 = vmatmul.msk.f32.gmra.mxu2 %vm1583_vm5, %v1562_v59  ;;  %v1570_v37 = vpop.permute.xlu1 %1569 }
 0x4e6   :  { %v1566_v0 = vpop.permute.xlu0 %1565  ;;  %v1544_v45 = vpop.permute.xlu2 %1543 }
 0x4e7   :  { %2357 = vmatmul.msk.f32.gmra.mxu0 %vm1583_vm5, %v1528_v1  ;;  %2375 = vmatmul.msk.f32.gmra.mxu2 %vm1583_vm5, %v1564_v58  ;;  %v1540_v12 = vpop.permute.xlu1 %1539 }
 0x4ee   :  { %v1536_v47 = vpop.permute.xlu0 %1535  ;;  %v1580_v46 = vpop.permute.xlu2 %1579 }
 0x4ef   :  { %2358 = vmatmul.msk.f32.gmra.mxu0 %vm1583_vm5, %v1530_v56  ;;  %2376 = vmatmul.msk.f32.gmra.mxu2 %vm1583_vm5, %v1566_v0  ;;  %v1576_v8 = vpop.permute.xlu1 %1575 }
 0x4f6   :  { %v1572_v7 = vpop.permute.xlu0 %1571  ;;  %v1550_v49 = vpop.permute.xlu2 %1549 }
 0x4f7   :  { %2359 = vmatmul.msk.f32.gmra.mxu0 %vm1583_vm5, %v1532_v25  ;;  %2377 = vmatmul.msk.f32.gmra.mxu2 %vm1583_vm5, %v1568_v38  ;;  %v1546_v43 = vpop.permute.xlu1 %1545  ;;  %v4066_v25 = vld [vmem:[#allocation26_spill] sm:$0xff] }
 0x4fe   :  { %v1542_v6 = vpop.permute.xlu0 %1541 }
 0x4ff   :  { %2360 = vmatmul.msk.f32.gmra.mxu0 %vm1583_vm5, %v1534_v17  ;;  %2378 = vmatmul.msk.f32.gmra.mxu2 %vm1583_vm5, %v1570_v37  ;;  %v1582_v50 = vpop.permute.xlu1 %1581 }
 0x506   :  { %v1578_v11 = vpop.permute.xlu0 %1577 }
 0x507   :  { %2361 = vmatmul.msk.f32.gmra.mxu0 %vm1583_vm5, %v1536_v47  ;;  %2379 = vmatmul.msk.f32.gmra.mxu2 %vm1583_vm5, %v1572_v7  ;;  %v1554_v52 = vpop.permute.xlu1 %1553 }
 0x50e   :  { %v1548_v63 = vpop.permute.xlu0 %1547 }
 0x50f   :  { %2362 = vmatmul.msk.f32.gmra.mxu0 %vm1583_vm5, %v1538_v14  ;;  %2380 = vmatmul.msk.f32.gmra.mxu2 %vm1583_vm5, %v1574_v20  ;;  %v4067_v20 = vld [vmem:[#allocation23_spill] sm:$0xff] }
 0x516   :  { %v1552_v18 = vpop.permute.xlu0 %1551 }
 0x517   :  { %2363 = vmatmul.msk.f32.gmra.mxu0 %vm1583_vm5, %v1540_v12  ;;  %2381 = vmatmul.msk.f32.gmra.mxu2 %vm1583_vm5, %v1576_v8 }
 0x51f   :  { %2364 = vmatmul.msk.f32.gmra.mxu0 %vm1583_vm5, %v1542_v6  ;;  %2382 = vmatmul.msk.f32.gmra.mxu2 %vm1583_vm5, %v1578_v11 }
 0x527   :  { %2365 = vmatmul.msk.f32.gmra.mxu0 %vm1583_vm5, %v1544_v45  ;;  %2383 = vmatmul.msk.f32.gmra.mxu2 %vm1583_vm5, %v1580_v46 }
 0x52f   :  { %2366 = vmatmul.msk.f32.gmra.mxu0 %vm1583_vm5, %v1546_v43  ;;  %2384 = vmatmul.msk.f32.gmra.mxu2 %vm1583_vm5, %v1582_v50  ;;  %v4068_v43 = vld [vmem:[#allocation27_spill] sm:$0xff] }
 0x532   :  { %v1723_v4 = vpop.f32.mrf.mxu2 }
 0x533   :  { %v1724_v16 = vadd.f32 %v1723_v4, %v3001_v10 }
 0x535   :  { %v1846_v28 = vsel %vm1583_vm5, %v1724_v16, -inf }
 0x537   :  { %2367 = vmatmul.msk.f32.gmra.mxu0 %vm1583_vm5, %v1548_v63 }
 0x53f   :  { %2368 = vmatmul.msk.f32.gmra.mxu0 %vm1583_vm5, %v1550_v49 }
 0x542   :  { %v1726_v33 = vpop.f32.mrf.mxu2 }
 0x543   :  { %v1727_v13 = vadd.f32 %v1726_v33, %v3245_v48 }
 0x544   :  { %v1669_v34 = vpop.f32.mrf.mxu0 }
 0x545   :  { %v1847_v53 = vsel %vm1583_vm5, %v1727_v13, -inf  ;;  %v1670_v3 = vadd.f32 %v1669_v34, %v4063_v2 }
 0x546   :  { %v1848_v32 = vmax.f32 %v1846_v28, %v1847_v53 }
 0x547   :  { %2369 = vmatmul.msk.f32.gmra.mxu0 %vm1583_vm5, %v1552_v18  ;;  %v1765_v30 = vsel %vm1583_vm5, %v1670_v3, -inf }
 0x548   :  { %v1849_v51 = vrot.slane %v1848_v32, 4 }
 0x54a   :  { %v1850_v26 = vmax.f32 %v1848_v32, %v1849_v51 }
 0x54c   :  { %v1851_v60 = vrot.slane %v1850_v26, 2  ;;  %v1672_v10 = vpop.f32.mrf.mxu0 }
 0x54d   :  { %v1673_v29 = vadd.f32 %v1672_v10, %v4064_v22 }
 0x54e   :  { %v1852_v23 = vmax.f32 %v1850_v26, %v1851_v60 }
 0x54f   :  { %2370 = vmatmul.msk.f32.gmra.mxu0 %vm1583_vm5, %v1554_v52  ;;  %v1766_v39 = vsel %vm1583_vm5, %v1673_v29, -inf }
 0x550   :  { %v1853_v48 = vrot.slane %v1852_v23, 1  ;;  %v1767_v57 = vmax.f32 %v1765_v30, %v1766_v39 }
 0x552   :  { %v1854_v21 = vmax.f32 %v1852_v23, %v1853_v48  ;;  %v1768_v40 = vrot.slane %v1767_v57, 4 }
 0x554   :  { %v1927_v55 = vsub.f32 %v1724_v16, %v1854_v21  ;;  %v1928_v61 = vsub.f32 %v1727_v13, %v1854_v21  ;;  %v1769_v5 = vmax.f32 %v1767_v57, %v1768_v40  ;;  %v1675_v54 = vpop.f32.mrf.mxu0  ;;  %v4070_v40 = vld [vmem:[#allocation21_spill] sm:$0xff] }
 0x555   :  { %v1676_v19 = vadd.f32 %v1675_v54, %v4065_v9 }
 0x556   :  { %v1977_v42 = vmul.f32 1.442695, %v1927_v55  ;;  %v1979_v36 = vmul.f32 1.442695, %v1928_v61  ;;  %v1770_v15 = vrot.slane %v1769_v5, 2 }
 0x557   :  { %v1774_v37 = vsel %vm1583_vm5, %v1676_v19, -inf }
 0x558   :  { %2505 = vpow2.f32 %v1977_v42  ;;  %v1771_v24 = vmax.f32 %v1769_v5, %v1770_v15 }
 0x559   :  { %2507 = vpow2.f32 %v1979_v36 }
 0x55a   :  { %v1729_v41 = vpop.f32.mrf.mxu2  ;;  %v1772_v27 = vrot.slane %v1771_v24, 1 }
 0x55b   :  { %v1730_v6 = vadd.f32 %v1729_v41, %v4067_v20 }
 0x55c   :  { %v1773_v59 = vmax.f32 %v1771_v24, %v1772_v27  ;;  %v1678_v56 = vpop.f32.mrf.mxu0  ;;  %v4071_v24 = vld [vmem:[#allocation18_spill] sm:$0xff] }
 0x55d   :  { %v1679_v0 = vadd.f32 %v1678_v56, %v4066_v25  ;;  %v1855_v63 = vsel %vm1583_vm5, %v1730_v6, -inf }
 0x55e   :  { %v3582_v31 = vpop.eup %2505  ;;  %v1909_v38 = vsub.f32 %v1670_v3, %v1773_v59  ;;  %v1910_v47 = vsub.f32 %v1673_v29, %v1773_v59  ;;  %v4069_v29 = vld [vmem:[#allocation24_spill] sm:$0xff] }
 0x55f   :  { %v3585_v62 = vpop.eup %2507  ;;  %v2086_v1 = vsel %vm1583_vm5, %v3582_v31, 0.0  ;;  %v1775_v14 = vsel %vm1583_vm5, %v1679_v0, -inf }
 0x560   :  { %v2087_v58 = vsel %vm1583_vm5, %v3585_v62, 0.0  ;;  %v1941_v7 = vmul.f32 1.442695, %v1909_v38  ;;  %v1943_v12 = vmul.f32 1.442695, %v1910_v47  ;;  %v1776_v8 = vmax.f32 %v1774_v37, %v1775_v14 }
 0x561   :  { %v2088_v17 = vadd.f32 %v2087_v58, %v2086_v1 }
 0x562   :  { %v1732_v45 = vpop.f32.mrf.mxu2  ;;  %2509 = vpow2.f32 %v1941_v7  ;;  %v1777_v11 = vrot.slane %v1776_v8, 4 }
 0x563   :  { %v1733_v46 = vadd.f32 %v1732_v45, %v4068_v43  ;;  %2511 = vpow2.f32 %v1943_v12  ;;  %v2089_v50 = vrot.slane %v2088_v17, 4 }
 0x564   :  { %v1778_v4 = vmax.f32 %v1776_v8, %v1777_v11  ;;  %v1681_v13 = vpop.f32.mrf.mxu0 }
 0x565   :  { %v1856_v49 = vsel %vm1583_vm5, %v1733_v46, -inf  ;;  %v2090_v18 = vadd.f32 %v2089_v50, %v2088_v17  ;;  %v3607_v21 = vadd.f32 %v1681_v13, %v4069_v29  ;;  %v4072_v17 = vld [vmem:[#allocation20_spill] sm:$0xff] }
 0x566   :  { %v1857_v16 = vmax.f32 %v1855_v63, %v1856_v49  ;;  %v1779_v33 = vrot.slane %v1778_v4, 2 }
 0x567   :  { %v2091_v10 = vrot.slane %v2090_v18, 2  ;;  %v1783_v41 = vsel %vm1583_vm5, %v3607_v21, -inf }
 0x568   :  { %v1858_v28 = vrot.slane %v1857_v16, 4  ;;  %v3598_v53 = vpop.eup %2509  ;;  %v1780_v32 = vmax.f32 %v1778_v4, %v1779_v33 }
 0x569   :  { %v3600_v34 = vpop.eup %2511  ;;  %v2005_v51 = vsel %vm1583_vm5, %v3598_v53, 0.0  ;;  %v2092_v54 = vadd.f32 %v2091_v10, %v2090_v18 }
 0x56a   :  { %v1859_v26 = vmax.f32 %v1857_v16, %v1858_v28  ;;  %v1735_v60 = vpop.f32.mrf.mxu2  ;;  %v2006_v52 = vsel %vm1583_vm5, %v3600_v34, 0.0  ;;  %v1781_v23 = vrot.slane %v1780_v32, 1 }
 0x56b   :  { %v2007_v2 = vadd.f32 %v2006_v52, %v2005_v51  ;;  %v3615_v27 = vadd.f32 %v1735_v60, %v4071_v24  ;;  %v2093_v59 = vrot.slane %v2092_v54, 1 }
 0x56c   :  { %v1860_v3 = vrot.slane %v1859_v26, 2  ;;  %v1782_v48 = vmax.f32 %v1780_v32, %v1781_v23  ;;  %v1684_v55 = vpop.f32.mrf.mxu0 }
 0x56d   :  { %v2008_v30 = vrot.slane %v2007_v2, 4  ;;  %v3610_v42 = vadd.f32 %v1684_v55, %v4070_v40  ;;  %v2094_v47 = vadd.f32 %v2093_v59, %v2092_v54  ;;  %v1864_v7 = vsel %vm1583_vm5, %v3615_v27, -inf }
 0x56e   :  { %v1861_v22 = vmax.f32 %v1859_v26, %v1860_v3  ;;  %v1911_v39 = vsub.f32 %v1676_v19, %v1782_v48  ;;  %v1912_v57 = vsub.f32 %v1679_v0, %v1782_v48 }
 0x56f   :  { %v1784_v9 = vsel %vm1583_vm5, %v3610_v42, -inf  ;;  %v2009_v19 = vadd.f32 %v2008_v30, %v2007_v2 }
 0x570   :  { %v1862_v61 = vrot.slane %v1861_v22, 1  ;;  %v1945_v36 = vmul.f32 1.442695, %v1911_v39  ;;  %v1947_v5 = vmul.f32 1.442695, %v1912_v57  ;;  %v1785_v1 = vmax.f32 %v1783_v41, %v1784_v9  ;;  %v4073_v39 = vld [vmem:[#allocation16_spill] sm:$0xff] }
 0x571   :  { %v2010_v12 = vrot.slane %v2009_v19, 2 }
 0x572   :  { %v1863_v15 = vmax.f32 %v1861_v22, %v1862_v61  ;;  %2513 = vpow2.f32 %v1945_v36  ;;  %v1738_v25 = vpop.f32.mrf.mxu2  ;;  %v1786_v0 = vrot.slane %v1785_v1, 4  ;;  %v4074_v36 = vld [vmem:[#allocation22_spill] sm:$0xff] }
 0x573   :  { %2515 = vpow2.f32 %v1947_v5  ;;  %v3620_v38 = vadd.f32 %v1738_v25, %v4072_v17  ;;  %v2011_v16 = vadd.f32 %v2010_v12, %v2009_v19 }
 0x574   :  { %v1929_v56 = vsub.f32 %v1730_v6, %v1863_v15  ;;  %v1930_v58 = vsub.f32 %v1733_v46, %v1863_v15  ;;  %v1787_v20 = vmax.f32 %v1785_v1, %v1786_v0  ;;  %2517 = vrcp.f32 %v2094_v47  ;;  %v1687_v43 = vpop.f32.mrf.mxu0 }
 0x575   :  { %v1865_v8 = vsel %vm1583_vm5, %v3620_v38, -inf  ;;  %v2012_v51 = vrot.slane %v2011_v16, 1  ;;  %v1688_v57 = vadd.f32 %v1687_v43, %v4073_v39 }
 0x576   :  { %v1981_v37 = vmul.f32 1.442695, %v1929_v56  ;;  %v1983_v14 = vmul.f32 1.442695, %v1930_v58  ;;  %v1866_v6 = vmax.f32 %v1864_v7, %v1865_v8  ;;  %v1788_v11 = vrot.slane %v1787_v20, 2 }
 0x577   :  { %v2013_v22 = vadd.f32 %v2012_v51, %v2011_v16  ;;  %v1792_v9 = vsel %vm1583_vm5, %v1688_v57, -inf }
 0x578   :  { %2519 = vpow2.f32 %v1981_v37  ;;  %v3626_v45 = vpop.eup %2513  ;;  %v1867_v63 = vrot.slane %v1866_v6, 4  ;;  %v1789_v49 = vmax.f32 %v1787_v20, %v1788_v11 }
 0x579   :  { %2521 = vpow2.f32 %v1983_v14  ;;  %v3628_v46 = vpop.eup %2515  ;;  %v2014_v50 = vsel %vm1583_vm5, %v3626_v45, 0.0 }
 0x57a   :  { %v2015_v4 = vsel %vm1583_vm5, %v3628_v46, 0.0  ;;  %v1868_v13 = vmax.f32 %v1866_v6, %v1867_v63  ;;  %v3634_v28 = vpop.f32.mrf.mxu2  ;;  %v2518_v18 = vpop.eup %2517  ;;  %v1790_v32 = vrot.slane %v1789_v49, 1  ;;  %2523 = vrcp.f32 %v2013_v22 }
 0x57b   :  { %v2016_v33 = vadd.f32 %v2015_v4, %v2014_v50  ;;  %v3639_v52 = vmul.f32 %v2518_v18, %v3585_v62  ;;  %v3642_v23 = vmul.f32 %v2518_v18, %v3582_v31 }
 0x57c   :  { %v1869_v60 = vrot.slane %v1868_v13, 2  ;;  %v1791_v48 = vmax.f32 %v1789_v49, %v1790_v32  ;;  %v1690_v61 = vpop.f32.mrf.mxu0 }
 0x57d   :  { %v2017_v3 = vrot.slane %v2016_v33, 4  ;;  %v1691_v5 = vadd.f32 %v1690_v61, %v4074_v36 }
 0x57e   :  { %v3636_v26 = vpop.eup %2519  ;;  %v1870_v30 = vmax.f32 %v1868_v13, %v1869_v60  ;;  %v1913_v62 = vsub.f32 %v3607_v21, %v1791_v48  ;;  %v1914_v31 = vsub.f32 %v3610_v42, %v1791_v48 }
 0x57f   :  { %v3644_v2 = vpop.eup %2521  ;;  %v2095_v10 = vsel %vm1583_vm5, %v3636_v26, 0.0  ;;  %v2018_v54 = vadd.f32 %v2017_v3, %v2016_v33  ;;  %v1793_v19 = vsel %vm1583_vm5, %v1691_v5, -inf }
 0x580   :  { %v2096_v29 = vsel %vm1583_vm5, %v3644_v2, 0.0  ;;  %v1871_v40 = vrot.slane %v1870_v30, 1  ;;  %v1949_v15 = vmul.f32 1.442695, %v1913_v62  ;;  %v1951_v41 = vmul.f32 1.442695, %v1914_v31  ;;  %v2524_v0 = vpop.eup %2523 }
 0x581   :  { %v2097_v55 = vadd.f32 %v2096_v29, %v2095_v10  ;;  %v1794_v59 = vmax.f32 %v1792_v9, %v1793_v19  ;;  %v2019_v58 = vrot.slane %v2018_v54, 2  ;;  %v3659_v7 = vmul.f32 %v2524_v0, %v3600_v34 }
 0x582   :  { %v1872_v24 = vmax.f32 %v1870_v30, %v1871_v40  ;;  %2525 = vpow2.f32 %v1949_v15  ;;  %v1744_v56 = vpop.f32.mrf.mxu2  ;;  %v3662_v12 = vmul.f32 %v2524_v0, %v3598_v53 }
 0x583   :  { %v2098_v1 = vrot.slane %v2097_v55, 4  ;;  %2527 = vpow2.f32 %v1951_v41  ;;  %v1795_v25 = vrot.slane %v1794_v59, 4  ;;  %4075 = vst [vmem:[#allocation28_spill] sm:$0xff] %v3659_v7  ;;  %v2020_v8 = vadd.f32 %v2019_v58, %v2018_v54  ;;  %v4078_v54 = vld [vmem:[#allocation19_spill] sm:$0xff] }
 0x584   :  { %v1931_v21 = vsub.f32 %v3615_v27, %v1872_v24  ;;  %v1932_v42 = vsub.f32 %v3620_v38, %v1872_v24  ;;  %4076 = vst [vmem:[#allocation29_spill] sm:$0xff] %v3662_v12  ;;  %v1693_v38 = vpop.f32.mrf.mxu0  ;;  %v3685_v15 = vadd.f32 %v3634_v28, %v4078_v54  ;;  %v4079_v24 = vld [vmem:[#allocation10_spill] sm:$0xff]  ;;  %v4085_v54 = vld [vmem:[#allocation9_spill] sm:$0xff] }
 0x585   :  { %v2099_v37 = vadd.f32 %v2098_v1, %v2097_v55  ;;  %v1796_v14 = vmax.f32 %v1794_v59, %v1795_v25  ;;  %v2021_v63 = vrot.slane %v2020_v8, 1  ;;  %v4077_v55 = vld [vmem:[#allocation15_spill] sm:$0xff]  ;;  %v4080_v59 = vld [vmem:[#allocation17_spill] sm:$0xff] }
 0x586   :  { %v1985_v17 = vmul.f32 1.442695, %v1931_v21  ;;  %v1987_v47 = vmul.f32 1.442695, %v1932_v42  ;;  %v3681_v62 = vadd.f32 %v1744_v56, %v4077_v55  ;;  %v1873_v28 = vsel %vm1583_vm5, %v3685_v15, -inf  ;;  %v4082_v25 = vld [vmem:[#allocation13_spill] sm:$0xff] }
 0x587   :  { %v1797_v27 = vrot.slane %v1796_v14, 2  ;;  %v2100_v43 = vrot.slane %v2099_v37, 2  ;;  %v2022_v16 = vadd.f32 %v2021_v63, %v2020_v8 }
 0x588   :  { %2529 = vpow2.f32 %v1985_v17  ;;  %v3664_v20 = vpop.eup %2525  ;;  %v1874_v1 = vsel %vm1583_vm5, %v3681_v62, -inf }
 0x589   :  { %2531 = vpow2.f32 %v1987_v47  ;;  %v3666_v6 = vpop.eup %2527  ;;  %v2023_v11 = vsel %vm1583_vm5, %v3664_v20, 0.0  ;;  %v1798_v50 = vmax.f32 %v1796_v14, %v1797_v27  ;;  %v2101_v60 = vadd.f32 %v2100_v43, %v2099_v37 }
 0x58a   :  { %v2024_v34 = vsel %vm1583_vm5, %v3666_v6, 0.0  ;;  %v1747_v4 = vpop.f32.mrf.mxu2  ;;  %2533 = vrcp.f32 %v2022_v16  ;;  %v1875_v37 = vmax.f32 %v1873_v28, %v1874_v1 }
 0x58b   :  { %v2025_v53 = vadd.f32 %v2024_v34, %v2023_v11  ;;  %v1799_v49 = vrot.slane %v1798_v50, 1  ;;  %v2102_v39 = vrot.slane %v2101_v60, 1  ;;  %v3688_v9 = vadd.f32 %v1747_v4, %v4079_v24 }
 0x58c   :  { %v1696_v30 = vpop.f32.mrf.mxu0 }
 0x58d   :  { %v2026_v13 = vrot.slane %v2025_v53, 4  ;;  %v1800_v51 = vmax.f32 %v1798_v50, %v1799_v49  ;;  %v2103_v36 = vadd.f32 %v2102_v39, %v2101_v60  ;;  %v1882_v58 = vsel %vm1583_vm5, %v3688_v9, -inf }
 0x58e   :  { %v3672_v33 = vpop.eup %2529  ;;  %v3706_v0 = vadd.f32 %v1696_v30, %v4082_v25 }
 0x58f   :  { %v3674_v18 = vpop.eup %2531  ;;  %v2104_v32 = vsel %vm1583_vm5, %v3672_v33, 0.0  ;;  %v2027_v3 = vadd.f32 %v2026_v13, %v2025_v53  ;;  %v1915_v22 = vsub.f32 %v1688_v57, %v1800_v51  ;;  %v1916_v29 = vsub.f32 %v1691_v5, %v1800_v51 }
 0x590   :  { %v2105_v10 = vsel %vm1583_vm5, %v3674_v18, 0.0  ;;  %v2534_v57 = vpop.eup %2533  ;;  %v1802_v4 = vsel %vm1583_vm5, %v3706_v0, -inf }
 0x591   :  { %v2106_v48 = vadd.f32 %v2105_v10, %v2104_v32  ;;  %v1953_v61 = vmul.f32 1.442695, %v1915_v22  ;;  %v1955_v40 = vmul.f32 1.442695, %v1916_v29  ;;  %v2028_v41 = vrot.slane %v2027_v3, 2 }
 0x592   :  { %v1750_v5 = vpop.f32.mrf.mxu2  ;;  %v3698_v42 = vmul.f32 %v2534_v57, %v3628_v46  ;;  %v3701_v56 = vmul.f32 %v2534_v57, %v3626_v45  ;;  %v4083_v46 = vld [vmem:[#allocation12_spill] sm:$0xff]  ;;  %v1876_v32 = vrot.slane %v1875_v37, 4 }
 0x593   :  { %v2107_v31 = vrot.slane %v2106_v48, 4  ;;  %2535 = vpow2.f32 %v1953_v61  ;;  %v3693_v21 = vadd.f32 %v1750_v5, %v4080_v59  ;;  %v2029_v47 = vadd.f32 %v2028_v41, %v2027_v3  ;;  %v4086_v59 = vld [vmem:[#allocation5_spill] sm:$0xff] }
 0x594   :  { %2537 = vpow2.f32 %v1955_v40  ;;  %4081 = vst [vmem:[#allocation25_spill] sm:$0xff] %v3701_v56  ;;  %v3713_v11 = vadd.f32 %v1693_v38, %v4083_v46  ;;  %v1699_v45 = vpop.f32.mrf.mxu0  ;;  %v1877_v55 = vmax.f32 %v1875_v37, %v1876_v32  ;;  %v4087_v46 = vld [vmem:[#allocation7_spill] sm:$0xff] }
 0x595   :  { %v2108_v19 = vadd.f32 %v2107_v31, %v2106_v48  ;;  %2539 = vrcp.f32 %v2103_v36  ;;  %v1883_v17 = vsel %vm1583_vm5, %v3693_v21, -inf  ;;  %v2030_v43 = vrot.slane %v2029_v47, 1  ;;  %v4084_v31 = vld [vmem:[#allocation14_spill] sm:$0xff] }
 0x596   :  { %v1884_v14 = vmax.f32 %v1882_v58, %v1883_v17  ;;  %v1801_v60 = vsel %vm1583_vm5, %v3713_v11, -inf  ;;  %v3732_v61 = vadd.f32 %v1699_v45, %v4084_v31  ;;  %v1878_v5 = vrot.slane %v1877_v55, 2 }
 0x597   :  { %v2109_v8 = vrot.slane %v2108_v19, 2  ;;  %v2031_v16 = vadd.f32 %v2030_v43, %v2029_v47  ;;  %v1803_v22 = vmax.f32 %v1801_v60, %v1802_v4 }
 0x598   :  { %v1885_v49 = vrot.slane %v1884_v14, 4 }
 0x599   :  { %v3710_v27 = vpop.eup %2535  ;;  %v2110_v3 = vadd.f32 %v2109_v8, %v2108_v19  ;;  %2541 = vrcp.f32 %v2031_v16  ;;  %v1804_v36 = vrot.slane %v1803_v22, 4  ;;  %v1810_v19 = vsel %vm1583_vm5, %v3732_v61, -inf }
 0x59a   :  { %v3715_v34 = vpop.eup %2537  ;;  %v2032_v50 = vsel %vm1583_vm5, %v3710_v27, 0.0  ;;  %v1753_v38 = vpop.f32.mrf.mxu2  ;;  %v1886_v29 = vmax.f32 %v1884_v14, %v1885_v49 }
 0x59b   :  { %v2540_v63 = vpop.eup %2539  ;;  %v2033_v53 = vsel %vm1583_vm5, %v3715_v34, 0.0  ;;  %v2111_v30 = vrot.slane %v2110_v3, 1  ;;  %v3742_v28 = vadd.f32 %v1753_v38, %v4086_v59  ;;  %v1805_v17 = vmax.f32 %v1803_v22, %v1804_v36 }
 0x59c   :  { %v2034_v13 = vadd.f32 %v2033_v53, %v2032_v50  ;;  %v3724_v51 = vmul.f32 %v2540_v63, %v3644_v2  ;;  %v3729_v10 = vmul.f32 %v2540_v63, %v3636_v26  ;;  %v1702_v40 = vpop.f32.mrf.mxu0  ;;  %v1887_v57 = vrot.slane %v1886_v29, 2 }
 0x59d   :  { %v2112_v2 = vadd.f32 %v2111_v30, %v2110_v3  ;;  %v3735_v41 = vadd.f32 %v1702_v40, %v4085_v54  ;;  %v1879_v50 = vmax.f32 %v1877_v55, %v1878_v5  ;;  %v1891_v53 = vsel %vm1583_vm5, %v3742_v28, -inf }
 0x59e   :  { %v2035_v48 = vrot.slane %v2034_v13, 4  ;;  %v1888_v14 = vmax.f32 %v1886_v29, %v1887_v57 }
 0x59f   :  { %2543 = vrcp.f32 %v2112_v2  ;;  %v2542_v26 = vpop.eup %2541  ;;  %v1811_v1 = vsel %vm1583_vm5, %v3735_v41, -inf  ;;  %v1880_v22 = vrot.slane %v1879_v50, 1  ;;  %v4088_v2 = vld [vmem:[#allocation3_spill] sm:$0xff] }
 0x5a0   :  { %v2036_v39 = vadd.f32 %v2035_v48, %v2034_v13  ;;  %v1812_v58 = vmax.f32 %v1810_v19, %v1811_v1  ;;  %v3745_v25 = vmul.f32 %v2542_v26, %v3666_v6  ;;  %v3748_v37 = vmul.f32 %v2542_v26, %v3664_v20  ;;  %v4089_v26 = vld [vmem:[#allocation11_spill] sm:$0xff] }
 0x5a1   :  { %v1806_v20 = vrot.slane %v1805_v17, 2  ;;  %v1889_v38 = vrot.slane %v1888_v14, 1 }
 0x5a2   :  { %v2037_v24 = vrot.slane %v2036_v39, 2  ;;  %v1756_v47 = vpop.f32.mrf.mxu2  ;;  %v1813_v8 = vrot.slane %v1812_v58, 4 }
 0x5a3   :  { %v1757_v45 = vadd.f32 %v1756_v47, %v4087_v46  ;;  %v1807_v55 = vmax.f32 %v1805_v17, %v1806_v20  ;;  %v1890_v31 = vmax.f32 %v1888_v14, %v1889_v38 }
 0x5a4   :  { %v2038_v43 = vadd.f32 %v2037_v24, %v2036_v39  ;;  %v1814_v4 = vmax.f32 %v1812_v58, %v1813_v8  ;;  %v1705_v6 = vpop.f32.mrf.mxu0  ;;  %v4090_v8 = vld [vmem:[#allocation4_spill] sm:$0xff] }
 0x5a5   :  { %v2544_v63 = vpop.eup %2543  ;;  %v1892_v49 = vsel %vm1583_vm5, %v1757_v45, -inf  ;;  %v3761_v36 = vadd.f32 %v1705_v6, %v4088_v2  ;;  %v1808_v5 = vrot.slane %v1807_v55, 1  ;;  %v1935_v19 = vsub.f32 %v3688_v9, %v1890_v31 }
 0x5a6   :  { %v2039_v16 = vrot.slane %v2038_v43, 1  ;;  %v1893_v13 = vmax.f32 %v1891_v53, %v1892_v49  ;;  %v3755_v32 = vmul.f32 %v2544_v63, %v3674_v18  ;;  %v3758_v60 = vmul.f32 %v2544_v63, %v3672_v33 }
 0x5a7   :  { %v1815_v29 = vrot.slane %v1814_v4, 2  ;;  %v1881_v18 = vmax.f32 %v1879_v50, %v1880_v22  ;;  %v1819_v58 = vsel %vm1583_vm5, %v3761_v36, -inf  ;;  %v1936_v50 = vsub.f32 %v3693_v21, %v1890_v31 }
 0x5a8   :  { %v2040_v3 = vadd.f32 %v2039_v16, %v2038_v43  ;;  %v1894_v48 = vrot.slane %v1893_v13, 4  ;;  %v1809_v49 = vmax.f32 %v1807_v55, %v1808_v5  ;;  %v1993_v6 = vmul.f32 1.442695, %v1935_v19  ;;  %v4092_v19 = vld [vmem:[#allocation6_spill] sm:$0xff] }
 0x5a9   :  { %v1816_v54 = vmax.f32 %v1814_v4, %v1815_v29  ;;  %v1933_v47 = vsub.f32 %v3685_v15, %v1881_v18  ;;  %v1934_v20 = vsub.f32 %v3681_v62, %v1881_v18  ;;  %v1995_v29 = vmul.f32 1.442695, %v1936_v50 }
 0x5aa   :  { %v1895_v30 = vmax.f32 %v1893_v13, %v1894_v48  ;;  %v1759_v39 = vpop.f32.mrf.mxu2  ;;  %2545 = vrcp.f32 %v2040_v3  ;;  %v4091_v13 = vld [vmem:[#allocation8_spill] sm:$0xff] }
 0x5ab   :  { %v1817_v14 = vrot.slane %v1816_v54, 1  ;;  %v3773_v46 = vadd.f32 %v1759_v39, %v4090_v8  ;;  %v1989_v31 = vmul.f32 1.442695, %v1933_v47  ;;  %2547 = vpow2.f32 %v1993_v6 }
 0x5ac   :  { %v1896_v40 = vrot.slane %v1895_v30, 2  ;;  %v1708_v24 = vpop.f32.mrf.mxu0 }
 0x5ad   :  { %v3764_v33 = vadd.f32 %v1708_v24, %v4089_v26  ;;  %v1818_v21 = vmax.f32 %v1816_v54, %v1817_v14  ;;  %v1900_v48 = vsel %vm1583_vm5, %v3773_v46, -inf  ;;  %v1918_v54 = vsub.f32 %v3706_v0, %v1809_v49 }
 0x5ae   :  { %v1897_v57 = vmax.f32 %v1895_v30, %v1896_v40  ;;  %v1917_v40 = vsub.f32 %v3713_v11, %v1809_v49 }
 0x5af   :  { %v1820_v17 = vsel %vm1583_vm5, %v3764_v33, -inf  ;;  %v1919_v2 = vsub.f32 %v3732_v61, %v1818_v21  ;;  %v1920_v24 = vsub.f32 %v3735_v41, %v1818_v21  ;;  %v1959_v0 = vmul.f32 1.442695, %v1918_v54  ;;  %v4093_v41 = vld [vmem:[#allocation2_spill] sm:$0xff] }
 0x5b0   :  { %v2546_v1 = vpop.eup %2545  ;;  %v1898_v59 = vrot.slane %v1897_v57, 1  ;;  %v1821_v43 = vmax.f32 %v1819_v58, %v1820_v17  ;;  %v1957_v26 = vmul.f32 1.442695, %v1917_v40 }
 0x5b1   :  { %v3777_v9 = vmul.f32 %v2546_v1, %v3715_v34  ;;  %v3780_v4 = vmul.f32 %v2546_v1, %v3710_v27  ;;  %v1961_v58 = vmul.f32 1.442695, %v1919_v2  ;;  %v1963_v14 = vmul.f32 1.442695, %v1920_v24 }
 0x5b2   :  { %v1899_v63 = vmax.f32 %v1897_v57, %v1898_v59  ;;  %v1762_v53 = vpop.f32.mrf.mxu2  ;;  %v1822_v16 = vrot.slane %v1821_v43, 4  ;;  %v3798_v59 = vpop.eup %2547 }
 0x5b3   :  { %v3783_v15 = vadd.f32 %v1762_v53, %v4091_v13 }
 0x5b4   :  { %v1937_v38 = vsub.f32 %v3742_v28, %v1899_v63  ;;  %v1938_v3 = vsub.f32 %v1757_v45, %v1899_v63  ;;  %v1823_v34 = vmax.f32 %v1821_v43, %v1822_v16  ;;  %v1711_v22 = vpop.f32.mrf.mxu0  ;;  %v1991_v28 = vmul.f32 1.442695, %v1934_v20 }
 0x5b5   :  { %v1901_v27 = vsel %vm1583_vm5, %v3783_v15, -inf  ;;  %v3796_v1 = vadd.f32 %v1711_v22, %v4092_v19  ;;  %v2122_v22 = vsel %vm1583_vm5, %v3798_v59, 0.0 }
 0x5b6   :  { %v1997_v30 = vmul.f32 1.442695, %v1937_v38  ;;  %v1999_v39 = vmul.f32 1.442695, %v1938_v3  ;;  %v1902_v55 = vmax.f32 %v1900_v48, %v1901_v27  ;;  %v1824_v62 = vrot.slane %v1823_v34, 2 }
 0x5b7   :  { %v1828_v20 = vsel %vm1583_vm5, %v3796_v1, -inf }
 0x5b8   :  { %2549 = vpow2.f32 %v1997_v30  ;;  %v1903_v45 = vrot.slane %v1902_v55, 4  ;;  %v1825_v18 = vmax.f32 %v1823_v34, %v1824_v62 }
 0x5b9   :  { %2551 = vpow2.f32 %v1999_v39 }
 0x5ba   :  { %2553 = vpow2.f32 %v1995_v29  ;;  %v1904_v57 = vmax.f32 %v1902_v55, %v1903_v45  ;;  %v1826_v5 = vrot.slane %v1825_v18, 1 }
 0x5bb   :  { %2555 = vpow2.f32 %v1989_v31 }
 0x5bc   :  { %2557 = vpow2.f32 %v1991_v28  ;;  %v1905_v11 = vrot.slane %v1904_v57, 2  ;;  %v1827_v61 = vmax.f32 %v1825_v18, %v1826_v5  ;;  %v1714_v17 = vpop.f32.mrf.mxu0 }
 0x5bd   :  { %v3803_v43 = vadd.f32 %v1714_v17, %v4093_v41  ;;  %2559 = vpow2.f32 %v1957_v26 }
 0x5be   :  { %v3800_v47 = vpop.eup %2549  ;;  %v1906_v8 = vmax.f32 %v1904_v57, %v1905_v11  ;;  %v1921_v53 = vsub.f32 %v3761_v36, %v1827_v61  ;;  %v1922_v49 = vsub.f32 %v3764_v33, %v1827_v61  ;;  %2561 = vpow2.f32 %v1961_v58 }
 0x5bf   :  { %v3805_v50 = vpop.eup %2551  ;;  %v2131_v63 = vsel %vm1583_vm5, %v3800_v47, 0.0  ;;  %v1829_v38 = vsel %vm1583_vm5, %v3803_v43, -inf  ;;  %2563 = vpow2.f32 %v1963_v14 }
 0x5c0   :  { %v3811_v6 = vpop.eup %2553  ;;  %v2132_v16 = vsel %vm1583_vm5, %v3805_v50, 0.0  ;;  %v1907_v13 = vrot.slane %v1906_v8, 1  ;;  %v1965_v21 = vmul.f32 1.442695, %v1921_v53  ;;  %v1967_v48 = vmul.f32 1.442695, %v1922_v49 }
 0x5c1   :  { %v3819_v3 = vpop.eup %2555  ;;  %v1830_v36 = vmax.f32 %v1828_v20, %v1829_v38  ;;  %v2133_v33 = vadd.f32 %v2132_v16, %v2131_v63  ;;  %v2123_v29 = vsel %vm1583_vm5, %v3811_v6, 0.0  ;;  %v4094_v49 = vld [vmem:[#allocation30_spill] sm:$0xff] }
 0x5c2   :  { %v3821_v34 = vpop.eup %2557  ;;  %v1908_v27 = vmax.f32 %v1906_v8, %v1907_v13  ;;  %2565 = vpow2.f32 %v1965_v21  ;;  %v2113_v40 = vsel %vm1583_vm5, %v3819_v3, 0.0  ;;  %v2124_v2 = vadd.f32 %v2123_v29, %v2122_v22  ;;  %v4095_v22 = vld [vmem:[#allocation31_spill] sm:$0xff] }
 0x5c3   :  { %v1831_v30 = vrot.slane %v1830_v36, 4  ;;  %2567 = vpow2.f32 %v1967_v48  ;;  %v3829_v31 = vpop.eup %2559  ;;  %v2114_v62 = vsel %vm1583_vm5, %v3821_v34, 0.0  ;;  %v2134_v18 = vrot.slane %v2133_v33, 4 }
 0x5c4   :  { %v1939_v39 = vsub.f32 %v3773_v46, %v1908_v27  ;;  %v1940_v55 = vsub.f32 %v3783_v15, %v1908_v27  ;;  %2569 = vpow2.f32 %v1959_v0  ;;  %v1717_v45 = vpop.f32.mrf.mxu0  ;;  %v3835_v57 = vpop.eup %2561  ;;  %v2115_v5 = vadd.f32 %v2114_v62, %v2113_v40 }
 0x5c5   :  { %v1832_v28 = vmax.f32 %v1830_v36, %v1831_v30  ;;  %v3837_v26 = vpop.eup %2563  ;;  %v2125_v58 = vrot.slane %v2124_v2, 4  ;;  %v2135_v61 = vadd.f32 %v2134_v18, %v2133_v33  ;;  %v2050_v41 = vsel %vm1583_vm5, %v3835_v57, 0.0 }
 0x5c6   :  { %v2001_v54 = vmul.f32 1.442695, %v1939_v39  ;;  %v2003_v24 = vmul.f32 1.442695, %v1940_v55  ;;  %v2051_v63 = vsel %vm1583_vm5, %v3837_v26, 0.0  ;;  %v3854_v16 = vadd.f32 %v1717_v45, %v4094_v49 }
 0x5c7   :  { %v1833_v46 = vrot.slane %v1832_v28, 2  ;;  %v2116_v13 = vrot.slane %v2115_v5, 4  ;;  %v2041_v20 = vsel %vm1583_vm5, %v3829_v31, 0.0  ;;  %v2126_v33 = vadd.f32 %v2125_v58, %v2124_v2 }
 0x5c8   :  { %2571 = vpow2.f32 %v2001_v54  ;;  %v3839_v15 = vpop.eup %2565  ;;  %v2136_v27 = vrot.slane %v2135_v61, 2  ;;  %v2052_v39 = vadd.f32 %v2051_v63, %v2050_v41  ;;  %v1837_v2 = vsel %vm1583_vm5, %v3854_v16, -inf }
 0x5c9   :  { %2573 = vpow2.f32 %v2003_v24  ;;  %v1834_v11 = vmax.f32 %v1832_v28, %v1833_v46  ;;  %v3841_v19 = vpop.eup %2567  ;;  %v2059_v17 = vsel %vm1583_vm5, %v3839_v15, 0.0  ;;  %v2127_v58 = vrot.slane %v2126_v33, 2 }
 0x5ca   :  { %v3845_v0 = vpop.eup %2569  ;;  %v2060_v14 = vsel %vm1583_vm5, %v3841_v19, 0.0  ;;  %v2053_v41 = vrot.slane %v2052_v39, 4 }
 0x5cb   :  { %v1835_v8 = vrot.slane %v1834_v11, 1  ;;  %v2061_v53 = vadd.f32 %v2060_v14, %v2059_v17  ;;  %v2042_v36 = vsel %vm1583_vm5, %v3845_v0, 0.0  ;;  %v2137_v17 = vadd.f32 %v2136_v27, %v2135_v61 }
 0x5cc   :  { %v1720_v21 = vpop.f32.mrf.mxu0  ;;  %v2117_v14 = vadd.f32 %v2116_v13, %v2115_v5 }
 0x5cd   :  { %v1836_v38 = vmax.f32 %v1834_v11, %v1835_v8  ;;  %v1721_v29 = vadd.f32 %v1720_v21, %v4095_v22  ;;  %v2062_v28 = vrot.slane %v2061_v53, 4  ;;  %v2138_v21 = vrot.slane %v2137_v17, 1 }
 0x5ce   :  { %v3858_v48 = vpop.eup %2571  ;;  %v2128_v22 = vadd.f32 %v2127_v58, %v2126_v33  ;;  %v2118_v12 = vrot.slane %v2117_v14, 2 }
 0x5cf   :  { %v3863_v30 = vpop.eup %2573  ;;  %v2140_v55 = vsel %vm1583_vm5, %v3858_v48, 0.0  ;;  %v1923_v40 = vsub.f32 %v3796_v1, %v1836_v38  ;;  %v1924_v62 = vsub.f32 %v3803_v43, %v1836_v38  ;;  %v1838_v18 = vsel %vm1583_vm5, %v1721_v29, -inf }
 0x5d0   :  { %v2141_v45 = vsel %vm1583_vm5, %v3863_v30, 0.0  ;;  %v1839_v11 = vmax.f32 %v1837_v2, %v1838_v18  ;;  %v2043_v43 = vadd.f32 %v2042_v36, %v2041_v20  ;;  %v2063_v63 = vadd.f32 %v2062_v28, %v2061_v53 }
 0x5d1   :  { %v2142_v54 = vadd.f32 %v2141_v45, %v2140_v55  ;;  %v1969_v24 = vmul.f32 1.442695, %v1923_v40  ;;  %v1971_v46 = vmul.f32 1.442695, %v1924_v62  ;;  %v2054_v45 = vadd.f32 %v2053_v41, %v2052_v39 }
 0x5d2   :  { %v1840_v1 = vrot.slane %v1839_v11, 4  ;;  %v2044_v40 = vrot.slane %v2043_v43, 4  ;;  %v2064_v61 = vrot.slane %v2063_v63, 2  ;;  %v2139_v53 = vadd.f32 %v2138_v21, %v2137_v17 }
 0x5d3   :  { %v2143_v8 = vrot.slane %v2142_v54, 4  ;;  %2575 = vpow2.f32 %v1969_v24  ;;  %v2129_v36 = vrot.slane %v2128_v22, 1  ;;  %v2119_v18 = vadd.f32 %v2118_v12, %v2117_v14 }
 0x5d4   :  { %2577 = vpow2.f32 %v1971_v46  ;;  %v1841_v38 = vmax.f32 %v1839_v11, %v1840_v1  ;;  %v2055_v46 = vrot.slane %v2054_v45, 2 }
 0x5d5   :  { %v2144_v49 = vadd.f32 %v2143_v8, %v2142_v54  ;;  %v2045_v54 = vadd.f32 %v2044_v40, %v2043_v43  ;;  %2579 = vrcp.f32 %v2139_v53  ;;  %v2130_v8 = vadd.f32 %v2129_v36, %v2128_v22 }
 0x5d6   :  { %v1842_v55 = vrot.slane %v1841_v38, 2  ;;  %v2120_v17 = vrot.slane %v2119_v18, 1  ;;  %v2056_v12 = vadd.f32 %v2055_v46, %v2054_v45 }
 0x5d7   :  { %v2145_v7 = vrot.slane %v2144_v49, 2 }
 0x5d8   :  { %v1843_v13 = vmax.f32 %v1841_v38, %v1842_v55  ;;  %v2121_v43 = vadd.f32 %v2120_v17, %v2119_v18 }
 0x5d9   :  { %v3874_v62 = vpop.eup %2575  ;;  %v2146_v5 = vadd.f32 %v2145_v7, %v2144_v49  ;;  %v2065_v7 = vadd.f32 %v2064_v61, %v2063_v63  ;;  %v2046_v49 = vrot.slane %v2045_v54, 2 }
 0x5da   :  { %v3876_v27 = vpop.eup %2577  ;;  %v2068_v20 = vsel %vm1583_vm5, %v3874_v62, 0.0  ;;  %v1844_v2 = vrot.slane %v1843_v13, 1 }
 0x5db   :  { %v2147_v28 = vrot.slane %v2146_v5, 1  ;;  %v2069_v33 = vsel %vm1583_vm5, %v3876_v27, 0.0  ;;  %v2066_v56 = vrot.slane %v2065_v7, 1  ;;  %v2580_v40 = vpop.eup %2579 }
 0x5dc   :  { %v2070_v24 = vadd.f32 %v2069_v33, %v2068_v20  ;;  %v1845_v39 = vmax.f32 %v1843_v13, %v1844_v2  ;;  %v2194_v36 = vmul.f32 %v2580_v40, %v3805_v50 }
 0x5dd   :  { %v2148_v11 = vadd.f32 %v2147_v28, %v2146_v5  ;;  %v2067_v22 = vadd.f32 %v2066_v56, %v2065_v7  ;;  %v2057_v5 = vrot.slane %v2056_v12, 1 }
 0x5de   :  { %v2071_v58 = vrot.slane %v2070_v24, 4  ;;  %v1925_v1 = vsub.f32 %v3854_v16, %v1845_v39  ;;  %v1926_v41 = vsub.f32 %v1721_v29, %v1845_v39  ;;  %v2047_v16 = vadd.f32 %v2046_v49, %v2045_v54 }
 0x5df   :  { %2581 = vrcp.f32 %v2148_v11  ;;  %v2058_v2 = vadd.f32 %v2057_v5, %v2056_v12  ;;  %v2226_v46 = vmul.f32 %v2194_v36, %v3452_v44 }
 0x5e0   :  { %v2072_v38 = vadd.f32 %v2071_v58, %v2070_v24  ;;  %v1973_v21 = vmul.f32 1.442695, %v1925_v1  ;;  %v1975_v55 = vmul.f32 1.442695, %v1926_v41  ;;  %2583 = vrcp.f32 %v2130_v8 }
 0x5e1   :  { %v2048_v18 = vrot.slane %v2047_v16, 1 }
 0x5e2   :  { %v2073_v14 = vrot.slane %v2072_v38, 2  ;;  %2585 = vpow2.f32 %v1973_v21 }
 0x5e3   :  { %2587 = vpow2.f32 %v1975_v55  ;;  %v2049_v7 = vadd.f32 %v2048_v18, %v2047_v16  ;;  %v2220_v16 = vmul.f32 %v3755_v32, %v3452_v44  ;;  %v2218_v32 = vmul.f32 %v3724_v51, %v3452_v44 }
 0x5e4   :  { %v2074_v63 = vadd.f32 %v2073_v14, %v2072_v38  ;;  %2589 = vrcp.f32 %v2121_v43 }
 0x5e5   :  { %v2582_v61 = vpop.eup %2581  ;;  %2591 = vrcp.f32 %v2067_v22 }
 0x5e6   :  { %v2075_v29 = vrot.slane %v2074_v63, 1  ;;  %v2196_v13 = vmul.f32 %v2582_v61, %v3863_v30  ;;  %v2195_v20 = vmul.f32 %v2582_v61, %v3858_v48  ;;  %v2584_v53 = vpop.eup %2583  ;;  %v2193_v30 = vmul.f32 %v2580_v40, %v3800_v47 }
 0x5e7   :  { %v2192_v39 = vmul.f32 %v2584_v53, %v3811_v6  ;;  %v2191_v1 = vmul.f32 %v2584_v53, %v3798_v59 }
 0x5e8   :  { %v2228_v45 = vmul.f32 %v2196_v13, %v3452_v44  ;;  %v2076_v28 = vadd.f32 %v2075_v29, %v2074_v63  ;;  %v3887_v33 = vpop.eup %2585  ;;  %v2227_v48 = vmul.f32 %v2195_v20, %v3449_v35  ;;  %v2225_v8 = vmul.f32 %v2193_v30, %v3449_v35 }
 0x5e9   :  { %v3889_v56 = vpop.eup %2587  ;;  %v2077_v54 = vsel %vm1583_vm5, %v3887_v33, 0.0  ;;  %v2224_v49 = vmul.f32 %v2192_v39, %v3452_v44  ;;  %v2223_v12 = vmul.f32 %v2191_v1, %v3449_v35  ;;  %v2219_v20 = vmul.f32 %v3758_v60, %v3449_v35  ;;  %v2612_v39 = vld [vmem:[%s3996_s2 + $0x10] sm:$0xff] }
 0x5ea   :  { %2255 = vmatpush.msrb.mxu3 %v2228_v45  ;;  %2593 = vrcp.f32 %v2076_v28  ;;  %v2078_v50 = vsel %vm1583_vm5, %v3889_v56, 0.0  ;;  %v2590_v11 = vpop.eup %2589 }
 0x5eb   :  { %v2079_v24 = vadd.f32 %v2078_v50, %v2077_v54  ;;  %2595 = vrcp.f32 %v2058_v2  ;;  %v2592_v47 = vpop.eup %2591  ;;  %v2190_v38 = vmul.f32 %v2590_v11, %v3821_v34  ;;  %v2189_v14 = vmul.f32 %v2590_v11, %v3819_v3 }
 0x5ec   :  { %2256 = vmatpush.msrb.mxu3 %v2227_v48  ;;  %2597 = vrcp.f32 %v2049_v7  ;;  %v2178_v43 = vmul.f32 %v2592_v47, %v3841_v19  ;;  %v4096_v48 = vld [vmem:[#allocation25_spill] sm:$0xff] }
 0x5ed   :  { %v2080_v58 = vrot.slane %v2079_v24, 4  ;;  %v2222_v63 = vmul.f32 %v2190_v38, %v3452_v44  ;;  %v2221_v61 = vmul.f32 %v2189_v14, %v3449_v35  ;;  %v2199_v30 = vmul.f32 %v4096_v48, %v3449_v35 }
 0x5ee   :  { %2257 = vmatpush.msrb.mxu3 %v2226_v46  ;;  %v2210_v3 = vmul.f32 %v2178_v43, %v3452_v44  ;;  %v2610_v46 = vld [vmem:[%s3996_s2 + $0x18] sm:$0xff] }
 0x5ef   :  { %v2081_v17 = vadd.f32 %v2080_v58, %v2079_v24 }
 0x5f0   :  { %v2594_v41 = vpop.eup %2593  ;;  %2258 = vmatpush.msrb.mxu3 %v2225_v8 }
 0x5f1   :  { %v2180_v21 = vmul.f32 %v2594_v41, %v3876_v27  ;;  %v2179_v6 = vmul.f32 %v2594_v41, %v3874_v62  ;;  %v2082_v55 = vrot.slane %v2081_v17, 2  ;;  %v2596_v40 = vpop.eup %2595  ;;  %v2177_v62 = vmul.f32 %v2592_v47, %v3839_v15 }
 0x5f2   :  { %2259 = vmatpush.msrb.mxu3 %v2224_v49  ;;  %v2176_v5 = vmul.f32 %v2596_v40, %v3837_v26  ;;  %v2598_v19 = vpop.eup %2597  ;;  %v2175_v15 = vmul.f32 %v2596_v40, %v3835_v57  ;;  %v2217_v57 = vmul.f32 %v3729_v10, %v3449_v35  ;;  %v2204_v10 = vmul.f32 %v3777_v9, %v3452_v44  ;;  %v2609_v9 = vld [vmem:[%s3996_s2 + $0x8] sm:$0xff] }
 0x5f3   :  { %v2212_v59 = vmul.f32 %v2180_v21, %v3452_v44  ;;  %v2083_v34 = vadd.f32 %v2082_v55, %v2081_v17  ;;  %v2211_v27 = vmul.f32 %v2179_v6, %v3449_v35  ;;  %v2209_v13 = vmul.f32 %v2177_v62, %v3449_v35 }
 0x5f4   :  { %2260 = vmatpush.msrb.mxu3 %v2223_v12  ;;  %v2208_v53 = vmul.f32 %v2176_v5, %v3452_v44  ;;  %v2174_v26 = vmul.f32 %v2598_v19, %v3845_v0  ;;  %v2207_v45 = vmul.f32 %v2175_v15, %v3449_v35  ;;  %v2173_v36 = vmul.f32 %v2598_v19, %v3829_v31 }
 0x5f5   :  { %2232 = vmatpush.msra.mxu2 %v2212_v59  ;;  %v2084_v22 = vrot.slane %v2083_v34, 1  ;;  %v2216_v0 = vmul.f32 %v3639_v52, %v3452_v44  ;;  %v2215_v31 = vmul.f32 %v3642_v23, %v3449_v35  ;;  %v2203_v52 = vmul.f32 %v3780_v4, %v3449_v35 }
 0x5f6   :  { %2261 = vmatpush.msrb.mxu3 %v2222_v63  ;;  %v2206_v60 = vmul.f32 %v2174_v26, %v3452_v44  ;;  %v2205_v51 = vmul.f32 %v2173_v36, %v3449_v35  ;;  %v2202_v23 = vmul.f32 %v3745_v25, %v3452_v44  ;;  %v2200_v4 = vmul.f32 %v3698_v42, %v3452_v44  ;;  %v4097_v25 = vld [vmem:[#allocation28_spill] sm:$0xff]  ;;  %v2611_v42 = vld [vmem:[%s3996_s2] sm:$0xff] }
 0x5f7   :  { %2233 = vmatpush.msra.mxu2 %v2211_v27  ;;  %v2085_v29 = vadd.f32 %v2084_v22, %v2083_v34  ;;  %v2198_v50 = vmul.f32 %v4097_v25, %v3452_v44 }
 0x5f8   :  { %2262 = vmatpush.msrb.mxu3 %v2221_v61 }
 0x5f9   :  { %2234 = vmatpush.msra.mxu2 %v2210_v3  ;;  %2599 = vrcp.f32 %v2085_v29 }
 0x5fa   :  { %2263 = vmatpush.msrb.mxu3 %v2220_v16 }
 0x5fb   :  { %2235 = vmatpush.msra.mxu2 %v2209_v13 }
 0x5fc   :  { %2264 = vmatpush.msrb.mxu3 %v2219_v20 }
 0x5fd   :  { %2236 = vmatpush.msra.mxu2 %v2208_v53 }
 0x5fe   :  { %2265 = vmatpush.msrb.mxu3 %v2218_v32 }
 0x5ff   :  { %2237 = vmatpush.msra.mxu2 %v2207_v45  ;;  %v2600_v28 = vpop.eup %2599 }
 0x600   :  { %2266 = vmatpush.msrb.mxu3 %v2217_v57  ;;  %v2182_v2 = vmul.f32 %v2600_v28, %v3889_v56  ;;  %v2181_v18 = vmul.f32 %v2600_v28, %v3887_v33  ;;  %v2201_v33 = vmul.f32 %v3748_v37, %v3449_v35  ;;  %v4098_v37 = vld [vmem:[#allocation29_spill] sm:$0xff] }
 0x601   :  { %2238 = vmatpush.msra.mxu2 %v2206_v60  ;;  %v2197_v24 = vmul.f32 %v4098_v37, %v3449_v35 }
 0x602   :  { %2267 = vmatpush.msrb.mxu3 %v2216_v0  ;;  %v2214_v54 = vmul.f32 %v2182_v2, %v3452_v44  ;;  %v2213_v56 = vmul.f32 %v2181_v18, %v3449_v35  ;;  %v2404_v35 = vld [vmem:[%s4000_s10] ss:$0 sm:$0xff] }
 0x603   :  { %2239 = vmatpush.msra.mxu2 %v2205_v51 }
 0x604   :  { %2268 = vmatpush.msrb.mxu3 %v2215_v31 }
 0x605   :  { %2240 = vmatpush.msra.mxu2 %v2204_v10 }
 0x606   :  { %2269 = vmatpush.msrb.mxu3 %v2214_v54 }
 0x607   :  { %2241 = vmatpush.msra.mxu2 %v2203_v52 }
 0x608   :  { %2270 = vmatpush.msrb.mxu3 %v2213_v56 }
 0x609   :  { %2242 = vmatpush.msra.mxu2 %v2202_v23  ;;  %2271 = vmatmul.f32.vlgmr.msrb.gmra.mxu3 %v2609_v9 }
 0x60b   :  { %2243 = vmatpush.msra.mxu2 %v2201_v33 }
 0x60d   :  { %2244 = vmatpush.msra.mxu2 %v2200_v4 }
 0x60f   :  { %2245 = vmatpush.msra.mxu2 %v2199_v30 }
 0x611   :  { %2246 = vmatpush.msra.mxu2 %v2198_v50  ;;  %2274 = vmatmul.f32.gmra.mxu3 %v2610_v46 }
 0x613   :  { %2247 = vmatpush.msra.mxu2 %v2197_v24 }
 0x614   :  { %2248 = vmatmul.f32.vlgmr.msra.gmra.mxu2 %v2611_v42 }
 0x61c   :  { %2251 = vmatmul.f32.gmra.mxu2 %v2612_v39 }
 0x68c   :  { %v2272_v44 = vpop.f32.mrf.mxu3 }
 0x694   :  { %v2275_v47 = vpop.f32.mrf.mxu3 }
 0x697   :  { %v2249_v11 = vpop.f32.mrf.mxu2 }
 0x698   :  { %v2250_v7 = vadd.f32 %v2404_v35, %v2249_v11 }
 0x69a   :  { %v2273_v58 = vadd.f32 %v2272_v44, %v2250_v7 }
 0x69c   :  { %2278 = vst.msk [vmem:[%s4001_s11] sm:$0xff] %vm1583_vm5, %v2273_v58  ;;  %v2280_v8 = vsel %vm1583_vm5, %v2273_v58, -inf }
 0x69d   :  { %2281 = vmax.xlane.f32.xlu2 %v2280_v8 }
 0x69f   :  { %v2252_v1 = vpop.f32.mrf.mxu2 }
 0x6a0   :  { %v2253_v41 = vadd.f32 %v2404_v35, %v2252_v1 }
 0x6a2   :  { %v2276_v17 = vadd.f32 %v2275_v47, %v2253_v41 }
 0x6a4   :  { %2279 = vst.msk [vmem:[%s4001_s11 + $0x8] sm:$0xff] %vm1583_vm5, %v2276_v17  ;;  %v2283_v49 = vsel %vm1583_vm5, %v2276_v17, -inf }
 0x6a5   :  { %2284 = vmax.xlane.f32.xlu0 %v2283_v49 }
 0x710   :  { %v2282_v38 = vpop.xlane.xlu2 %2281 }
 0x711   :  { %v2286_v21 = vsub.f32 %v2273_v58, %v2282_v38 }
 0x713   :  { %v2288_v6 = vmul.f32 1.442695, %v2286_v21 }
 0x715   :  { %2601 = vpow2.f32 %v2288_v6 }
 0x718   :  { %v2285_v55 = vpop.xlane.xlu0 %2284 }
 0x719   :  { %v2287_v12 = vsub.f32 %v2276_v17, %v2285_v55 }
 0x71b   :  { %v2602_v14 = vpop.eup %2601  ;;  %v2290_v59 = vmul.f32 1.442695, %v2287_v12 }
 0x71c   :  { %v2292_v43 = vsel %vm1583_vm5, %v2602_v14, 0.0 }
 0x71d   :  { %2603 = vpow2.f32 %v2290_v59  ;;  %2293 = vadd.xlane.f32.xlu1 %v2292_v43 }
 0x723   :  { %v2604_v40 = vpop.eup %2603 }
 0x724   :  { %v2295_v63 = vsel %vm1583_vm5, %v2604_v40, 0.0 }
 0x725   :  { %2296 = vadd.xlane.f32.xlu2 %v2295_v63 }
 0x790   :  { %v2294_v34 = vpop.xlane.xlu1 %2293 }
 0x791   :  { %2605 = vlog2.f32 %v2294_v34 }
 0x797   :  { %v2606_v27 = vpop.eup %2605 }
 0x798   :  { %v2299_v62 = vmul.f32 0.6931472, %v2606_v27  ;;  %v2297_v61 = vpop.xlane.xlu2 %2296 }
 0x799   :  { %2607 = vlog2.f32 %v2297_v61 }
 0x79a   :  { %v2302_v22 = vsub.f32 %v2286_v21, %v2299_v62 }
 0x79c   :  { %2304 = vst.msk [vmem:[%s4002_s12] sm:$0xff] %vm1583_vm5, %v2302_v22 }
 0x79f   :  { %v2608_v3 = vpop.eup %2607 }
 0x7a0   :  { %v2301_v5 = vmul.f32 0.6931472, %v2608_v3 }
 0x7a2   :  { %v2303_v19 = vsub.f32 %v2287_v12, %v2301_v5 }
 0x7a4   :  { %2305 = vst.msk [vmem:[%s4002_s12 + $0x8] sm:$0xff] %vm1583_vm5, %v2303_v19 }

</bundles_post_ra>
